<compile_context>
chip_gen: v7x
topology: tpu7x:2x2x1
jax: 0.10.0
libtpu: 0.0.40
codegen_flags: <defaults>
</compile_context>

<pallas_src>
import functools

import jax
import jax.numpy as jnp
from jax.experimental import pallas as pl
from jax.experimental.pallas import tpu as pltpu

# Geometry fixed by the module: fc_map expects 4356 = 4 * 33 * 33 features.
OUTW = 33                        # conv output height/width (k=3, stride 1, pad 1)
PADW = OUTW + 2                  # 35   padded height/width
NP = PADW * PADW                 # 1225 flattened padded map length
NQ = (OUTW - 1) * PADW + OUTW    # 1153 flattened output span (stride-35 layout)


# -----------------------------------------------------------------------------
# Fused kernel: one grid step == one batch element
# -----------------------------------------------------------------------------
def _actor_fused_kernel(
    xf_ref,    # (1, 1, F)      float-branch input row
    xm_ref,    # (1, Cin, NP)   zero-padded map, channel-major, spatially flattened
    mask_ref,  # (1, NQ)        1.0 where q % 35 < 33 (valid column) else 0.0
    w1_ref,    # (9, C1, Cin)   conv1 taps, k = 3*dy + dx
    b1_ref,    # (C1, 1)
    w2_ref,    # (9, C2, C1)
    b2_ref,    # (C2, 1)
    wfc_ref,   # (C2, NQ, 32)   fc_map weight with NCHW flatten + stride-35 folded in
    bfc_ref,   # (1, 32)
    wf_ref,    # (F, 32)        float_layer
    bf_ref,    # (1, 32)
    wc_ref,    # (64, 64)       fc_combined
    bc_ref,    # (1, 64)
    wh_ref,    # (64, A0+A1)    fc_move_or_not | fc_rotate, concatenated
    bh_ref,    # (1, A0+A1)
    om_ref,    # out (1, 1, A0)
    or_ref,    # out (1, 1, A1)
    p2_ref,    # scratch (C1, NP): zero-padded conv1 activation (conv2 input)
):
    f32 = jnp.float32
    mask = mask_ref[...]                       # (1, NQ)
    xm = xm_ref[0]                             # (Cin, NP)

    # ---- conv1: 3x3 / pad 1 as 9 shift-and-accumulate MXU matmuls ------------
    acc1 = jnp.zeros((w1_ref.shape[1], NQ), f32)
    for k in range(9):
        dy, dx = k // 3, k % 3
        sh = dy * PADW + dx
        acc1 = acc1 + jnp.dot(w1_ref[k], xm[:, sh:sh + NQ],
                              preferred_element_type=f32)
    h1 = jnp.maximum(acc1 + b1_ref[...], 0.0) * mask   # zero the wrap columns

    # conv2 input: zero ring + interior, still in the flat stride-35 layout.
    off = PADW + 1                                      # 36 = one row + one col
    p2_ref[...] = jnp.zeros(p2_ref.shape, f32)
    p2_ref[:, off:off + NQ] = h1

    # ---- conv2 ----------------------------------------------------------------
    acc2 = jnp.zeros((w2_ref.shape[1], NQ), f32)
    for k in range(9):
        dy, dx = k // 3, k % 3
        sh = dy * PADW + dx
        acc2 = acc2 + jnp.dot(w2_ref[k], p2_ref[:, sh:sh + NQ],
                              preferred_element_type=f32)
    h2 = jnp.maximum(acc2 + b2_ref[...], 0.0)  # (C2, NQ); wrap cols hit zero weights

    # ---- fc_map (wrap columns removed by zero rows of the expanded weight) ----
    x2 = bfc_ref[...]                          # (1, 32)
    for c in range(h2.shape[0]):
        x2 = x2 + jnp.dot(h2[c:c + 1, :], wfc_ref[c], preferred_element_type=f32)
    x2 = jnp.maximum(x2, 0.0)

    # ---- float branch ----------------------------------------------------------
    x1 = jnp.dot(xf_ref[0], wf_ref[...], preferred_element_type=f32) + bf_ref[...]
    x1 = jnp.maximum(x1, 0.0)                  # (1, 32)

    # ---- fc_combined: torch.cat((x1, x2)) folded into a split weight -----------
    n1 = wf_ref.shape[1]
    xc = jnp.dot(x1, wc_ref[0:n1, :], preferred_element_type=f32)
    xc = xc + jnp.dot(x2, wc_ref[n1:wc_ref.shape[0], :], preferred_element_type=f32)
    xc = jnp.maximum(xc + bc_ref[...], 0.0)    # (1, 64)

    # ---- heads: one matmul, split, softmax along lanes --------------------------
    logits = jnp.dot(xc, wh_ref[...], preferred_element_type=f32) + bh_ref[...]
    a0 = om_ref.shape[2]
    a1 = or_ref.shape[2]

    def _softmax(l):
        m = jnp.max(l, axis=1, keepdims=True)
        e = jnp.exp(l - m)
        return e / jnp.sum(e, axis=1, keepdims=True)

    om_ref[0] = _softmax(logits[:, 0:a0]).astype(om_ref.dtype)
    or_ref[0] = _softmax(logits[:, a0:a0 + a1]).astype(or_ref.dtype)


# -----------------------------------------------------------------------------
# pallas_call wrapper
# -----------------------------------------------------------------------------
def _actor_pallas_call(xf, xm, prep, a0, a1):
    B, _, F = xf.shape
    Cin = xm.shape[1]
    c1 = prep["w1"].shape[1]

    c3 = lambda i: (0, 0, 0)   # constant (weight) blocks: fetched once, stay in VMEM
    c2 = lambda i: (0, 0)

    in_specs = [
        pl.BlockSpec((1, 1, F), lambda i: (i, 0, 0)),       # xf: one row per step
        pl.BlockSpec((1, Cin, NP), lambda i: (i, 0, 0)),    # xm: one image per step
        pl.BlockSpec(prep["colmask"].shape, c2),
        pl.BlockSpec(prep["w1"].shape, c3),
        pl.BlockSpec(prep["b1"].shape, c2),
        pl.BlockSpec(prep["w2"].shape, c3),
        pl.BlockSpec(prep["b2"].shape, c2),
        pl.BlockSpec(prep["wfc"].shape, c3),
        pl.BlockSpec(prep["bfc"].shape, c2),
        pl.BlockSpec(prep["wf"].shape, c2),
        pl.BlockSpec(prep["bf"].shape, c2),
        pl.BlockSpec(prep["wc"].shape, c2),
        pl.BlockSpec(prep["bc"].shape, c2),
        pl.BlockSpec(prep["wh"].shape, c2),
        pl.BlockSpec(prep["bh"].shape, c2),
    ]
    out_specs = (
        pl.BlockSpec((1, 1, a0), lambda i: (i, 0, 0)),
        pl.BlockSpec((1, 1, a1), lambda i: (i, 0, 0)),
    )
    out_shape = (
        jax.ShapeDtypeStruct((B, 1, a0), jnp.float32),
        jax.ShapeDtypeStruct((B, 1, a1), jnp.float32),
    )

    om, orot = pl.pallas_call(
        _actor_fused_kernel,
        out_shape=out_shape,
        grid=(B,),
        in_specs=in_specs,
        out_specs=out_specs,
        scratch_shapes=[pltpu.VMEM((c1, NP), jnp.float32)],
        compiler_params=pltpu.CompilerParams(
            # Tiny per-step working set; keep the whole forward on one TensorCore.
            dimension_semantics=("arbitrary",),
        ),
    )(
        xf, xm, prep["colmask"],
        prep["w1"], prep["b1"], prep["w2"], prep["b2"],
        prep["wfc"], prep["bfc"], prep["wf"], prep["bf"],
        prep["wc"], prep["bc"], prep["wh"], prep["bh"],
    )
    return om.reshape(B, a0), orot.reshape(B, a1)


# -----------------------------------------------------------------------------
# Parameters: init (PyTorch-style) + one-time layout folding
# -----------------------------------------------------------------------------
def init_actor_params(key, state_dim, action_dim):
    float_dim = state_dim[0]
    map_c = state_dim[1][0]
    ks = jax.random.split(key, 14)

    def lin(kw, kb, fan_in, fan_out):
        s = 1.0 / jnp.sqrt(jnp.float32(fan_in))
        w = jax.random.uniform(kw, (fan_in, fan_out), jnp.float32, -s, s)
        b = jax.random.uniform(kb, (fan_out,), jnp.float32, -s, s)
        return w, b

    def conv(kw, kb, cin, cout):
        s = 1.0 / jnp.sqrt(jnp.float32(cin * 9))
        w = jax.random.uniform(kw, (cout, cin, 3, 3), jnp.float32, -s, s)
        b = jax.random.uniform(kb, (cout,), jnp.float32, -s, s)
        return w, b

    p = {}
    p["float_w"], p["float_b"] = lin(ks[0], ks[1], float_dim, 32)
    p["conv1_w"], p["conv1_b"] = conv(ks[2], ks[3], map_c, 8)
    p["conv2_w"], p["conv2_b"] = conv(ks[4], ks[5], 8, 4)
    p["fcmap_w"], p["fcmap_b"] = lin(ks[6], ks[7], 4 * 33 * 33, 32)   # 4356
    p["fccomb_w"], p["fccomb_b"] = lin(ks[8], ks[9], 64, 64)
    p["move_w"], p["move_b"] = lin(ks[10], ks[11], 64, action_dim[0])
    p["rot_w"], p["rot_b"] = lin(ks[12], ks[13], 64, action_dim[1])
    return p


def prepare_actor_params(p):
    """One-time weight re-layout (runs outside the per-call hot path)."""
    c1, cin = p["conv1_w"].shape[0], p["conv1_w"].shape[1]
    c2 = p["conv2_w"].shape[0]
    nf = p["fcmap_w"].shape[1]
    # fc_map weight: fold (a) PyTorch's NCHW flatten order and (b) the kernel's
    # stride-35 flat spatial layout (zeros at the two wrap columns per row).
    wfc = p["fcmap_w"].reshape(c2, OUTW, OUTW, nf)
    wfc = jnp.pad(wfc, ((0, 0), (0, 0), (0, PADW - OUTW), (0, 0)))
    wfc = wfc.reshape(c2, OUTW * PADW, nf)[:, :NQ, :]
    return {
        # conv taps: w[k = 3*dy + dx] = W[:, :, dy, dx]  ->  (9, Cout, Cin)
        "w1": jnp.transpose(p["conv1_w"], (2, 3, 0, 1)).reshape(9, c1, cin),
        "b1": p["conv1_b"].reshape(c1, 1),
        "w2": jnp.transpose(p["conv2_w"], (2, 3, 0, 1)).reshape(9, c2, c1),
        "b2": p["conv2_b"].reshape(c2, 1),
        "wfc": wfc,
        "bfc": p["fcmap_b"].reshape(1, -1),
        "wf": p["float_w"],
        "bf": p["float_b"].reshape(1, -1),
        "wc": p["fccomb_w"],
        "bc": p["fccomb_b"].reshape(1, -1),
        # both heads fused into a single matmul
        "wh": jnp.concatenate([p["move_w"], p["rot_w"]], axis=1),
        "bh": jnp.concatenate([p["move_b"], p["rot_b"]]).reshape(1, -1),
        # valid-column mask for the stride-35 flattened conv layout
        "colmask": ((jnp.arange(NQ, dtype=jnp.int32) % PADW) < OUTW)
        .astype(jnp.float32)
        .reshape(1, NQ),
    }


# -----------------------------------------------------------------------------
# Forward (wrapper) and pure-JAX reference
# -----------------------------------------------------------------------------
def actor_forward(prep, state_float, state_map, *, action_dim):
    a0, a1 = action_dim
    x1 = state_float
    if x1.ndim == 1:
        x1 = x1[None, :]
    xmap = state_map
    if xmap.ndim == 3:
        xmap = xmap[None]
    B = x1.shape[0]
    Cin = xmap.shape[1]
    # pad=1 and flatten HW (channel-major) -> (B, Cin, 1225); tiny XLA-side glue.
    xm = jnp.pad(xmap, ((0, 0), (0, 0), (1, 1), (1, 1))).reshape(B, Cin, NP)
    xf = x1.reshape(B, 1, x1.shape[-1])
    return _actor_pallas_call(xf.astype(jnp.float32), xm.astype(jnp.float32),
                              prep, a0, a1)


def actor_reference(p, state_float, state_map):
    """Pure-JAX reference with the PyTorch module's semantics (f32)."""
    hp = jax.lax.Precision.HIGHEST
    x1 = state_float
    if x1.ndim == 1:
        x1 = x1[None, :]
    x1 = jax.nn.relu(jnp.dot(x1, p["float_w"], precision=hp) + p["float_b"])
    dn = ("NCHW", "OIHW", "NCHW")
    x2 = jax.lax.conv_general_dilated(state_map, p["conv1_w"], (1, 1),
                                      ((1, 1), (1, 1)), dimension_numbers=dn,
                                      precision=hp)
    x2 = jax.nn.relu(x2 + p["conv1_b"][None, :, None, None])
    x2 = jax.lax.conv_general_dilated(x2, p["conv2_w"], (1, 1),
                                      ((1, 1), (1, 1)), dimension_numbers=dn,
                                      precision=hp)
    x2 = jax.nn.relu(x2 + p["conv2_b"][None, :, None, None])
    x2 = x2.reshape(x2.shape[0], -1)
    x2 = jax.nn.relu(jnp.dot(x2, p["fcmap_w"], precision=hp) + p["fcmap_b"])
    x = jnp.concatenate([x1, x2], axis=1)
    x = jax.nn.relu(jnp.dot(x, p["fccomb_w"], precision=hp) + p["fccomb_b"])
    lm = jnp.dot(x, p["move_w"], precision=hp) + p["move_b"]
    lr = jnp.dot(x, p["rot_w"], precision=hp) + p["rot_b"]
    return jax.nn.softmax(lm, axis=1), jax.nn.softmax(lr, axis=1)


# -----------------------------------------------------------------------------
# Main
# -----------------------------------------------------------------------------
if __name__ == "__main__":
    # state_dim = (float_dim, (map_channels, 33, 33)); 33x33 forced by fc_map's 4356.
    state_dim = (8, (4, 33, 33))
    action_dim = (2, 4)
    batch = 2

    key = jax.random.PRNGKey(0)
    k_param, k_f, k_m = jax.random.split(key, 3)

    params = init_actor_params(k_param, state_dim, action_dim)
    prep = prepare_actor_params(params)          # one-time weight re-layout

    state_float = jax.random.normal(k_f, (batch, state_dim[0]), jnp.float32)
    state_map = jax.random.normal(k_m, (batch,) + state_dim[1], jnp.float32)  # NCHW

    fwd = jax.jit(functools.partial(actor_forward, action_dim=action_dim))
    out_move, out_rotate = fwd(prep, state_float, state_map)
    jax.block_until_ready((out_move, out_rotate))

    # shape & normalisation checks
    assert out_move.shape == (batch, action_dim[0])
    assert out_rotate.shape == (batch, action_dim[1])
    assert jnp.allclose(jnp.sum(out_move, axis=1), 1.0, atol=1e-5)
    assert jnp.allclose(jnp.sum(out_rotate, axis=1), 1.0, atol=1e-5)

    # numerical check against the pure-JAX reference of the PyTorch module
    ref_move, ref_rot = actor_reference(params, state_float, state_map)
    err = max(float(jnp.max(jnp.abs(out_move - ref_move))),
              float(jnp.max(jnp.abs(out_rotate - ref_rot))))
    assert err < 5e-4, f"max abs error vs reference: {err}"

    print("KERNEL_OK")
</pallas_src>

<mosaic_0001>
module attributes {stable_mosaic.version = 11 : i64} {
  func.func @_actor_fused_kernel(%arg0: i32, %arg1: memref<1x1x8xf32, #tpu.memory_space<vmem>>, %arg2: memref<1x4x1225xf32, #tpu.memory_space<vmem>>, %arg3: memref<1x1153xf32, #tpu.memory_space<vmem>>, %arg4: memref<9x8x4xf32, #tpu.memory_space<vmem>>, %arg5: memref<8x1xf32, #tpu.memory_space<vmem>>, %arg6: memref<9x4x8xf32, #tpu.memory_space<vmem>>, %arg7: memref<4x1xf32, #tpu.memory_space<vmem>>, %arg8: memref<4x1153x32xf32, #tpu.memory_space<vmem>>, %arg9: memref<1x32xf32, #tpu.memory_space<vmem>>, %arg10: memref<8x32xf32, #tpu.memory_space<vmem>>, %arg11: memref<1x32xf32, #tpu.memory_space<vmem>>, %arg12: memref<64x64xf32, #tpu.memory_space<vmem>>, %arg13: memref<1x64xf32, #tpu.memory_space<vmem>>, %arg14: memref<64x6xf32, #tpu.memory_space<vmem>>, %arg15: memref<1x6xf32, #tpu.memory_space<vmem>>, %arg16: memref<1x1x2xf32, #tpu.memory_space<vmem>>, %arg17: memref<1x1x4xf32, #tpu.memory_space<vmem>>, %arg18: memref<8x1225xf32, #tpu.memory_space<vmem>>) attributes {dimension_semantics = [#tpu.dimension_semantics<arbitrary>], iteration_bounds = array<i64: 2>, scalar_prefetch = 0 : i64, scratch_operands = 1 : i64, tpu.core_type = #tpu.core_type<tc>, window_params = [{transform_indices = @transform_0, window_bounds = array<i64: 1, 1, 8>}, {transform_indices = @transform_1, window_bounds = array<i64: 1, 4, 1225>}, {pipeline_mode = #tpu.pipeline_mode<synchronous>, transform_indices = @transform_2, window_bounds = array<i64: 1, 1153>}, {pipeline_mode = #tpu.pipeline_mode<synchronous>, transform_indices = @transform_3, window_bounds = array<i64: 9, 8, 4>}, {pipeline_mode = #tpu.pipeline_mode<synchronous>, transform_indices = @transform_4, window_bounds = array<i64: 8, 1>}, {pipeline_mode = #tpu.pipeline_mode<synchronous>, transform_indices = @transform_5, window_bounds = array<i64: 9, 4, 8>}, {pipeline_mode = #tpu.pipeline_mode<synchronous>, transform_indices = @transform_6, window_bounds = array<i64: 4, 1>}, {pipeline_mode = #tpu.pipeline_mode<synchronous>, transform_indices = @transform_7, window_bounds = array<i64: 4, 1153, 32>}, {pipeline_mode = #tpu.pipeline_mode<synchronous>, transform_indices = @transform_8, window_bounds = array<i64: 1, 32>}, {pipeline_mode = #tpu.pipeline_mode<synchronous>, transform_indices = @transform_9, window_bounds = array<i64: 8, 32>}, {pipeline_mode = #tpu.pipeline_mode<synchronous>, transform_indices = @transform_10, window_bounds = array<i64: 1, 32>}, {pipeline_mode = #tpu.pipeline_mode<synchronous>, transform_indices = @transform_11, window_bounds = array<i64: 64, 64>}, {pipeline_mode = #tpu.pipeline_mode<synchronous>, transform_indices = @transform_12, window_bounds = array<i64: 1, 64>}, {pipeline_mode = #tpu.pipeline_mode<synchronous>, transform_indices = @transform_13, window_bounds = array<i64: 64, 6>}, {pipeline_mode = #tpu.pipeline_mode<synchronous>, transform_indices = @transform_14, window_bounds = array<i64: 1, 6>}, {transform_indices = @transform_15, window_bounds = array<i64: 1, 1, 2>}, {transform_indices = @transform_16, window_bounds = array<i64: 1, 1, 4>}]} {
    %c0 = arith.constant 0 : index
    %c0_0 = arith.constant 0 : index
    %0 = vector.load %arg3[%c0, %c0_0] : memref<1x1153xf32, #tpu.memory_space<vmem>>, vector<1x1153xf32>
    %c0_1 = arith.constant 0 : index
    %c0_2 = arith.constant 0 : index
    %c0_3 = arith.constant 0 : index
    %1 = vector.load %arg2[%c0_1, %c0_2, %c0_3] : memref<1x4x1225xf32, #tpu.memory_space<vmem>>, vector<1x4x1225xf32>
    %2 = vector.shape_cast %1 : vector<1x4x1225xf32> to vector<4x1225xf32>
    %cst = arith.constant 0.000000e+00 : f32
    %3 = vector.broadcast %cst : f32 to vector<8x1153xf32>
    %c0_4 = arith.constant 0 : index
    %c0_5 = arith.constant 0 : index
    %c0_6 = arith.constant 0 : index
    %4 = vector.load %arg4[%c0_4, %c0_5, %c0_6] : memref<9x8x4xf32, #tpu.memory_space<vmem>>, vector<1x8x4xf32>
    %5 = vector.shape_cast %4 : vector<1x8x4xf32> to vector<8x4xf32>
    %6 = vector.extract_strided_slice %2 {offsets = [0, 0], sizes = [4, 1153], strides = [1, 1]} : vector<4x1225xf32> to vector<4x1153xf32>
    %cst_7 = arith.constant dense<0.000000e+00> : vector<8x1153xf32>
    %7 = tpu.matmul %5, %6, %cst_7 {dimension_numbers = #tpu.dot_dimension_numbers<[1], [0], [0], [1], [0, 0, 1, 1], [], []>} : vector<8x4xf32>, vector<4x1153xf32>, vector<8x1153xf32> -> vector<8x1153xf32>
    %8 = arith.addf %3, %7 : vector<8x1153xf32>
    %c1 = arith.constant 1 : index
    %c0_8 = arith.constant 0 : index
    %c0_9 = arith.constant 0 : index
    %9 = vector.load %arg4[%c1, %c0_8, %c0_9] : memref<9x8x4xf32, #tpu.memory_space<vmem>>, vector<1x8x4xf32>
    %10 = vector.shape_cast %9 : vector<1x8x4xf32> to vector<8x4xf32>
    %11 = vector.extract_strided_slice %2 {offsets = [0, 1], sizes = [4, 1153], strides = [1, 1]} : vector<4x1225xf32> to vector<4x1153xf32>
    %cst_10 = arith.constant dense<0.000000e+00> : vector<8x1153xf32>
    %12 = tpu.matmul %10, %11, %cst_10 {dimension_numbers = #tpu.dot_dimension_numbers<[1], [0], [0], [1], [0, 0, 1, 1], [], []>} : vector<8x4xf32>, vector<4x1153xf32>, vector<8x1153xf32> -> vector<8x1153xf32>
    %13 = arith.addf %8, %12 : vector<8x1153xf32>
    %c2 = arith.constant 2 : index
    %c0_11 = arith.constant 0 : index
    %c0_12 = arith.constant 0 : index
    %14 = vector.load %arg4[%c2, %c0_11, %c0_12] : memref<9x8x4xf32, #tpu.memory_space<vmem>>, vector<1x8x4xf32>
    %15 = vector.shape_cast %14 : vector<1x8x4xf32> to vector<8x4xf32>
    %16 = vector.extract_strided_slice %2 {offsets = [0, 2], sizes = [4, 1153], strides = [1, 1]} : vector<4x1225xf32> to vector<4x1153xf32>
    %cst_13 = arith.constant dense<0.000000e+00> : vector<8x1153xf32>
    %17 = tpu.matmul %15, %16, %cst_13 {dimension_numbers = #tpu.dot_dimension_numbers<[1], [0], [0], [1], [0, 0, 1, 1], [], []>} : vector<8x4xf32>, vector<4x1153xf32>, vector<8x1153xf32> -> vector<8x1153xf32>
    %18 = arith.addf %13, %17 : vector<8x1153xf32>
    %c3 = arith.constant 3 : index
    %c0_14 = arith.constant 0 : index
    %c0_15 = arith.constant 0 : index
    %19 = vector.load %arg4[%c3, %c0_14, %c0_15] : memref<9x8x4xf32, #tpu.memory_space<vmem>>, vector<1x8x4xf32>
    %20 = vector.shape_cast %19 : vector<1x8x4xf32> to vector<8x4xf32>
    %21 = vector.extract_strided_slice %2 {offsets = [0, 35], sizes = [4, 1153], strides = [1, 1]} : vector<4x1225xf32> to vector<4x1153xf32>
    %cst_16 = arith.constant dense<0.000000e+00> : vector<8x1153xf32>
    %22 = tpu.matmul %20, %21, %cst_16 {dimension_numbers = #tpu.dot_dimension_numbers<[1], [0], [0], [1], [0, 0, 1, 1], [], []>} : vector<8x4xf32>, vector<4x1153xf32>, vector<8x1153xf32> -> vector<8x1153xf32>
    %23 = arith.addf %18, %22 : vector<8x1153xf32>
    %c4 = arith.constant 4 : index
    %c0_17 = arith.constant 0 : index
    %c0_18 = arith.constant 0 : index
    %24 = vector.load %arg4[%c4, %c0_17, %c0_18] : memref<9x8x4xf32, #tpu.memory_space<vmem>>, vector<1x8x4xf32>
    %25 = vector.shape_cast %24 : vector<1x8x4xf32> to vector<8x4xf32>
    %26 = vector.extract_strided_slice %2 {offsets = [0, 36], sizes = [4, 1153], strides = [1, 1]} : vector<4x1225xf32> to vector<4x1153xf32>
    %cst_19 = arith.constant dense<0.000000e+00> : vector<8x1153xf32>
    %27 = tpu.matmul %25, %26, %cst_19 {dimension_numbers = #tpu.dot_dimension_numbers<[1], [0], [0], [1], [0, 0, 1, 1], [], []>} : vector<8x4xf32>, vector<4x1153xf32>, vector<8x1153xf32> -> vector<8x1153xf32>
    %28 = arith.addf %23, %27 : vector<8x1153xf32>
    %c5 = arith.constant 5 : index
    %c0_20 = arith.constant 0 : index
    %c0_21 = arith.constant 0 : index
    %29 = vector.load %arg4[%c5, %c0_20, %c0_21] : memref<9x8x4xf32, #tpu.memory_space<vmem>>, vector<1x8x4xf32>
    %30 = vector.shape_cast %29 : vector<1x8x4xf32> to vector<8x4xf32>
    %31 = vector.extract_strided_slice %2 {offsets = [0, 37], sizes = [4, 1153], strides = [1, 1]} : vector<4x1225xf32> to vector<4x1153xf32>
    %cst_22 = arith.constant dense<0.000000e+00> : vector<8x1153xf32>
    %32 = tpu.matmul %30, %31, %cst_22 {dimension_numbers = #tpu.dot_dimension_numbers<[1], [0], [0], [1], [0, 0, 1, 1], [], []>} : vector<8x4xf32>, vector<4x1153xf32>, vector<8x1153xf32> -> vector<8x1153xf32>
    %33 = arith.addf %28, %32 : vector<8x1153xf32>
    %c6 = arith.constant 6 : index
    %c0_23 = arith.constant 0 : index
    %c0_24 = arith.constant 0 : index
    %34 = vector.load %arg4[%c6, %c0_23, %c0_24] : memref<9x8x4xf32, #tpu.memory_space<vmem>>, vector<1x8x4xf32>
    %35 = vector.shape_cast %34 : vector<1x8x4xf32> to vector<8x4xf32>
    %36 = vector.extract_strided_slice %2 {offsets = [0, 70], sizes = [4, 1153], strides = [1, 1]} : vector<4x1225xf32> to vector<4x1153xf32>
    %cst_25 = arith.constant dense<0.000000e+00> : vector<8x1153xf32>
    %37 = tpu.matmul %35, %36, %cst_25 {dimension_numbers = #tpu.dot_dimension_numbers<[1], [0], [0], [1], [0, 0, 1, 1], [], []>} : vector<8x4xf32>, vector<4x1153xf32>, vector<8x1153xf32> -> vector<8x1153xf32>
    %38 = arith.addf %33, %37 : vector<8x1153xf32>
    %c7 = arith.constant 7 : index
    %c0_26 = arith.constant 0 : index
    %c0_27 = arith.constant 0 : index
    %39 = vector.load %arg4[%c7, %c0_26, %c0_27] : memref<9x8x4xf32, #tpu.memory_space<vmem>>, vector<1x8x4xf32>
    %40 = vector.shape_cast %39 : vector<1x8x4xf32> to vector<8x4xf32>
    %41 = vector.extract_strided_slice %2 {offsets = [0, 71], sizes = [4, 1153], strides = [1, 1]} : vector<4x1225xf32> to vector<4x1153xf32>
    %cst_28 = arith.constant dense<0.000000e+00> : vector<8x1153xf32>
    %42 = tpu.matmul %40, %41, %cst_28 {dimension_numbers = #tpu.dot_dimension_numbers<[1], [0], [0], [1], [0, 0, 1, 1], [], []>} : vector<8x4xf32>, vector<4x1153xf32>, vector<8x1153xf32> -> vector<8x1153xf32>
    %43 = arith.addf %38, %42 : vector<8x1153xf32>
    %c8 = arith.constant 8 : index
    %c0_29 = arith.constant 0 : index
    %c0_30 = arith.constant 0 : index
    %44 = vector.load %arg4[%c8, %c0_29, %c0_30] : memref<9x8x4xf32, #tpu.memory_space<vmem>>, vector<1x8x4xf32>
    %45 = vector.shape_cast %44 : vector<1x8x4xf32> to vector<8x4xf32>
    %46 = vector.extract_strided_slice %2 {offsets = [0, 72], sizes = [4, 1153], strides = [1, 1]} : vector<4x1225xf32> to vector<4x1153xf32>
    %cst_31 = arith.constant dense<0.000000e+00> : vector<8x1153xf32>
    %47 = tpu.matmul %45, %46, %cst_31 {dimension_numbers = #tpu.dot_dimension_numbers<[1], [0], [0], [1], [0, 0, 1, 1], [], []>} : vector<8x4xf32>, vector<4x1153xf32>, vector<8x1153xf32> -> vector<8x1153xf32>
    %48 = arith.addf %43, %47 : vector<8x1153xf32>
    %c0_32 = arith.constant 0 : index
    %c0_33 = arith.constant 0 : index
    %49 = vector.load %arg5[%c0_32, %c0_33] : memref<8x1xf32, #tpu.memory_space<vmem>>, vector<8x1xf32>
    %50 = vector.broadcast %49 : vector<8x1xf32> to vector<8x1153xf32>
    %51 = arith.addf %48, %50 : vector<8x1153xf32>
    %cst_34 = arith.constant 0.000000e+00 : f32
    %52 = vector.broadcast %cst_34 : f32 to vector<8x1153xf32>
    %53 = arith.maximumf %51, %52 : vector<8x1153xf32>
    %54 = vector.broadcast %0 : vector<1x1153xf32> to vector<8x1153xf32>
    %55 = arith.mulf %53, %54 : vector<8x1153xf32>
    %cst_35 = arith.constant 0.000000e+00 : f32
    %56 = vector.broadcast %cst_35 : f32 to vector<8x1225xf32>
    %c0_36 = arith.constant 0 : index
    %c0_37 = arith.constant 0 : index
    %57 = vector.load %arg18[%c0_36, %c0_37] : memref<8x1225xf32, #tpu.memory_space<vmem>>, vector<8x1225xf32>
    tpu.vector_store %arg18[%c0_36, %c0_37], %56 {strides = array<i32>} : memref<8x1225xf32, #tpu.memory_space<vmem>>, vector<8x1225xf32>,
    %c0_38 = arith.constant 0 : index
    %c36 = arith.constant 36 : index
    %58 = vector.load %arg18[%c0_38, %c36] : memref<8x1225xf32, #tpu.memory_space<vmem>>, vector<8x1153xf32>
    tpu.vector_store %arg18[%c0_38, %c36], %55 {strides = array<i32>} : memref<8x1225xf32, #tpu.memory_space<vmem>>, vector<8x1153xf32>,
    %cst_39 = arith.constant 0.000000e+00 : f32
    %59 = vector.broadcast %cst_39 : f32 to vector<4x1153xf32>
    %c0_40 = arith.constant 0 : index
    %c0_41 = arith.constant 0 : index
    %c0_42 = arith.constant 0 : index
    %60 = vector.load %arg6[%c0_40, %c0_41, %c0_42] : memref<9x4x8xf32, #tpu.memory_space<vmem>>, vector<1x4x8xf32>
    %61 = vector.shape_cast %60 : vector<1x4x8xf32> to vector<4x8xf32>
    %c0_43 = arith.constant 0 : index
    %c0_44 = arith.constant 0 : index
    %62 = vector.load %arg18[%c0_43, %c0_44] : memref<8x1225xf32, #tpu.memory_space<vmem>>, vector<8x1153xf32>
    %cst_45 = arith.constant dense<0.000000e+00> : vector<4x1153xf32>
    %63 = tpu.matmul %61, %62, %cst_45 {dimension_numbers = #tpu.dot_dimension_numbers<[1], [0], [0], [1], [0, 0, 1, 1], [], []>} : vector<4x8xf32>, vector<8x1153xf32>, vector<4x1153xf32> -> vector<4x1153xf32>
    %64 = arith.addf %59, %63 : vector<4x1153xf32>
    %c1_46 = arith.constant 1 : index
    %c0_47 = arith.constant 0 : index
    %c0_48 = arith.constant 0 : index
    %65 = vector.load %arg6[%c1_46, %c0_47, %c0_48] : memref<9x4x8xf32, #tpu.memory_space<vmem>>, vector<1x4x8xf32>
    %66 = vector.shape_cast %65 : vector<1x4x8xf32> to vector<4x8xf32>
    %c0_49 = arith.constant 0 : index
    %c1_50 = arith.constant 1 : index
    %67 = vector.load %arg18[%c0_49, %c1_50] : memref<8x1225xf32, #tpu.memory_space<vmem>>, vector<8x1153xf32>
    %cst_51 = arith.constant dense<0.000000e+00> : vector<4x1153xf32>
    %68 = tpu.matmul %66, %67, %cst_51 {dimension_numbers = #tpu.dot_dimension_numbers<[1], [0], [0], [1], [0, 0, 1, 1], [], []>} : vector<4x8xf32>, vector<8x1153xf32>, vector<4x1153xf32> -> vector<4x1153xf32>
    %69 = arith.addf %64, %68 : vector<4x1153xf32>
    %c2_52 = arith.constant 2 : index
    %c0_53 = arith.constant 0 : index
    %c0_54 = arith.constant 0 : index
    %70 = vector.load %arg6[%c2_52, %c0_53, %c0_54] : memref<9x4x8xf32, #tpu.memory_space<vmem>>, vector<1x4x8xf32>
    %71 = vector.shape_cast %70 : vector<1x4x8xf32> to vector<4x8xf32>
    %c0_55 = arith.constant 0 : index
    %c2_56 = arith.constant 2 : index
    %72 = vector.load %arg18[%c0_55, %c2_56] : memref<8x1225xf32, #tpu.memory_space<vmem>>, vector<8x1153xf32>
    %cst_57 = arith.constant dense<0.000000e+00> : vector<4x1153xf32>
    %73 = tpu.matmul %71, %72, %cst_57 {dimension_numbers = #tpu.dot_dimension_numbers<[1], [0], [0], [1], [0, 0, 1, 1], [], []>} : vector<4x8xf32>, vector<8x1153xf32>, vector<4x1153xf32> -> vector<4x1153xf32>
    %74 = arith.addf %69, %73 : vector<4x1153xf32>
    %c3_58 = arith.constant 3 : index
    %c0_59 = arith.constant 0 : index
    %c0_60 = arith.constant 0 : index
    %75 = vector.load %arg6[%c3_58, %c0_59, %c0_60] : memref<9x4x8xf32, #tpu.memory_space<vmem>>, vector<1x4x8xf32>
    %76 = vector.shape_cast %75 : vector<1x4x8xf32> to vector<4x8xf32>
    %c0_61 = arith.constant 0 : index
    %c35 = arith.constant 35 : index
    %77 = vector.load %arg18[%c0_61, %c35] : memref<8x1225xf32, #tpu.memory_space<vmem>>, vector<8x1153xf32>
    %cst_62 = arith.constant dense<0.000000e+00> : vector<4x1153xf32>
    %78 = tpu.matmul %76, %77, %cst_62 {dimension_numbers = #tpu.dot_dimension_numbers<[1], [0], [0], [1], [0, 0, 1, 1], [], []>} : vector<4x8xf32>, vector<8x1153xf32>, vector<4x1153xf32> -> vector<4x1153xf32>
    %79 = arith.addf %74, %78 : vector<4x1153xf32>
    %c4_63 = arith.constant 4 : index
    %c0_64 = arith.constant 0 : index
    %c0_65 = arith.constant 0 : index
    %80 = vector.load %arg6[%c4_63, %c0_64, %c0_65] : memref<9x4x8xf32, #tpu.memory_space<vmem>>, vector<1x4x8xf32>
    %81 = vector.shape_cast %80 : vector<1x4x8xf32> to vector<4x8xf32>
    %c0_66 = arith.constant 0 : index
    %c36_67 = arith.constant 36 : index
    %82 = vector.load %arg18[%c0_66, %c36_67] : memref<8x1225xf32, #tpu.memory_space<vmem>>, vector<8x1153xf32>
    %cst_68 = arith.constant dense<0.000000e+00> : vector<4x1153xf32>
    %83 = tpu.matmul %81, %82, %cst_68 {dimension_numbers = #tpu.dot_dimension_numbers<[1], [0], [0], [1], [0, 0, 1, 1], [], []>} : vector<4x8xf32>, vector<8x1153xf32>, vector<4x1153xf32> -> vector<4x1153xf32>
    %84 = arith.addf %79, %83 : vector<4x1153xf32>
    %c5_69 = arith.constant 5 : index
    %c0_70 = arith.constant 0 : index
    %c0_71 = arith.constant 0 : index
    %85 = vector.load %arg6[%c5_69, %c0_70, %c0_71] : memref<9x4x8xf32, #tpu.memory_space<vmem>>, vector<1x4x8xf32>
    %86 = vector.shape_cast %85 : vector<1x4x8xf32> to vector<4x8xf32>
    %c0_72 = arith.constant 0 : index
    %c37 = arith.constant 37 : index
    %87 = vector.load %arg18[%c0_72, %c37] : memref<8x1225xf32, #tpu.memory_space<vmem>>, vector<8x1153xf32>
    %cst_73 = arith.constant dense<0.000000e+00> : vector<4x1153xf32>
    %88 = tpu.matmul %86, %87, %cst_73 {dimension_numbers = #tpu.dot_dimension_numbers<[1], [0], [0], [1], [0, 0, 1, 1], [], []>} : vector<4x8xf32>, vector<8x1153xf32>, vector<4x1153xf32> -> vector<4x1153xf32>
    %89 = arith.addf %84, %88 : vector<4x1153xf32>
    %c6_74 = arith.constant 6 : index
    %c0_75 = arith.constant 0 : index
    %c0_76 = arith.constant 0 : index
    %90 = vector.load %arg6[%c6_74, %c0_75, %c0_76] : memref<9x4x8xf32, #tpu.memory_space<vmem>>, vector<1x4x8xf32>
    %91 = vector.shape_cast %90 : vector<1x4x8xf32> to vector<4x8xf32>
    %c0_77 = arith.constant 0 : index
    %c70 = arith.constant 70 : index
    %92 = vector.load %arg18[%c0_77, %c70] : memref<8x1225xf32, #tpu.memory_space<vmem>>, vector<8x1153xf32>
    %cst_78 = arith.constant dense<0.000000e+00> : vector<4x1153xf32>
    %93 = tpu.matmul %91, %92, %cst_78 {dimension_numbers = #tpu.dot_dimension_numbers<[1], [0], [0], [1], [0, 0, 1, 1], [], []>} : vector<4x8xf32>, vector<8x1153xf32>, vector<4x1153xf32> -> vector<4x1153xf32>
    %94 = arith.addf %89, %93 : vector<4x1153xf32>
    %c7_79 = arith.constant 7 : index
    %c0_80 = arith.constant 0 : index
    %c0_81 = arith.constant 0 : index
    %95 = vector.load %arg6[%c7_79, %c0_80, %c0_81] : memref<9x4x8xf32, #tpu.memory_space<vmem>>, vector<1x4x8xf32>
    %96 = vector.shape_cast %95 : vector<1x4x8xf32> to vector<4x8xf32>
    %c0_82 = arith.constant 0 : index
    %c71 = arith.constant 71 : index
    %97 = vector.load %arg18[%c0_82, %c71] : memref<8x1225xf32, #tpu.memory_space<vmem>>, vector<8x1153xf32>
    %cst_83 = arith.constant dense<0.000000e+00> : vector<4x1153xf32>
    %98 = tpu.matmul %96, %97, %cst_83 {dimension_numbers = #tpu.dot_dimension_numbers<[1], [0], [0], [1], [0, 0, 1, 1], [], []>} : vector<4x8xf32>, vector<8x1153xf32>, vector<4x1153xf32> -> vector<4x1153xf32>
    %99 = arith.addf %94, %98 : vector<4x1153xf32>
    %c8_84 = arith.constant 8 : index
    %c0_85 = arith.constant 0 : index
    %c0_86 = arith.constant 0 : index
    %100 = vector.load %arg6[%c8_84, %c0_85, %c0_86] : memref<9x4x8xf32, #tpu.memory_space<vmem>>, vector<1x4x8xf32>
    %101 = vector.shape_cast %100 : vector<1x4x8xf32> to vector<4x8xf32>
    %c0_87 = arith.constant 0 : index
    %c72 = arith.constant 72 : index
    %102 = vector.load %arg18[%c0_87, %c72] : memref<8x1225xf32, #tpu.memory_space<vmem>>, vector<8x1153xf32>
    %cst_88 = arith.constant dense<0.000000e+00> : vector<4x1153xf32>
    %103 = tpu.matmul %101, %102, %cst_88 {dimension_numbers = #tpu.dot_dimension_numbers<[1], [0], [0], [1], [0, 0, 1, 1], [], []>} : vector<4x8xf32>, vector<8x1153xf32>, vector<4x1153xf32> -> vector<4x1153xf32>
    %104 = arith.addf %99, %103 : vector<4x1153xf32>
    %c0_89 = arith.constant 0 : index
    %c0_90 = arith.constant 0 : index
    %105 = vector.load %arg7[%c0_89, %c0_90] : memref<4x1xf32, #tpu.memory_space<vmem>>, vector<4x1xf32>
    %106 = vector.broadcast %105 : vector<4x1xf32> to vector<4x1153xf32>
    %107 = arith.addf %104, %106 : vector<4x1153xf32>
    %cst_91 = arith.constant 0.000000e+00 : f32
    %108 = vector.broadcast %cst_91 : f32 to vector<4x1153xf32>
    %109 = arith.maximumf %107, %108 : vector<4x1153xf32>
    %c0_92 = arith.constant 0 : index
    %c0_93 = arith.constant 0 : index
    %110 = vector.load %arg9[%c0_92, %c0_93] : memref<1x32xf32, #tpu.memory_space<vmem>>, vector<1x32xf32>
    %111 = vector.extract_strided_slice %109 {offsets = [0, 0], sizes = [1, 1153], strides = [1, 1]} : vector<4x1153xf32> to vector<1x1153xf32>
    %c0_94 = arith.constant 0 : index
    %c0_95 = arith.constant 0 : index
    %c0_96 = arith.constant 0 : index
    %112 = vector.load %arg8[%c0_94, %c0_95, %c0_96] : memref<4x1153x32xf32, #tpu.memory_space<vmem>>, vector<1x1153x32xf32>
    %113 = vector.shape_cast %112 : vector<1x1153x32xf32> to vector<1153x32xf32>
    %cst_97 = arith.constant dense<0.000000e+00> : vector<1x32xf32>
    %114 = tpu.matmul %111, %113, %cst_97 {dimension_numbers = #tpu.dot_dimension_numbers<[1], [0], [0], [1], [0, 0, 1, 1], [], []>} : vector<1x1153xf32>, vector<1153x32xf32>, vector<1x32xf32> -> vector<1x32xf32>
    %115 = arith.addf %110, %114 : vector<1x32xf32>
    %116 = vector.extract_strided_slice %109 {offsets = [1, 0], sizes = [1, 1153], strides = [1, 1]} : vector<4x1153xf32> to vector<1x1153xf32>
    %c1_98 = arith.constant 1 : index
    %c0_99 = arith.constant 0 : index
    %c0_100 = arith.constant 0 : index
    %117 = vector.load %arg8[%c1_98, %c0_99, %c0_100] : memref<4x1153x32xf32, #tpu.memory_space<vmem>>, vector<1x1153x32xf32>
    %118 = vector.shape_cast %117 : vector<1x1153x32xf32> to vector<1153x32xf32>
    %cst_101 = arith.constant dense<0.000000e+00> : vector<1x32xf32>
    %119 = tpu.matmul %116, %118, %cst_101 {dimension_numbers = #tpu.dot_dimension_numbers<[1], [0], [0], [1], [0, 0, 1, 1], [], []>} : vector<1x1153xf32>, vector<1153x32xf32>, vector<1x32xf32> -> vector<1x32xf32>
    %120 = arith.addf %115, %119 : vector<1x32xf32>
    %121 = vector.extract_strided_slice %109 {offsets = [2, 0], sizes = [1, 1153], strides = [1, 1]} : vector<4x1153xf32> to vector<1x1153xf32>
    %c2_102 = arith.constant 2 : index
    %c0_103 = arith.constant 0 : index
    %c0_104 = arith.constant 0 : index
    %122 = vector.load %arg8[%c2_102, %c0_103, %c0_104] : memref<4x1153x32xf32, #tpu.memory_space<vmem>>, vector<1x1153x32xf32>
    %123 = vector.shape_cast %122 : vector<1x1153x32xf32> to vector<1153x32xf32>
    %cst_105 = arith.constant dense<0.000000e+00> : vector<1x32xf32>
    %124 = tpu.matmul %121, %123, %cst_105 {dimension_numbers = #tpu.dot_dimension_numbers<[1], [0], [0], [1], [0, 0, 1, 1], [], []>} : vector<1x1153xf32>, vector<1153x32xf32>, vector<1x32xf32> -> vector<1x32xf32>
    %125 = arith.addf %120, %124 : vector<1x32xf32>
    %126 = vector.extract_strided_slice %109 {offsets = [3, 0], sizes = [1, 1153], strides = [1, 1]} : vector<4x1153xf32> to vector<1x1153xf32>
    %c3_106 = arith.constant 3 : index
    %c0_107 = arith.constant 0 : index
    %c0_108 = arith.constant 0 : index
    %127 = vector.load %arg8[%c3_106, %c0_107, %c0_108] : memref<4x1153x32xf32, #tpu.memory_space<vmem>>, vector<1x1153x32xf32>
    %128 = vector.shape_cast %127 : vector<1x1153x32xf32> to vector<1153x32xf32>
    %cst_109 = arith.constant dense<0.000000e+00> : vector<1x32xf32>
    %129 = tpu.matmul %126, %128, %cst_109 {dimension_numbers = #tpu.dot_dimension_numbers<[1], [0], [0], [1], [0, 0, 1, 1], [], []>} : vector<1x1153xf32>, vector<1153x32xf32>, vector<1x32xf32> -> vector<1x32xf32>
    %130 = arith.addf %125, %129 : vector<1x32xf32>
    %cst_110 = arith.constant 0.000000e+00 : f32
    %131 = vector.broadcast %cst_110 : f32 to vector<1x32xf32>
    %132 = arith.maximumf %130, %131 : vector<1x32xf32>
    %c0_111 = arith.constant 0 : index
    %c0_112 = arith.constant 0 : index
    %c0_113 = arith.constant 0 : index
    %133 = vector.load %arg1[%c0_111, %c0_112, %c0_113] : memref<1x1x8xf32, #tpu.memory_space<vmem>>, vector<1x1x8xf32>
    %134 = vector.shape_cast %133 : vector<1x1x8xf32> to vector<1x8xf32>
    %c0_114 = arith.constant 0 : index
    %c0_115 = arith.constant 0 : index
    %135 = vector.load %arg10[%c0_114, %c0_115] : memref<8x32xf32, #tpu.memory_space<vmem>>, vector<8x32xf32>
    %cst_116 = arith.constant dense<0.000000e+00> : vector<1x32xf32>
    %136 = tpu.matmul %134, %135, %cst_116 {dimension_numbers = #tpu.dot_dimension_numbers<[1], [0], [0], [1], [0, 0, 1, 1], [], []>} : vector<1x8xf32>, vector<8x32xf32>, vector<1x32xf32> -> vector<1x32xf32>
    %c0_117 = arith.constant 0 : index
    %c0_118 = arith.constant 0 : index
    %137 = vector.load %arg11[%c0_117, %c0_118] : memref<1x32xf32, #tpu.memory_space<vmem>>, vector<1x32xf32>
    %138 = arith.addf %136, %137 : vector<1x32xf32>
    %cst_119 = arith.constant 0.000000e+00 : f32
    %139 = vector.broadcast %cst_119 : f32 to vector<1x32xf32>
    %140 = arith.maximumf %138, %139 : vector<1x32xf32>
    %c0_120 = arith.constant 0 : index
    %c0_121 = arith.constant 0 : index
    %141 = vector.load %arg12[%c0_120, %c0_121] : memref<64x64xf32, #tpu.memory_space<vmem>>, vector<32x64xf32>
    %cst_122 = arith.constant dense<0.000000e+00> : vector<1x64xf32>
    %142 = tpu.matmul %140, %141, %cst_122 {dimension_numbers = #tpu.dot_dimension_numbers<[1], [0], [0], [1], [0, 0, 1, 1], [], []>} : vector<1x32xf32>, vector<32x64xf32>, vector<1x64xf32> -> vector<1x64xf32>
    %c32 = arith.constant 32 : index
    %c0_123 = arith.constant 0 : index
    %143 = vector.load %arg12[%c32, %c0_123] : memref<64x64xf32, #tpu.memory_space<vmem>>, vector<32x64xf32>
    %cst_124 = arith.constant dense<0.000000e+00> : vector<1x64xf32>
    %144 = tpu.matmul %132, %143, %cst_124 {dimension_numbers = #tpu.dot_dimension_numbers<[1], [0], [0], [1], [0, 0, 1, 1], [], []>} : vector<1x32xf32>, vector<32x64xf32>, vector<1x64xf32> -> vector<1x64xf32>
    %145 = arith.addf %142, %144 : vector<1x64xf32>
    %c0_125 = arith.constant 0 : index
    %c0_126 = arith.constant 0 : index
    %146 = vector.load %arg13[%c0_125, %c0_126] : memref<1x64xf32, #tpu.memory_space<vmem>>, vector<1x64xf32>
    %147 = arith.addf %145, %146 : vector<1x64xf32>
    %cst_127 = arith.constant 0.000000e+00 : f32
    %148 = vector.broadcast %cst_127 : f32 to vector<1x64xf32>
    %149 = arith.maximumf %147, %148 : vector<1x64xf32>
    %c0_128 = arith.constant 0 : index
    %c0_129 = arith.constant 0 : index
    %150 = vector.load %arg14[%c0_128, %c0_129] : memref<64x6xf32, #tpu.memory_space<vmem>>, vector<64x6xf32>
    %cst_130 = arith.constant dense<0.000000e+00> : vector<1x6xf32>
    %151 = tpu.matmul %149, %150, %cst_130 {dimension_numbers = #tpu.dot_dimension_numbers<[1], [0], [0], [1], [0, 0, 1, 1], [], []>} : vector<1x64xf32>, vector<64x6xf32>, vector<1x6xf32> -> vector<1x6xf32>
    %c0_131 = arith.constant 0 : index
    %c0_132 = arith.constant 0 : index
    %152 = vector.load %arg15[%c0_131, %c0_132] : memref<1x6xf32, #tpu.memory_space<vmem>>, vector<1x6xf32>
    %153 = arith.addf %151, %152 : vector<1x6xf32>
    %154 = vector.extract_strided_slice %153 {offsets = [0, 0], sizes = [1, 2], strides = [1, 1]} : vector<1x6xf32> to vector<1x2xf32>
    %cst_133 = arith.constant dense<0xFF800000> : vector<1xf32>
    %155 = vector.multi_reduction <maximumf>, %154, %cst_133 [1] : vector<1x2xf32> to vector<1xf32>
    %156 = vector.shape_cast %155 : vector<1xf32> to vector<1x1xf32>
    %157 = vector.broadcast %156 : vector<1x1xf32> to vector<1x2xf32>
    %158 = arith.subf %154, %157 : vector<1x2xf32>
    %159 = math.exp %158 : vector<1x2xf32>
    %cst_134 = arith.constant dense<0.000000e+00> : vector<1xf32>
    %160 = vector.multi_reduction <add>, %159, %cst_134 [1] : vector<1x2xf32> to vector<1xf32>
    %161 = vector.shape_cast %160 : vector<1xf32> to vector<1x1xf32>
    %162 = vector.broadcast %161 : vector<1x1xf32> to vector<1x2xf32>
    %163 = arith.divf %159, %162 : vector<1x2xf32>
    %c0_135 = arith.constant 0 : index
    %c0_136 = arith.constant 0 : index
    %c0_137 = arith.constant 0 : index
    %164 = vector.load %arg16[%c0_135, %c0_136, %c0_137] : memref<1x1x2xf32, #tpu.memory_space<vmem>>, vector<1x1x2xf32>
    %165 = vector.shape_cast %164 : vector<1x1x2xf32> to vector<1x2xf32>
    %166 = vector.shape_cast %163 : vector<1x2xf32> to vector<1x1x2xf32>
    tpu.vector_store %arg16[%c0_135, %c0_136, %c0_137], %166 {strides = array<i32>} : memref<1x1x2xf32, #tpu.memory_space<vmem>>, vector<1x1x2xf32>,
    %167 = vector.extract_strided_slice %153 {offsets = [0, 2], sizes = [1, 4], strides = [1, 1]} : vector<1x6xf32> to vector<1x4xf32>
    %cst_138 = arith.constant dense<0xFF800000> : vector<1xf32>
    %168 = vector.multi_reduction <maximumf>, %167, %cst_138 [1] : vector<1x4xf32> to vector<1xf32>
    %169 = vector.shape_cast %168 : vector<1xf32> to vector<1x1xf32>
    %170 = vector.broadcast %169 : vector<1x1xf32> to vector<1x4xf32>
    %171 = arith.subf %167, %170 : vector<1x4xf32>
    %172 = math.exp %171 : vector<1x4xf32>
    %cst_139 = arith.constant dense<0.000000e+00> : vector<1xf32>
    %173 = vector.multi_reduction <add>, %172, %cst_139 [1] : vector<1x4xf32> to vector<1xf32>
    %174 = vector.shape_cast %173 : vector<1xf32> to vector<1x1xf32>
    %175 = vector.broadcast %174 : vector<1x1xf32> to vector<1x4xf32>
    %176 = arith.divf %172, %175 : vector<1x4xf32>
    %c0_140 = arith.constant 0 : index
    %c0_141 = arith.constant 0 : index
    %c0_142 = arith.constant 0 : index
    %177 = vector.load %arg17[%c0_140, %c0_141, %c0_142] : memref<1x1x4xf32, #tpu.memory_space<vmem>>, vector<1x1x4xf32>
    %178 = vector.shape_cast %177 : vector<1x1x4xf32> to vector<1x4xf32>
    %179 = vector.shape_cast %176 : vector<1x4xf32> to vector<1x1x4xf32>
    tpu.vector_store %arg17[%c0_140, %c0_141, %c0_142], %179 {strides = array<i32>} : memref<1x1x4xf32, #tpu.memory_space<vmem>>, vector<1x1x4xf32>,
    return
  }
  func.func @transform_0(%arg0: i32) -> (i32, i32, i32) {
    %c0_i32 = arith.constant 0 : i32
    %c0_i32_0 = arith.constant 0 : i32
    %c0_i32_1 = arith.constant 0 : i32
    return %arg0, %c0_i32, %c0_i32_0 : i32, i32, i32
  }
  func.func @transform_1(%arg0: i32) -> (i32, i32, i32) {
    %c0_i32 = arith.constant 0 : i32
    %c0_i32_0 = arith.constant 0 : i32
    %c0_i32_1 = arith.constant 0 : i32
    return %arg0, %c0_i32, %c0_i32_0 : i32, i32, i32
  }
  func.func @transform_2(%arg0: i32) -> (i32, i32) {
    %c0_i32 = arith.constant 0 : i32
    %c0_i32_0 = arith.constant 0 : i32
    %c0_i32_1 = arith.constant 0 : i32
    return %c0_i32, %c0_i32_0 : i32, i32
  }
  func.func @transform_3(%arg0: i32) -> (i32, i32, i32) {
    %c0_i32 = arith.constant 0 : i32
    %c0_i32_0 = arith.constant 0 : i32
    %c0_i32_1 = arith.constant 0 : i32
    %c0_i32_2 = arith.constant 0 : i32
    return %c0_i32, %c0_i32_0, %c0_i32_1 : i32, i32, i32
  }
  func.func @transform_4(%arg0: i32) -> (i32, i32) {
    %c0_i32 = arith.constant 0 : i32
    %c0_i32_0 = arith.constant 0 : i32
    %c0_i32_1 = arith.constant 0 : i32
    return %c0_i32, %c0_i32_0 : i32, i32
  }
  func.func @transform_5(%arg0: i32) -> (i32, i32, i32) {
    %c0_i32 = arith.constant 0 : i32
    %c0_i32_0 = arith.constant 0 : i32
    %c0_i32_1 = arith.constant 0 : i32
    %c0_i32_2 = arith.constant 0 : i32
    return %c0_i32, %c0_i32_0, %c0_i32_1 : i32, i32, i32
  }
  func.func @transform_6(%arg0: i32) -> (i32, i32) {
    %c0_i32 = arith.constant 0 : i32
    %c0_i32_0 = arith.constant 0 : i32
    %c0_i32_1 = arith.constant 0 : i32
    return %c0_i32, %c0_i32_0 : i32, i32
  }
  func.func @transform_7(%arg0: i32) -> (i32, i32, i32) {
    %c0_i32 = arith.constant 0 : i32
    %c0_i32_0 = arith.constant 0 : i32
    %c0_i32_1 = arith.constant 0 : i32
    %c0_i32_2 = arith.constant 0 : i32
    return %c0_i32, %c0_i32_0, %c0_i32_1 : i32, i32, i32
  }
  func.func @transform_8(%arg0: i32) -> (i32, i32) {
    %c0_i32 = arith.constant 0 : i32
    %c0_i32_0 = arith.constant 0 : i32
    %c0_i32_1 = arith.constant 0 : i32
    return %c0_i32, %c0_i32_0 : i32, i32
  }
  func.func @transform_9(%arg0: i32) -> (i32, i32) {
    %c0_i32 = arith.constant 0 : i32
    %c0_i32_0 = arith.constant 0 : i32
    %c0_i32_1 = arith.constant 0 : i32
    return %c0_i32, %c0_i32_0 : i32, i32
  }
  func.func @transform_10(%arg0: i32) -> (i32, i32) {
    %c0_i32 = arith.constant 0 : i32
    %c0_i32_0 = arith.constant 0 : i32
    %c0_i32_1 = arith.constant 0 : i32
    return %c0_i32, %c0_i32_0 : i32, i32
  }
  func.func @transform_11(%arg0: i32) -> (i32, i32) {
    %c0_i32 = arith.constant 0 : i32
    %c0_i32_0 = arith.constant 0 : i32
    %c0_i32_1 = arith.constant 0 : i32
    return %c0_i32, %c0_i32_0 : i32, i32
  }
  func.func @transform_12(%arg0: i32) -> (i32, i32) {
    %c0_i32 = arith.constant 0 : i32
    %c0_i32_0 = arith.constant 0 : i32
    %c0_i32_1 = arith.constant 0 : i32
    return %c0_i32, %c0_i32_0 : i32, i32
  }
  func.func @transform_13(%arg0: i32) -> (i32, i32) {
    %c0_i32 = arith.constant 0 : i32
    %c0_i32_0 = arith.constant 0 : i32
    %c0_i32_1 = arith.constant 0 : i32
    return %c0_i32, %c0_i32_0 : i32, i32
  }
  func.func @transform_14(%arg0: i32) -> (i32, i32) {
    %c0_i32 = arith.constant 0 : i32
    %c0_i32_0 = arith.constant 0 : i32
    %c0_i32_1 = arith.constant 0 : i32
    return %c0_i32, %c0_i32_0 : i32, i32
  }
  func.func @transform_15(%arg0: i32) -> (i32, i32, i32) {
    %c0_i32 = arith.constant 0 : i32
    %c0_i32_0 = arith.constant 0 : i32
    %c0_i32_1 = arith.constant 0 : i32
    return %arg0, %c0_i32, %c0_i32_0 : i32, i32, i32
  }
  func.func @transform_16(%arg0: i32) -> (i32, i32, i32) {
    %c0_i32 = arith.constant 0 : i32
    %c0_i32_0 = arith.constant 0 : i32
    %c0_i32_1 = arith.constant 0 : i32
    return %arg0, %c0_i32, %c0_i32_0 : i32, i32, i32
  }
}

</mosaic_0001>

<bundles_post_ra>
// kernel: actor_forward.1
= control target key start
LH: loop header
LB: loop body
LE: loop exit
PB: predicated region body
PF: predicated region fallthrough
CT: control target
= control target key end

     0   :  { %s16227_s0 = inlined_call_operand.vmem [shape: f32[2,1,8], index: 0, kind: input, shape index: {}]   ;;  %s16228_s1 = inlined_call_operand.vmem [shape: f32[2,4,1225], index: 1, kind: input, shape index: {}]   ;;  %s16229_s2 = inlined_call_operand.vmem [shape: f32[1,1153], index: 2, kind: input, shape index: {}]   ;;  %s16230_s3 = inlined_call_operand.vmem [shape: f32[9,8,4], index: 3, kind: input, shape index: {}]   ;;  %s16231_s4 = inlined_call_operand.vmem [shape: f32[8,1], index: 4, kind: input, shape index: {}]   ;;  %s16232_s5 = inlined_call_operand.vmem [shape: f32[9,4,8], index: 5, kind: input, shape index: {}]   ;;  %s16233_s6 = inlined_call_operand.vmem [shape: f32[4,1], index: 6, kind: input, shape index: {}]   ;;  %s16234_s7 = inlined_call_operand.vmem [shape: f32[4,1153,32], index: 7, kind: input, shape index: {}]   ;;  %s16235_s8 = inlined_call_operand.vmem [shape: f32[1,32], index: 8, kind: input, shape index: {}]   ;;  %s16236_s9 = inlined_call_operand.vmem [shape: f32[8,32], index: 9, kind: input, shape index: {}]   ;;  %s16237_s10 = inlined_call_operand.vmem [shape: f32[1,32], index: 10, kind: input, shape index: {}]   ;;  %s16238_s11 = inlined_call_operand.vmem [shape: f32[64,64], index: 11, kind: input, shape index: {}]   ;;  %s16239_s12 = inlined_call_operand.vmem [shape: f32[1,64], index: 12, kind: input, shape index: {}]   ;;  %s16240_s13 = inlined_call_operand.vmem [shape: f32[64,6], index: 13, kind: input, shape index: {}]   ;;  %s16241_s14 = inlined_call_operand.vmem [shape: f32[1,6], index: 14, kind: input, shape index: {}]   ;;  %s16242_s15 = inlined_call_operand.hbm [shape: f32[2,1,2], index: 15, kind: output, shape index: {0}]   ;;  %s16243_s16 = inlined_call_operand.hbm [shape: f32[2,1,4], index: 16, kind: output, shape index: {1}]  }
   0x1   :  { %16257 = sst [smem:[#allocation10_spill]] %s16227_s0 }
   0x2   :  { %16258 = sst [smem:[#allocation11_spill]] %s16228_s1 }
   0x3   :  { %16259 = sst [smem:[#allocation12_spill]] %s16229_s2 }
   0x4   :  { %16260 = sst [smem:[#allocation13_spill]] %s16230_s3 }
   0x5   :  { %16261 = sst [smem:[#allocation14_spill]] %s16231_s4 }
   0x6   :  { %16262 = sst [smem:[#allocation15_spill]] %s16232_s5 }
   0x7   :  { %22 = vsyncpa [#allocation4], 0 }
   0x8   :  { %24 = vsyncpa [#allocation4 + $0x1], 0 }
   0x9   :  { %25 = vsyncpa [#allocation6], 0 }
   0xa   :  { %27 = vsyncpa [#allocation6 + $0x1], 0  ;;  %s13024_s21 = smov 0   ;;  %s13026_s22 = smov 0  }
   0xb   :  { %s13028_s23 = smov 0   ;;  %s13030_s24 = smov 0  }
   0xc LB: > { %s13045_s25 = sadd.s32 4294967295, %s12922_s24   ;;  %s10673_s26 = sadd.s32 4294967294, %s12922_s24   ;;  %s12922_s24 = sphi %s13030_s24, %s16283_s24   ;;  %s12918_s23 = sphi %s13028_s23, %s16282_s23   ;;  %s12914_s22 = sphi %s13026_s22, %s16281_s22   ;;  %s12910_s21 = sphi %s13024_s21, %s16280_s21  }
   0xd   : > { %s13049_s27 = sadd.s32 1, %s12922_s24   ;;  %s365_s28 = sadd.s32 1, %s12918_s23 }
   0xe   : > { %s362_s29 = ssub.s32 %s12922_s24, %s13049_s27  ;;  %p375_p0 = scmp.ne.s32.totalorder %s12918_s23, %s12914_s22 }
   0xf   : > { %p363_p1 = scmp.eq.s32.totalorder %s362_s29, 0  ;;  %p376_p2 = scmp.eq.s32.totalorder %s13045_s25, 1 }
  0x10   : > { %p381_p3 = scmp.ne.s32.totalorder %s12914_s22, %s12910_s21  ;;  %p382_p4 = scmp.eq.s32.totalorder %s10673_s26, 1 }
  0x11   : > { %s13060_s30 = scalar_select %p363_p1, %s12918_s23, %s365_s28  }
  0x12   : > { %p13062_p5 = por %p376_p2, %p375_p0  ;;  %p13066_p6 = por %p382_p4, %p381_p3 }
  0x13   : > { %16263 = sst [smem:[#allocation9_spill]] %s13060_s30  ;;  %p10676_p7 = scmp.ge.s32.totalorder %s12922_s24, 1 }
  0x14   : > { %p479_p8 = scmp.lt.s32.totalorder %s12922_s24, 3 }
  0x16   : > { %p480_p9 = pnand %p10676_p7, %p479_p8 }
  0x17   : > { %p535_p10 = scmp.lt.s32.totalorder (!%p480_p9), %s13045_s25, 1  ;;  %v12924_v0 = vmov (!%p480_p9), 0.0   ;;  %s16266_s1 = sld [smem:[#allocation11_spill]] (!%p480_p9)  ;;  %vm597_vm0 = vcmask (!%p480_p9), 1043456   ;;  %vm583_vm1 = vcmask (!%p480_p9), 1039360   ;;  %vm593_vm2 = vcmask (!%p480_p9), 31744  }
  0x18   : > { %483 = sbr.rel (%p480_p9) target bundleno = 2747 (0xabb), region = 80  ;;  %966 = vmatprep.mubr.f32.mxu0 (!%p480_p9), %v12924_v0  ;;  %4379 = vst [vmem:[#allocation2] sm:$0xff] (!%p480_p9), %v12924_v0  ;;  %682 = vmatprep.mubr.f32.mxu1 (!%p480_p9), %v12924_v0  ;;  %s12925_s29 = smov (!%p480_p9), 127   ;;  %vm1373_vm3 = vcmask (!%p480_p9), 1031168   ;;  %vm1793_vm4 = vcmask (!%p480_p9), 760832   ;;  %v12933_v51 = vmov (!%p480_p9), 0  }
  0x19   : > { %s16254_s30 = smov (!%p480_p9), 126   ;;  %s16244_s20 = smov (!%p480_p9), 92   ;;  %12813 = vset.pattern.permute.xlu0 (!%p480_p9), %v12933_v51  ;;  %vm2213_vm5 = vcmask (!%p480_p9), 752640   ;;  %vm2633_vm6 = vcmask (!%p480_p9), 744448   ;;  %vm3053_vm7 = vcmask (!%p480_p9), 474112   ;;  %vm3473_vm8 = vcmask (!%p480_p9), 465920  }
  0x1a   : > { %s16246_s26 = smov (!%p480_p9), 91   ;;  %s16267_s3 = sld [smem:[#allocation13_spill]] (!%p480_p9)  ;;  %vm3893_vm9 = vcmask (!%p480_p9), 457728   ;;  %vm4388_vm10 = vcmask (!%p480_p9), 596992   ;;  %vm4440_vm11 = vcmask (!%p480_p9), 1047840   ;;  %vm4420_vm12 = vcmask (!%p480_p9), 293888  }
  0x1b   : > { %s16268_s4 = sld [smem:[#allocation14_spill]] (!%p480_p9)  ;;  %s16269_s2 = sld [smem:[#allocation12_spill]] (!%p480_p9)  ;;  %vm4450_vm13 = vcmask (!%p480_p9), 302080   ;;  %vm4514_vm14 = vcmask (!%p480_p9), 64512   ;;  %vm8266_vm15 = vcmask (!%p480_p9), 7168  }
  0x1c   : > { %s16273_s5 = sld [smem:[#allocation15_spill]] (!%p480_p9) }
  0x1f   : > { %s13074_s18 = scalar_select %p535_p10, %s13045_s25, 1 }
  0x20   : > { %v13244_v17 = vld [vmem:[%s16267_s3 + $0x8] sm:$0xff]  ;;  %v13266_v23 = vld [vmem:[%s16267_s3] sm:$0xff]  ;;  %v13319_v34 = vld [vmem:[%s16267_s3 + $0x10] sm:$0xff] }
  0x21   : > { %s12755_s19 = smul.u32 40, %s13074_s18  ;;  %v13370_v48 = vld [vmem:[%s16267_s3 + $0x18] sm:$0xff]  ;;  %v4291_v56 = vld [vmem:[%s16268_s4] sm:$0xff] }
  0x23   : > { %s542_s28 = scalar_lea.vmem %s16266_s1, %s12755_s19  ;;  %s16248_s19 = smov 93  }
  0x24   : > { %v13083_v1 = vld [vmem:[%s542_s28 + $0x20] sm:$0xff]  ;;  %v13085_v2 = vld [vmem:[%s542_s28 + $0x8] sm:$0xff]  ;;  %v13109_v6 = vld [vmem:[%s542_s28 + $0x10] sm:$0xff] }
  0x25   : > { %579 = vrot.lane.b32.xlu0 %v13083_v1, %s12925_s29  ;;  %1357 = vrot.lane.b32.xlu1 %v13085_v2, %s16254_s30  ;;  %v13091_v3 = vld [vmem:[%s542_s28] sm:$0xff]  ;;  %v13103_v5 = vcombine.high %v13083_v1, %v13083_v1  ;;  %v13117_v7 = vcombine.high %v13109_v6, %v13109_v6  ;;  %v13119_v8 = vld [vmem:[%s542_s28 + $0x18] sm:$0xff]  ;;  %v13127_v9 = vcombine.high %v13085_v2, %v13085_v2  ;;  %s12930_s28 = smov 58  }
  0x26   : > { %v13095_v4 = vcombine.high %v13091_v3, %v13091_v3  ;;  %v13151_v10 = vcombine.high %v13119_v8, %v13119_v8 }
  0x29   : > { %1353 = vrot.lane.b32.xlu0 %v13091_v3, %s16254_s30  ;;  %1355 = vrot.lane.b32.xlu1 %v13095_v4, %s16254_s30 }
  0x2d   : > { %581 = vrot.lane.b32.xlu0 %v13103_v5, %s12925_s29  ;;  %565 = vrot.lane.b32.xlu1 %v13095_v4, %s12925_s29 }
  0x31   : > { %567 = vrot.lane.b32.xlu0 %v13085_v2, %s12925_s29  ;;  %563 = vrot.lane.b32.xlu1 %v13091_v3, %s12925_s29 }
  0x35   : > { %1363 = vrot.lane.b32.xlu0 %v13117_v7, %s16254_s30  ;;  %1365 = vrot.lane.b32.xlu1 %v13119_v8, %s16254_s30 }
  0x39   : > { %1361 = vrot.lane.b32.xlu0 %v13109_v6, %s16254_s30  ;;  %569 = vrot.lane.b32.xlu1 %v13127_v9, %s12925_s29 }
  0x3d   : > { %571 = vrot.lane.b32.xlu0 %v13109_v6, %s12925_s29  ;;  %1369 = vrot.lane.b32.xlu1 %v13083_v1, %s16254_s30 }
  0x41   : > { %1371 = vrot.lane.b32.xlu0 %v13103_v5, %s16254_s30  ;;  %573 = vrot.lane.b32.xlu1 %v13117_v7, %s12925_s29 }
  0x45   : > { %575 = vrot.lane.b32.xlu0 %v13119_v8, %s12925_s29  ;;  %1775 = vrot.lane.b32.xlu1 %v13095_v4, %s16248_s19 }
  0x49   : > { %1777 = vrot.lane.b32.xlu0 %v13085_v2, %s16248_s19  ;;  %1773 = vrot.lane.b32.xlu1 %v13091_v3, %s16248_s19 }
  0x4d   : > { %577 = vrot.lane.b32.xlu0 %v13151_v10, %s12925_s29  ;;  %1783 = vrot.lane.b32.xlu1 %v13117_v7, %s16248_s19 }
  0x51   : > { %1785 = vrot.lane.b32.xlu0 %v13119_v8, %s16248_s19  ;;  %1781 = vrot.lane.b32.xlu1 %v13109_v6, %s16248_s19 }
  0x55   : > { %1789 = vrot.lane.b32.xlu0 %v13083_v1, %s16248_s19  ;;  %1791 = vrot.lane.b32.xlu1 %v13103_v5, %s16248_s19 }
  0x59   : > { %2195 = vrot.lane.b32.xlu0 %v13095_v4, %s16244_s20  ;;  %2197 = vrot.lane.b32.xlu1 %v13085_v2, %s16244_s20 }
  0x5d   : > { %2193 = vrot.lane.b32.xlu0 %v13091_v3, %s16244_s20  ;;  %1359 = vrot.lane.b32.xlu1 %v13127_v9, %s16254_s30 }
  0x61   : > { %2203 = vrot.lane.b32.xlu0 %v13117_v7, %s16244_s20  ;;  %2205 = vrot.lane.b32.xlu1 %v13119_v8, %s16244_s20 }
  0x65   : > { %2201 = vrot.lane.b32.xlu0 %v13109_v6, %s16244_s20  ;;  %1367 = vrot.lane.b32.xlu1 %v13151_v10, %s16254_s30 }
  0x69   : > { %2209 = vrot.lane.b32.xlu0 %v13083_v1, %s16244_s20  ;;  %2211 = vrot.lane.b32.xlu1 %v13103_v5, %s16244_s20 }
  0x6d   : > { %1779 = vrot.lane.b32.xlu0 %v13127_v9, %s16248_s19  ;;  %2615 = vrot.lane.b32.xlu1 %v13095_v4, %s16246_s26 }
  0x71   : > { %2617 = vrot.lane.b32.xlu0 %v13085_v2, %s16246_s26  ;;  %2613 = vrot.lane.b32.xlu1 %v13091_v3, %s16246_s26 }
  0x75   : > { %1787 = vrot.lane.b32.xlu0 %v13151_v10, %s16248_s19  ;;  %2623 = vrot.lane.b32.xlu1 %v13117_v7, %s16246_s26  ;;  %s12934_s19 = smov 36  }
  0x79   : > { %2625 = vrot.lane.b32.xlu0 %v13119_v8, %s16246_s26  ;;  %2621 = vrot.lane.b32.xlu1 %v13109_v6, %s16246_s26 }
  0x7d   : > { %2199 = vrot.lane.b32.xlu0 %v13127_v9, %s16244_s20  ;;  %2629 = vrot.lane.b32.xlu1 %v13083_v1, %s16246_s26 }
  0x81   : > { %2631 = vrot.lane.b32.xlu0 %v13103_v5, %s16246_s26  ;;  %2207 = vrot.lane.b32.xlu1 %v13151_v10, %s16244_s20  ;;  %s16250_s20 = smov 57  }
  0x85   : > { %3035 = vrot.lane.b32.xlu0 %v13095_v4, %s12930_s28  ;;  %3037 = vrot.lane.b32.xlu1 %v13085_v2, %s12930_s28 }
  0x89   : > { %3033 = vrot.lane.b32.xlu0 %v13091_v3, %s12930_s28  ;;  %2619 = vrot.lane.b32.xlu1 %v13127_v9, %s16246_s26 }
  0x8d   : > { %3043 = vrot.lane.b32.xlu0 %v13117_v7, %s12930_s28  ;;  %3045 = vrot.lane.b32.xlu1 %v13119_v8, %s12930_s28 }
  0x91   : > { %3041 = vrot.lane.b32.xlu0 %v13109_v6, %s12930_s28  ;;  %2627 = vrot.lane.b32.xlu1 %v13151_v10, %s16246_s26  ;;  %s16275_s26 = smov 56  }
  0x95   : > { %3049 = vrot.lane.b32.xlu0 %v13083_v1, %s12930_s28  ;;  %3051 = vrot.lane.b32.xlu1 %v13103_v5, %s12930_s28 }
  0x97   : > { %v13229_v11 = vpop.permute.xlu0 %579  ;;  %v13231_v12 = vpop.permute.xlu1 %1357 }
  0x99   : > { %3039 = vrot.lane.b32.xlu0 %v13127_v9, %s12930_s28  ;;  %3455 = vrot.lane.b32.xlu1 %v13095_v4, %s16250_s20 }
  0x9b   : > { %v1354_v13 = vpop.permute.xlu0 %1353  ;;  %v1356_v14 = vpop.permute.xlu1 %1355 }
  0x9c   : > { %v1375_v28 = vsel %vm1373_vm3, %v1356_v14, %v13231_v12  ;;  %v1374_v29 = vsel %vm1373_vm3, %v1354_v13, %v1356_v14 }
  0x9d   : > { %3457 = vrot.lane.b32.xlu0 %v13085_v2, %s16250_s20  ;;  %3453 = vrot.lane.b32.xlu1 %v13091_v3, %s16250_s20 }
  0x9f   : > { %v582_v15 = vpop.permute.xlu0 %581  ;;  %v566_v16 = vpop.permute.xlu1 %565 }
  0xa0   : > { %10691 = vmatprep.subr.msk.mxu0 %vm597_vm0, %v582_v15  ;;  %v592_v18 = vsel %vm583_vm1, %v13229_v11, %v582_v15 }
  0xa1   : > { %10692 = vmatpush1.msk.msra.mxu0 %vm597_vm0, %v592_v18  ;;  %3047 = vrot.lane.b32.xlu0 %v13151_v10, %s12930_s28 }
  0xa2   : > { %3463 = vrot.lane.b32.xlu1 %v13117_v7, %s16250_s20  ;;  %10693 = vmatmul.mubr.msk.f32.vlgmr.msra.gmra.mrb[0].mxu0 %vm593_vm2, %v13244_v17 }
  0xa3   : > { %v568_v19 = vpop.permute.xlu0 %567  ;;  %v564_v20 = vpop.permute.xlu1 %563  ;;  %10694 = vmatprep.subr.msk.mxu0 %vm597_vm0, %v13095_v4  ;;  %1060 = vmatprep.mubr.f32.mxu0 %v12924_v0 }
  0xa4   : > { %v585_v21 = vsel %vm583_vm1, %v566_v16, %v568_v19  ;;  %10695 = vmatpush1.msk.msra.mxu0 %vm597_vm0, %v13091_v3  ;;  %v584_v22 = vsel %vm583_vm1, %v564_v20, %v566_v16 }
  0xa5   : > { %3465 = vrot.lane.b32.xlu0 %v13119_v8, %s16250_s20  ;;  %10679 = vmatprep.subr.msk.mxu1 %vm597_vm0, %v585_v21 }
  0xa6   : > { %3461 = vrot.lane.b32.xlu1 %v13109_v6, %s16250_s20  ;;  %10680 = vmatpush1.msk.msra.mxu1 %vm597_vm0, %v584_v22 }
  0xa7   : > { %10696 = vmatmul.mubr.msk.f32.vlgmr.msra.gmra.mrb[2].mxu0 %vm593_vm2, %v13266_v23  ;;  %v1364_v24 = vpop.permute.xlu0 %1363  ;;  %v13276_v25 = vpop.permute.xlu1 %1365  ;;  %10700 = vmatprep.subr.msk.mxu0 %vm597_vm0, %v13117_v7 }
  0xa8   : > { %10701 = vmatpush1.msk.msra.mxu0 %vm597_vm0, %v13109_v6  ;;  %1202 = vmatprep.mubr.f32.mxu0 %v12924_v0  ;;  %v1379_v32 = vsel %vm1373_vm3, %v1364_v24, %v13276_v25 }
  0xa9   : > { %3459 = vrot.lane.b32.xlu0 %v13127_v9, %s16250_s20  ;;  %10706 = vmatprep.subr.msk.mxu0 %vm597_vm0, %v13103_v5 }
  0xaa   : > { %3469 = vrot.lane.b32.xlu1 %v13083_v1, %s16250_s20  ;;  %10681 = vmatmul.mubr.msk.f32.vlgmr.msra.gmra.mrb[0].mxu1 %vm593_vm2, %v13244_v17 }
  0xab   : > { %10702 = vmatmul.mubr.msk.f32.vlgmr.msra.gmra.mrb[4].mxu0 %vm593_vm2, %v13266_v23  ;;  %v13293_v26 = vpop.permute.xlu0 %1361  ;;  %v570_v27 = vpop.permute.xlu1 %569  ;;  %753 = vmatprep.mubr.f32.mxu1 %v12924_v0 }
  0xac   : > { %10707 = vmatpush1.msk.msra.mxu0 %vm597_vm0, %v13083_v1  ;;  %1344 = vmatprep.mubr.f32.mxu0 %v12924_v0  ;;  %v586_v35 = vsel %vm583_vm1, %v568_v19, %v570_v27  ;;  %v1378_v36 = vsel %vm1373_vm3, %v13293_v26, %v1364_v24 }
  0xad   : > { %10710 = vmatprep.subr.msk.mxu0 %vm597_vm0, %v1375_v28  ;;  %3471 = vrot.lane.b32.xlu0 %v13103_v5, %s16250_s20 }
  0xae   : > { %3467 = vrot.lane.b32.xlu1 %v13151_v10, %s16250_s20  ;;  %s16252_s20 = smov 56  }
  0xaf   : > { %10708 = vmatmul.mubr.msk.f32.vlgmr.msra.gmra.mrb[0].mxu0 %vm593_vm2, %v13266_v23  ;;  %v572_v30 = vpop.permute.xlu0 %571  ;;  %v13309_v31 = vpop.permute.xlu1 %1369 }
  0xb0   : > { %10711 = vmatpush1.msk.msra.mxu0 %vm597_vm0, %v1374_v29  ;;  %v587_v33 = vsel %vm583_vm1, %v570_v27, %v572_v30  ;;  %1470 = vmatprep.mubr.f32.mxu0 %v12924_v0  ;;  %v13495_v27 = vld [vmem:[%s16267_s3 + $0x28] sm:$0xff] }
  0xb1   : > { %10716 = vmatprep.subr.msk.mxu0 %vm597_vm0, %v1379_v32  ;;  %3875 = vrot.lane.b32.xlu0 %v13095_v4, %s16252_s20  ;;  %v13441_v4 = vld [vmem:[%s16267_s3 + $0x20] sm:$0xff] }
  0xb2   : > { %3877 = vrot.lane.b32.xlu1 %v13085_v2, %s16252_s20  ;;  %10682 = vmatprep.subr.msk.mxu1 %vm597_vm0, %v587_v33 }
  0xb3   : > { %10683 = vmatpush1.msk.msra.mxu1 %vm597_vm0, %v586_v35  ;;  %10712 = vmatmul.mubr.msk.f32.vlgmr.msra.gmra.mrb[2].mxu0 %vm593_vm2, %v13319_v34  ;;  %v1372_v37 = vpop.permute.xlu0 %1371  ;;  %v574_v38 = vpop.permute.xlu1 %573 }
  0xb4   : > { %10717 = vmatpush1.msk.msra.mxu0 %vm597_vm0, %v1378_v36  ;;  %1612 = vmatprep.mubr.f32.mxu0 %v12924_v0  ;;  %v1382_v39 = vsel %vm1373_vm3, %v13309_v31, %v1372_v37  ;;  %v588_v43 = vsel %vm583_vm1, %v572_v30, %v574_v38 }
  0xb5   : > { %10722 = vmatprep.subr.msk.mxu0 %vm597_vm0, %v1372_v37  ;;  %3873 = vrot.lane.b32.xlu0 %v13091_v3, %s16252_s20 }
  0xb6   : > { %3879 = vrot.lane.b32.xlu1 %v13127_v9, %s16252_s20  ;;  %10684 = vmatmul.mubr.msk.f32.vlgmr.msra.gmra.mrb[2].mxu1 %vm593_vm2, %v13244_v17 }
  0xb7   : > { %10718 = vmatmul.mubr.msk.f32.vlgmr.msra.gmra.mrb[4].mxu0 %vm593_vm2, %v13319_v34  ;;  %v576_v40 = vpop.permute.xlu0 %575  ;;  %v1776_v41 = vpop.permute.xlu1 %1775  ;;  %824 = vmatprep.mubr.f32.mxu1 %v12924_v0 }
  0xb8   : > { %10723 = vmatpush1.msk.msra.mxu0 %vm597_vm0, %v1382_v39  ;;  %v589_v42 = vsel %vm583_vm1, %v574_v38, %v576_v40  ;;  %1754 = vmatprep.mubr.f32.mxu0 %v12924_v0 }
  0xb9   : > { %3881 = vrot.lane.b32.xlu0 %v13109_v6, %s16252_s20  ;;  %10685 = vmatprep.subr.msk.mxu1 %vm597_vm0, %v589_v42 }
  0xba   : > { %3883 = vrot.lane.b32.xlu1 %v13117_v7, %s16252_s20  ;;  %10686 = vmatpush1.msk.msra.mxu1 %vm597_vm0, %v588_v43 }
  0xbb   : > { %v13357_v44 = vpop.permute.xlu0 %1777  ;;  %v1774_v45 = vpop.permute.xlu1 %1773  ;;  %10724 = vmatmul.mubr.msk.f32.vlgmr.msra.gmra.mrb[0].mxu0 %vm593_vm2, %v13319_v34  ;;  %10687 = vmatmul.mubr.msk.f32.vlgmr.msra.gmra.mrb[4].mxu1 %vm593_vm2, %v13244_v17 }
  0xbc   : > { %v1794_v46 = vsel %vm1793_vm4, %v1774_v45, %v1776_v41  ;;  %v1795_v47 = vsel %vm1793_vm4, %v1776_v41, %v13357_v44  ;;  %1890 = vmatprep.mubr.f32.mxu0 %v12924_v0  ;;  %895 = vmatprep.mubr.f32.mxu1 %v12924_v0 }
  0xbd   : > { %3885 = vrot.lane.b32.xlu0 %v13119_v8, %s16252_s20  ;;  %10726 = vmatprep.subr.msk.mxu0 %vm597_vm0, %v1795_v47 }
  0xbe   : > { %3887 = vrot.lane.b32.xlu1 %v13151_v10, %s16252_s20  ;;  %10727 = vmatpush1.msk.msra.mxu0 %vm597_vm0, %v1794_v46 }
  0xbf   : > { %v578_v49 = vpop.permute.xlu0 %577  ;;  %v1784_v50 = vpop.permute.xlu1 %1783  ;;  %10728 = vmatmul.mubr.msk.f32.vlgmr.msra.gmra.mrb[2].mxu0 %vm593_vm2, %v13370_v48 }
  0xc0   : > { %v590_v52 = vsel %vm583_vm1, %v576_v40, %v578_v49  ;;  %v591_v53 = vsel %vm583_vm1, %v578_v49, %v13229_v11  ;;  %2032 = vmatprep.mubr.f32.mxu0 %v12924_v0 }
  0xc1   : > { %3889 = vrot.lane.b32.xlu0 %v13083_v1, %s16252_s20  ;;  %10688 = vmatprep.subr.msk.mxu1 %vm597_vm0, %v591_v53 }
  0xc2   : > { %3891 = vrot.lane.b32.xlu1 %v13103_v5, %s16252_s20  ;;  %10689 = vmatpush1.msk.msra.mxu1 %vm597_vm0, %v590_v52  ;;  %s16271_s20 = smov 92  }
  0xc3   : > { %v13391_v54 = vpop.permute.xlu0 %1785  ;;  %v13393_v55 = vpop.permute.xlu1 %1781  ;;  %10690 = vmatmul.mubr.msk.f32.vlgmr.msra.gmra.mrb[6].mxu1 %vm593_vm2, %v13244_v17  ;;  %10697 = vmatprep.subr.msk.mxu1 %vm597_vm0, %v13127_v9 }
  0xc4   : > { %v1798_v57 = vsel %vm1793_vm4, %v13393_v55, %v1784_v50  ;;  %v1799_v58 = vsel %vm1793_vm4, %v1784_v50, %v13391_v54  ;;  %10698 = vmatpush1.msk.msra.mxu1 %vm597_vm0, %v13085_v2  ;;  %1131 = vmatprep.mubr.f32.mxu1 %v12924_v0  ;;  %v10773_v50 = vld [vmem:[%s16267_s3 + $0x30] sm:$0xff] }
  0xc5   : > { %10732 = vmatprep.subr.msk.mxu0 %vm597_vm0, %v1799_v58  ;;  %10703 = vmatprep.subr.msk.mxu1 %vm597_vm0, %v13151_v10 }
  0xc6   : > { %10733 = vmatpush1.msk.msra.mxu0 %vm597_vm0, %v1798_v57  ;;  %4294 = vperm.xlu0 %12813, %v4291_v56  }
  0xc7   : > { %v13413_v59 = vpop.permute.xlu0 %1789  ;;  %v1792_v60 = vpop.permute.xlu1 %1791  ;;  %10734 = vmatmul.mubr.msk.f32.vlgmr.msra.gmra.mrb[4].mxu0 %vm593_vm2, %v13370_v48  ;;  %10699 = vmatmul.mubr.msk.f32.vlgmr.msra.gmra.mrb[2].mxu1 %vm593_vm2, %v13266_v23 }
  0xc8   : > { %v1802_v61 = vsel %vm1793_vm4, %v13413_v59, %v1792_v60  ;;  %10738 = vmatprep.subr.msk.mxu0 %vm597_vm0, %v1792_v60  ;;  %10704 = vmatpush1.msk.msra.mxu1 %vm597_vm0, %v13119_v8 }
  0xc9   : > { %10739 = vmatpush1.msk.msra.mxu0 %vm597_vm0, %v1802_v61  ;;  %2174 = vmatprep.mubr.f32.mxu0 %v12924_v0 }
  0xca   : > { %1273 = vmatprep.mubr.f32.mxu1 %v12924_v0 }
  0xcb   : > { %v2196_v62 = vpop.permute.xlu0 %2195  ;;  %v13427_v63 = vpop.permute.xlu1 %2197  ;;  %10740 = vmatmul.mubr.msk.f32.vlgmr.msra.gmra.mrb[0].mxu0 %vm593_vm2, %v13370_v48  ;;  %10705 = vmatmul.mubr.msk.f32.vlgmr.msra.gmra.mrb[6].mxu1 %vm593_vm2, %v13266_v23 }
  0xcc   : > { %v2215_v1 = vsel %vm2213_vm5, %v2196_v62, %v13427_v63  ;;  %2310 = vmatprep.mubr.f32.mxu0 %v12924_v0  ;;  %1541 = vmatprep.mubr.f32.mxu1 %v12924_v0 }
  0xcd   : > { %10742 = vmatprep.subr.msk.mxu0 %vm597_vm0, %v2215_v1 }
  0xcf   : > { %v2194_v2 = vpop.permute.xlu0 %2193  ;;  %v1360_v3 = vpop.permute.xlu1 %1359 }
  0xd0   : > { %v2214_v5 = vsel %vm2213_vm5, %v2194_v2, %v2196_v62  ;;  %v1376_v6 = vsel %vm1373_vm3, %v13231_v12, %v1360_v3  ;;  %v1377_v7 = vsel %vm1373_vm3, %v1360_v3, %v13293_v26 }
  0xd1   : > { %10713 = vmatprep.subr.msk.mxu1 %vm597_vm0, %v1377_v7  ;;  %10743 = vmatpush1.msk.msra.mxu0 %vm597_vm0, %v2214_v5 }
  0xd2   : > { %10714 = vmatpush1.msk.msra.mxu1 %vm597_vm0, %v1376_v6  ;;  %10744 = vmatmul.mubr.msk.f32.vlgmr.msra.gmra.mrb[2].mxu0 %vm593_vm2, %v13441_v4 }
  0xd3   : > { %v2204_v8 = vpop.permute.xlu0 %2203  ;;  %v13453_v9 = vpop.permute.xlu1 %2205  ;;  %10715 = vmatmul.mubr.msk.f32.vlgmr.msra.gmra.mrb[2].mxu1 %vm593_vm2, %v13319_v34  ;;  %2452 = vmatprep.mubr.f32.mxu0 %v12924_v0 }
  0xd4   : > { %v2219_v10 = vsel %vm2213_vm5, %v2204_v8, %v13453_v9  ;;  %1683 = vmatprep.mubr.f32.mxu1 %v12924_v0 }
  0xd5   : > { %10748 = vmatprep.subr.msk.mxu0 %vm597_vm0, %v2219_v10  ;;  %v10789_v10 = vld [vmem:[%s16267_s3 + $0x38] sm:$0xff] }
  0xd7   : > { %v2202_v11 = vpop.permute.xlu0 %2201  ;;  %v1368_v12 = vpop.permute.xlu1 %1367 }
  0xd8   : > { %v2218_v13 = vsel %vm2213_vm5, %v2202_v11, %v2204_v8  ;;  %v1380_v14 = vsel %vm1373_vm3, %v13276_v25, %v1368_v12  ;;  %v1381_v15 = vsel %vm1373_vm3, %v1368_v12, %v13309_v31 }
  0xd9   : > { %10719 = vmatprep.subr.msk.mxu1 %vm597_vm0, %v1381_v15  ;;  %10749 = vmatpush1.msk.msra.mxu0 %vm597_vm0, %v2218_v13 }
  0xda   : > { %10720 = vmatpush1.msk.msra.mxu1 %vm597_vm0, %v1380_v14  ;;  %10750 = vmatmul.mubr.msk.f32.vlgmr.msra.gmra.mrb[4].mxu0 %vm593_vm2, %v13441_v4 }
  0xdb   : > { %v2210_v16 = vpop.permute.xlu0 %2209  ;;  %v2212_v17 = vpop.permute.xlu1 %2211  ;;  %10721 = vmatmul.mubr.msk.f32.vlgmr.msra.gmra.mrb[6].mxu1 %vm593_vm2, %v13319_v34  ;;  %2594 = vmatprep.mubr.f32.mxu0 %v12924_v0 }
  0xdc   : > { %v2222_v18 = vsel %vm2213_vm5, %v2210_v16, %v2212_v17  ;;  %10754 = vmatprep.subr.msk.mxu0 %vm597_vm0, %v2212_v17  ;;  %1961 = vmatprep.mubr.f32.mxu1 %v12924_v0 }
  0xdd   : > { %10755 = vmatpush1.msk.msra.mxu0 %vm597_vm0, %v2222_v18 }
  0xde   : > { %10756 = vmatmul.mubr.msk.f32.vlgmr.msra.gmra.mrb[0].mxu0 %vm593_vm2, %v13441_v4 }
  0xdf   : > { %v1780_v19 = vpop.permute.xlu0 %1779  ;;  %v2616_v20 = vpop.permute.xlu1 %2615  ;;  %2730 = vmatprep.mubr.f32.mxu0 %v12924_v0 }
  0xe0   : > { %v1796_v21 = vsel %vm1793_vm4, %v13357_v44, %v1780_v19  ;;  %v1797_v22 = vsel %vm1793_vm4, %v1780_v19, %v13393_v55 }
  0xe1   : > { %10729 = vmatprep.subr.msk.mxu1 %vm597_vm0, %v1797_v22 }
  0xe2   : > { %10730 = vmatpush1.msk.msra.mxu1 %vm597_vm0, %v1796_v21 }
  0xe3   : > { %v2618_v23 = vpop.permute.xlu0 %2617  ;;  %v2614_v24 = vpop.permute.xlu1 %2613  ;;  %10731 = vmatmul.mubr.msk.f32.vlgmr.msra.gmra.mrb[2].mxu1 %vm593_vm2, %v13370_v48 }
  0xe4   : > { %v2634_v25 = vsel %vm2633_vm6, %v2614_v24, %v2616_v20  ;;  %v2635_v26 = vsel %vm2633_vm6, %v2616_v20, %v2618_v23  ;;  %2103 = vmatprep.mubr.f32.mxu1 %v12924_v0 }
  0xe5   : > { %10758 = vmatprep.subr.msk.mxu0 %vm597_vm0, %v2635_v26 }
  0xe6   : > { %10759 = vmatpush1.msk.msra.mxu0 %vm597_vm0, %v2634_v25 }
  0xe7   : > { %v1788_v28 = vpop.permute.xlu0 %1787  ;;  %v2624_v29 = vpop.permute.xlu1 %2623  ;;  %10760 = vmatmul.mubr.msk.f32.vlgmr.msra.gmra.mrb[2].mxu0 %vm593_vm2, %v13495_v27 }
  0xe8   : > { %v1800_v30 = vsel %vm1793_vm4, %v13391_v54, %v1788_v28  ;;  %v1801_v31 = vsel %vm1793_vm4, %v1788_v28, %v13413_v59  ;;  %2872 = vmatprep.mubr.f32.mxu0 %v12924_v0 }
  0xe9   : > { %10735 = vmatprep.subr.msk.mxu1 %vm597_vm0, %v1801_v31 }
  0xea   : > { %10736 = vmatpush1.msk.msra.mxu1 %vm597_vm0, %v1800_v30 }
  0xeb   : > { %v2626_v32 = vpop.permute.xlu0 %2625  ;;  %v2622_v33 = vpop.permute.xlu1 %2621  ;;  %10737 = vmatmul.mubr.msk.f32.vlgmr.msra.gmra.mrb[6].mxu1 %vm593_vm2, %v13370_v48 }
  0xec   : > { %v2638_v34 = vsel %vm2633_vm6, %v2622_v33, %v2624_v29  ;;  %v2639_v35 = vsel %vm2633_vm6, %v2624_v29, %v2626_v32  ;;  %2381 = vmatprep.mubr.f32.mxu1 %v12924_v0 }
  0xed   : > { %10764 = vmatprep.subr.msk.mxu0 %vm597_vm0, %v2639_v35 }
  0xee   : > { %10765 = vmatpush1.msk.msra.mxu0 %vm597_vm0, %v2638_v34 }
  0xef   : > { %v2200_v36 = vpop.permute.xlu0 %2199  ;;  %v2630_v37 = vpop.permute.xlu1 %2629  ;;  %10766 = vmatmul.mubr.msk.f32.vlgmr.msra.gmra.mrb[4].mxu0 %vm593_vm2, %v13495_v27 }
  0xf0   : > { %v2216_v38 = vsel %vm2213_vm5, %v13427_v63, %v2200_v36  ;;  %v2217_v39 = vsel %vm2213_vm5, %v2200_v36, %v2202_v11  ;;  %3014 = vmatprep.mubr.f32.mxu0 %v12924_v0 }
  0xf1   : > { %10745 = vmatprep.subr.msk.mxu1 %vm597_vm0, %v2217_v39 }
  0xf2   : > { %10746 = vmatpush1.msk.msra.mxu1 %vm597_vm0, %v2216_v38 }
  0xf3   : > { %v2632_v40 = vpop.permute.xlu0 %2631  ;;  %v2208_v41 = vpop.permute.xlu1 %2207  ;;  %10747 = vmatmul.mubr.msk.f32.vlgmr.msra.gmra.mrb[2].mxu1 %vm593_vm2, %v13441_v4 }
  0xf4   : > { %v2642_v42 = vsel %vm2633_vm6, %v2630_v37, %v2632_v40  ;;  %v2220_v43 = vsel %vm2213_vm5, %v13453_v9, %v2208_v41  ;;  %10770 = vmatprep.subr.msk.mxu0 %vm597_vm0, %v2632_v40  ;;  %v2221_v44 = vsel %vm2213_vm5, %v2208_v41, %v2210_v16  ;;  %2523 = vmatprep.mubr.f32.mxu1 %v12924_v0 }
  0xf5   : > { %10751 = vmatprep.subr.msk.mxu1 %vm597_vm0, %v2221_v44  ;;  %10771 = vmatpush1.msk.msra.mxu0 %vm597_vm0, %v2642_v42 }
  0xf6   : > { %10752 = vmatpush1.msk.msra.mxu1 %vm597_vm0, %v2220_v43  ;;  %10772 = vmatmul.mubr.msk.f32.vlgmr.msra.gmra.mrb[0].mxu0 %vm593_vm2, %v13495_v27 }
  0xf7   : > { %v3036_v45 = vpop.permute.xlu0 %3035  ;;  %v3038_v46 = vpop.permute.xlu1 %3037  ;;  %10753 = vmatmul.mubr.msk.f32.vlgmr.msra.gmra.mrb[6].mxu1 %vm593_vm2, %v13441_v4  ;;  %3150 = vmatprep.mubr.f32.mxu0 %v12924_v0 }
  0xf8   : > { %v3055_v47 = vsel %vm3053_vm7, %v3036_v45, %v3038_v46  ;;  %2801 = vmatprep.mubr.f32.mxu1 %v12924_v0 }
  0xf9   : > { %10774 = vmatprep.subr.msk.mxu0 %vm597_vm0, %v3055_v47 }
  0xfb   : > { %v3034_v48 = vpop.permute.xlu0 %3033  ;;  %v2620_v49 = vpop.permute.xlu1 %2619 }
  0xfc   : > { %v3054_v51 = vsel %vm3053_vm7, %v3034_v48, %v3036_v45  ;;  %v2636_v52 = vsel %vm2633_vm6, %v2618_v23, %v2620_v49  ;;  %v2637_v53 = vsel %vm2633_vm6, %v2620_v49, %v2622_v33 }
  0xfd   : > { %10761 = vmatprep.subr.msk.mxu1 %vm597_vm0, %v2637_v53  ;;  %10775 = vmatpush1.msk.msra.mxu0 %vm597_vm0, %v3054_v51 }
  0xfe   : > { %10762 = vmatpush1.msk.msra.mxu1 %vm597_vm0, %v2636_v52  ;;  %10776 = vmatmul.mubr.msk.f32.vlgmr.msra.gmra.mrb[2].mxu0 %vm593_vm2, %v10773_v50  ;;  %v4319_v52 = vlaneseq }
  0xff   : > { %v3044_v54 = vpop.permute.xlu0 %3043  ;;  %v3046_v55 = vpop.permute.xlu1 %3045  ;;  %10763 = vmatmul.mubr.msk.f32.vlgmr.msra.gmra.mrb[2].mxu1 %vm593_vm2, %v13495_v27  ;;  %3292 = vmatprep.mubr.f32.mxu0 %v12924_v0 }
 0x100   : > { %v3059_v56 = vsel %vm3053_vm7, %v3044_v54, %v3046_v55  ;;  %2943 = vmatprep.mubr.f32.mxu1 %v12924_v0  ;;  %v13650_v53 = vshrl.u32 %v4319_v52, 7 }
 0x101   : > { %10780 = vmatprep.subr.msk.mxu0 %vm597_vm0, %v3059_v56 }
 0x103   : > { %v3042_v57 = vpop.permute.xlu0 %3041  ;;  %v2628_v58 = vpop.permute.xlu1 %2627 }
 0x104   : > { %v3058_v59 = vsel %vm3053_vm7, %v3042_v57, %v3044_v54  ;;  %v2640_v60 = vsel %vm2633_vm6, %v2626_v32, %v2628_v58  ;;  %v2641_v61 = vsel %vm2633_vm6, %v2628_v58, %v2630_v37  ;;  %v10805_v32 = vld [vmem:[%s16267_s3 + $0x40] sm:$0xff]  ;;  %v4321_v54 = vsub.s32 0, %v13650_v53 }
 0x105   : > { %10767 = vmatprep.subr.msk.mxu1 %vm597_vm0, %v2641_v61  ;;  %10781 = vmatpush1.msk.msra.mxu0 %vm597_vm0, %v3058_v59 }
 0x106   : > { %10768 = vmatpush1.msk.msra.mxu1 %vm597_vm0, %v2640_v60  ;;  %10782 = vmatmul.mubr.msk.f32.vlgmr.msra.gmra.mrb[4].mxu0 %vm593_vm2, %v10773_v50 }
 0x107   : > { %v3050_v62 = vpop.permute.xlu0 %3049  ;;  %v3052_v63 = vpop.permute.xlu1 %3051  ;;  %10769 = vmatmul.mubr.msk.f32.vlgmr.msra.gmra.mrb[6].mxu1 %vm593_vm2, %v13495_v27  ;;  %3434 = vmatprep.mubr.f32.mxu0 %v12924_v0 }
 0x108   : > { %v3062_v1 = vsel %vm3053_vm7, %v3050_v62, %v3052_v63  ;;  %10786 = vmatprep.subr.msk.mxu0 %vm597_vm0, %v3052_v63  ;;  %3221 = vmatprep.mubr.f32.mxu1 %v12924_v0  ;;  %v4325_v63 = vsub.s32 1, %v13650_v53 }
 0x109   : > { %10787 = vmatpush1.msk.msra.mxu0 %vm597_vm0, %v3062_v1 }
 0x10a   : > { %10788 = vmatmul.mubr.msk.f32.vlgmr.msra.gmra.mrb[0].mxu0 %vm593_vm2, %v10773_v50 }
 0x10b   : > { %v3040_v2 = vpop.permute.xlu0 %3039  ;;  %v3456_v3 = vpop.permute.xlu1 %3455  ;;  %3570 = vmatprep.mubr.f32.mxu0 %v12924_v0 }
 0x10c   : > { %v3056_v4 = vsel %vm3053_vm7, %v3038_v46, %v3040_v2  ;;  %v3057_v5 = vsel %vm3053_vm7, %v3040_v2, %v3042_v57  ;;  %v543_v57 = vld [vmem:[%s16269_s2] sm:$0xff] }
 0x10d   : > { %10777 = vmatprep.subr.msk.mxu1 %vm597_vm0, %v3057_v5 }
 0x10e   : > { %10778 = vmatpush1.msk.msra.mxu1 %vm597_vm0, %v3056_v4 }
 0x10f   : > { %v3458_v6 = vpop.permute.xlu0 %3457  ;;  %v3454_v7 = vpop.permute.xlu1 %3453  ;;  %10779 = vmatmul.mubr.msk.f32.vlgmr.msra.gmra.mrb[2].mxu1 %vm593_vm2, %v10773_v50 }
 0x110   : > { %v3474_v8 = vsel %vm3473_vm8, %v3454_v7, %v3456_v3  ;;  %v3475_v9 = vsel %vm3473_vm8, %v3456_v3, %v3458_v6  ;;  %3363 = vmatprep.mubr.f32.mxu1 %v12924_v0  ;;  %v4333_v7 = vsub.s32 3, %v13650_v53 }
 0x111   : > { %10790 = vmatprep.subr.msk.mxu0 %vm597_vm0, %v3475_v9 }
 0x112   : > { %10791 = vmatpush1.msk.msra.mxu0 %vm597_vm0, %v3474_v8 }
 0x113   : > { %v3048_v11 = vpop.permute.xlu0 %3047  ;;  %10792 = vmatmul.mubr.msk.f32.vlgmr.msra.gmra.mrb[2].mxu0 %vm593_vm2, %v10789_v10 }
 0x114   : > { %v3060_v12 = vsel %vm3053_vm7, %v3046_v55, %v3048_v11  ;;  %v3464_v13 = vpop.permute.xlu1 %3463  ;;  %v3061_v14 = vsel %vm3053_vm7, %v3048_v11, %v3050_v62  ;;  %3712 = vmatprep.mubr.f32.mxu0 %v12924_v0  ;;  %v4322_v62 = vrot.slane %v543_v57, %v4321_v54  ;;  %v4326_v11 = vrot.slane %v543_v57, %v4325_v63 }
 0x115   : > { %10783 = vmatprep.subr.msk.mxu1 %vm597_vm0, %v3061_v14 }
 0x116   : > { %10784 = vmatpush1.msk.msra.mxu1 %vm597_vm0, %v3060_v12 }
 0x117   : > { %v3466_v15 = vpop.permute.xlu0 %3465  ;;  %10785 = vmatmul.mubr.msk.f32.vlgmr.msra.gmra.mrb[6].mxu1 %vm593_vm2, %v10773_v50 }
 0x118   : > { %v3462_v16 = vpop.permute.xlu1 %3461  ;;  %v3479_v17 = vsel %vm3473_vm8, %v3464_v13, %v3466_v15  ;;  %3641 = vmatprep.mubr.f32.mxu1 %v12924_v0 }
 0x119   : > { %v3478_v18 = vsel %vm3473_vm8, %v3462_v16, %v3464_v13  ;;  %10796 = vmatprep.subr.msk.mxu0 %vm597_vm0, %v3479_v17  ;;  %v4337_v13 = vsub.s32 4, %v13650_v53 }
 0x11a   : > { %10797 = vmatpush1.msk.msra.mxu0 %vm597_vm0, %v3478_v18 }
 0x11b   : > { %v3460_v19 = vpop.permute.xlu0 %3459  ;;  %10798 = vmatmul.mubr.msk.f32.vlgmr.msra.gmra.mrb[4].mxu0 %vm593_vm2, %v10789_v10 }
 0x11c   : > { %v3476_v20 = vsel %vm3473_vm8, %v3458_v6, %v3460_v19  ;;  %v3470_v21 = vpop.permute.xlu1 %3469  ;;  %v3477_v22 = vsel %vm3473_vm8, %v3460_v19, %v3462_v16  ;;  %3854 = vmatprep.mubr.f32.mxu0 %v12924_v0  ;;  %v4334_v16 = vrot.slane %v543_v57, %v4333_v7 }
 0x11d   : > { %10793 = vmatprep.subr.msk.mxu1 %vm597_vm0, %v3477_v22  ;;  %v4341_v22 = vsub.s32 5, %v13650_v53 }
 0x11e   : > { %10794 = vmatpush1.msk.msra.mxu1 %vm597_vm0, %v3476_v20 }
 0x11f   : > { %v3472_v23 = vpop.permute.xlu0 %3471  ;;  %10795 = vmatmul.mubr.msk.f32.vlgmr.msra.gmra.mrb[2].mxu1 %vm593_vm2, %v10789_v10 }
 0x120   : > { %v3482_v24 = vsel %vm3473_vm8, %v3470_v21, %v3472_v23  ;;  %v3468_v25 = vpop.permute.xlu1 %3467  ;;  %10802 = vmatprep.subr.msk.mxu0 %vm597_vm0, %v3472_v23  ;;  %3783 = vmatprep.mubr.f32.mxu1 %v12924_v0 }
 0x121   : > { %v3480_v26 = vsel %vm3473_vm8, %v3466_v15, %v3468_v25  ;;  %v3481_v27 = vsel %vm3473_vm8, %v3468_v25, %v3470_v21  ;;  %10803 = vmatpush1.msk.msra.mxu0 %vm597_vm0, %v3482_v24  ;;  %v4345_v24 = vsub.s32 6, %v13650_v53  ;;  %v4338_v25 = vrot.slane %v543_v57, %v4337_v13 }
 0x122   : > { %10799 = vmatprep.subr.msk.mxu1 %vm597_vm0, %v3481_v27  ;;  %10804 = vmatmul.mubr.msk.f32.vlgmr.msra.gmra.mrb[0].mxu0 %vm593_vm2, %v10789_v10 }
 0x123   : > { %10800 = vmatpush1.msk.msra.mxu1 %vm597_vm0, %v3480_v26  ;;  %v3876_v28 = vpop.permute.xlu0 %3875  ;;  %3990 = vmatprep.mubr.f32.mxu0 %v12924_v0 }
 0x124   : > { %v3878_v29 = vpop.permute.xlu1 %3877  ;;  %10801 = vmatmul.mubr.msk.f32.vlgmr.msra.gmra.mrb[6].mxu1 %vm593_vm2, %v10789_v10 }
 0x125   : > { %v3895_v30 = vsel %vm3893_vm9, %v3876_v28, %v3878_v29  ;;  %4061 = vmatprep.mubr.f32.mxu1 %v12924_v0 }
 0x126   : > { %10806 = vmatprep.subr.msk.mxu0 %vm597_vm0, %v3895_v30 }
 0x127   : > { %v3874_v31 = vpop.permute.xlu0 %3873 }
 0x128   : > { %v3894_v33 = vsel %vm3893_vm9, %v3874_v31, %v3876_v28  ;;  %v3880_v34 = vpop.permute.xlu1 %3879 }
 0x129   : > { %10807 = vmatpush1.msk.msra.mxu0 %vm597_vm0, %v3894_v33  ;;  %v3896_v38 = vsel %vm3893_vm9, %v3878_v29, %v3880_v34 }
 0x12a   : > { %10808 = vmatmul.mubr.msk.f32.vlgmr.msra.gmra.mrb[2].mxu0 %vm593_vm2, %v10805_v32 }
 0x12b   : > { %v3882_v35 = vpop.permute.xlu0 %3881  ;;  %4132 = vmatprep.mubr.f32.mxu0 %v12924_v0 }
 0x12c   : > { %v3884_v36 = vpop.permute.xlu1 %3883  ;;  %v3897_v37 = vsel %vm3893_vm9, %v3880_v34, %v3882_v35 }
 0x12d   : > { %10809 = vmatprep.subr.msk.mxu1 %vm597_vm0, %v3897_v37  ;;  %v3898_v42 = vsel %vm3893_vm9, %v3882_v35, %v3884_v36  ;;  %v4342_v37 = vrot.slane %v543_v57, %v4341_v22 }
 0x12e   : > { %10810 = vmatpush1.msk.msra.mxu1 %vm597_vm0, %v3896_v38  ;;  %v13670_v38 = vld [vmem:[#allocation2] sm:$0xff] }
 0x12f   : > { %v3886_v39 = vpop.permute.xlu0 %3885  ;;  %10811 = vmatmul.mubr.msk.f32.vlgmr.msra.gmra.mrb[2].mxu1 %vm593_vm2, %v10805_v32  ;;  %4389 = vst.msk [vmem:[#allocation2 + $0x48] sm:$0xff] %vm4388_vm10, %v13670_v38 }
 0x130   : > { %v3888_v40 = vpop.permute.xlu1 %3887  ;;  %v3899_v41 = vsel %vm3893_vm9, %v3884_v36, %v3886_v39  ;;  %4203 = vmatprep.mubr.f32.mxu1 %v12924_v0 }
 0x131   : > { %10812 = vmatprep.subr.msk.mxu0 %vm597_vm0, %v3899_v41  ;;  %v3900_v46 = vsel %vm3893_vm9, %v3886_v39, %v3888_v40 }
 0x132   : > { %10813 = vmatpush1.msk.msra.mxu0 %vm597_vm0, %v3898_v42 }
 0x133   : > { %v3890_v43 = vpop.permute.xlu0 %3889  ;;  %10814 = vmatmul.mubr.msk.f32.vlgmr.msra.gmra.mrb[4].mxu0 %vm593_vm2, %v10805_v32 }
 0x134   : > { %v3892_v44 = vpop.permute.xlu1 %3891  ;;  %v3901_v45 = vsel %vm3893_vm9, %v3888_v40, %v3890_v43  ;;  %4274 = vmatprep.mubr.f32.mxu0 %v12924_v0  ;;  %v4346_v40 = vrot.slane %v543_v57, %v4345_v24 }
 0x135   : > { %v3902_v47 = vsel %vm3893_vm9, %v3890_v43, %v3892_v44  ;;  %10815 = vmatprep.subr.msk.mxu1 %vm597_vm0, %v3901_v45  ;;  %10818 = vmatprep.subr.msk.mxu0 %vm597_vm0, %v3892_v44  ;;  %v544_v43 = vld [vmem:[%s16269_s2 + $0x8] sm:$0x3] }
 0x136   : > { %10816 = vmatpush1.msk.msra.mxu1 %vm597_vm0, %v3900_v46  ;;  %10819 = vmatpush1.msk.msra.mxu0 %vm597_vm0, %v3902_v47  ;;  %vm8270_vm0 = vcmask 1040384  }
 0x137   : > { %10817 = vmatmul.mubr.msk.f32.vlgmr.msra.gmra.mrb[6].mxu1 %vm593_vm2, %v10805_v32  ;;  %10820 = vmatmul.mubr.msk.f32.vlgmr.msra.gmra.mrb[0].mxu0 %vm593_vm2, %v10805_v32  ;;  %v4349_v32 = vsub.s32 7, %v13650_v53  ;;  %vm10283_vm2 = vcmask 261120  }
 0x138   : > { %4582 = vmatprep.mubr.f32.mxu1 %v12924_v0  ;;  %v4329_v0 = vsub.s32 2, %v13650_v53 }
 0x139   : > { %v4350_v45 = vrot.slane %v543_v57, %v4349_v32 }
 0x13a   : > { %v4330_v5 = vrot.slane %v543_v57, %v4329_v0 }
 0x145   : > { %v4295_v56 = vpop.permute.xlu0 %4294 }
 0x17d   : > { %v684_v48 = vpop.f32.mrb[0].mxu1 }
 0x17e   : > { %v686_v49 = vpop.f32.mrb[1].mxu1 }
 0x18e   : > { %v826_v50 = vpop.f32.mrb[4].mxu1 }
 0x18f   : > { %v828_v51 = vpop.f32.mrb[5].mxu1 }
 0x1fd   : > { %v3992_v55 = vpop.f32.mrb[2].mxu0 }
 0x1fe   : > { %v12584_v58 = vadd.f32 %v3992_v55, %v684_v48  ;;  %v3994_v59 = vpop.f32.mrb[3].mxu0  ;;  %v4358_v55 = vrot.slane %v544_v43, %v4325_v63 }
 0x1ff   : > { %v12585_v60 = vadd.f32 %v3994_v59, %v686_v49 }
 0x200   : > { %v4297_v61 = vadd.f32 %v12584_v58, %v4295_v56 }
 0x201   : > { %v4298_v1 = vadd.f32 %v12585_v60, %v4295_v56 }
 0x202   : > { %v4063_v2 = vpop.f32.mrb[2].mxu1  ;;  %v4307_v3 = vmax.f32 %v4297_v61, 0.0 }
 0x203   : > { %v4299_v4 = vadd.f32 %v4295_v56, %v4063_v2  ;;  %v4065_v6 = vpop.f32.mrb[3].mxu1  ;;  %v4308_v10 = vmax.f32 %v4298_v1, 0.0 }
 0x204   : > { %v4300_v8 = vadd.f32 %v4295_v56, %v4065_v6  ;;  %v4369_v9 = vmul.f32 %v4322_v62, %v4307_v3 }
 0x205   : > { %v4309_v12 = vmax.f32 %v4299_v4, 0.0  ;;  %v4370_v21 = vmul.f32 %v4326_v11, %v4308_v10 }
 0x206   : > { %4400 = vrot.lane.b32.xlu1 %v4369_v9, %s12934_s19  ;;  %v4134_v14 = vpop.f32.mrb[4].mxu0  ;;  %v4310_v19 = vmax.f32 %v4300_v8, 0.0 }
 0x207   : > { %v4371_v15 = vmul.f32 %v4330_v5, %v4309_v12  ;;  %v12586_v17 = vadd.f32 %v4134_v14, %v826_v50  ;;  %v4136_v18 = vpop.f32.mrb[5].mxu0  ;;  %v4354_v50 = vrot.slane %v544_v43, %v4321_v54 }
 0x208   : > { %v12587_v20 = vadd.f32 %v4136_v18, %v828_v51  ;;  %v4372_v34 = vmul.f32 %v4334_v16, %v4310_v19  ;;  %v10821_v19 = vld [vmem:[%s16273_s5 + $0x4] sm:$0xf] }
 0x209   : > { %v4301_v23 = vadd.f32 %v12586_v17, %v4295_v56  ;;  %4404 = vrot.lane.b32.xlu0 %v4371_v15, %s12934_s19 }
 0x20a   : > { %v4302_v26 = vadd.f32 %v12587_v20, %v4295_v56  ;;  %v4205_v27 = vpop.f32.mrb[6].mxu1  ;;  %4402 = vrot.lane.b32.xlu1 %v4370_v21, %s12934_s19  ;;  %v4276_v28 = vpop.f32.mrb[0].mxu0 }
 0x20b   : > { %v4311_v29 = vmax.f32 %v4301_v23, 0.0  ;;  %v4303_v30 = vadd.f32 %v4295_v56, %v4205_v27  ;;  %v4207_v31 = vpop.f32.mrb[7].mxu1  ;;  %v4278_v33 = vpop.f32.mrb[1].mxu0  ;;  %v4305_v41 = vadd.f32 %v4295_v56, %v4276_v28 }
 0x20c   : > { %v4312_v35 = vmax.f32 %v4302_v26, 0.0  ;;  %v4304_v36 = vadd.f32 %v4295_v56, %v4207_v31  ;;  %v4306_v46 = vadd.f32 %v4295_v56, %v4278_v33 }
 0x20d   : > { %v4313_v39 = vmax.f32 %v4303_v30, 0.0  ;;  %v4373_v42 = vmul.f32 %v4338_v25, %v4311_v29  ;;  %v4315_v49 = vmax.f32 %v4305_v41, 0.0 }
 0x20e   : > { %4406 = vrot.lane.b32.xlu1 %v4372_v34, %s12934_s19  ;;  %v4314_v44 = vmax.f32 %v4304_v36, 0.0  ;;  %v4374_v47 = vmul.f32 %v4342_v37, %v4312_v35  ;;  %v4316_v52 = vmax.f32 %v4306_v46, 0.0  ;;  %v4452_v36 = vld [vmem:[%s16273_s5] sm:$0xf] }
 0x20f   : > { %4408 = vrot.lane.b32.xlu0 %v4373_v42, %s12934_s19  ;;  %v4375_v48 = vmul.f32 %v4346_v40, %v4313_v39  ;;  %v4377_v58 = vmul.f32 %v4354_v50, %v4315_v49 }
 0x210   : > { %v4376_v51 = vmul.f32 %v4350_v45, %v4314_v44  ;;  %v4378_v56 = vmul.f32 %v4358_v55, %v4316_v52  ;;  %v10832_v52 = vld [vmem:[%s16273_s5 + $0x8] sm:$0xf] }
 0x212   : > { %4410 = vrot.lane.b32.xlu1 %v4374_v47, %s12934_s19  ;;  %v8094_v47 = vld [vmem:[%s16233_s6] sm:$0xf] }
 0x213   : > { %4412 = vrot.lane.b32.xlu0 %v4375_v48, %s12934_s19 }
 0x216   : > { %4414 = vrot.lane.b32.xlu1 %v4376_v51, %s12934_s19 }
 0x217   : > { %4416 = vrot.lane.b32.xlu0 %v4377_v58, %s12934_s19 }
 0x21a   : > { %4418 = vrot.lane.b32.xlu1 %v4378_v56, %s12934_s19  ;;  %s16272_s19 = smov 91  }
 0x278   : > { %v4401_v57 = vpop.permute.xlu1 %4400 }
 0x279   : > { %4441 = vst.msk [vmem:[#allocation2] sm:$0xff] %vm4440_vm11, %v4401_v57 }
 0x27b   : > { %v4405_v54 = vpop.permute.xlu0 %4404 }
 0x27c   : > { %v4403_v59 = vpop.permute.xlu1 %4402 }
 0x27d   : > { %v13688_v60 = vsel %vm4420_vm12, %v4401_v57, %v4403_v59  ;;  %v13691_v53 = vsel %vm4420_vm12, %v4403_v59, %v4405_v54 }
 0x27e   : > { %4479 = vrot.lane.b32.xlu1 %v13691_v53, %s12925_s29 }
 0x280   : > { %v4407_v0 = vpop.permute.xlu1 %4406  ;;  %v13695_v61 = vld [vmem:[#allocation2] sm:$0xff] }
 0x281   : > { %v13698_v62 = vsel %vm4420_vm12, %v4405_v54, %v4407_v0  ;;  %v4409_v63 = vpop.permute.xlu0 %4408  ;;  %4475 = vrot.lane.b32.xlu0 %v13695_v61, %s12925_s29 }
 0x282   : > { %v13703_v1 = vsel %vm4420_vm12, %v4407_v0, %v4409_v63  ;;  %4481 = vrot.lane.b32.xlu1 %v13698_v62, %s12925_s29 }
 0x284   : > { %v4411_v2 = vpop.permute.xlu1 %4410 }
 0x285   : > { %v13708_v3 = vsel %vm4420_vm12, %v4409_v63, %v4411_v2  ;;  %v4413_v4 = vpop.permute.xlu0 %4412  ;;  %4477 = vrot.lane.b32.xlu0 %v13688_v60, %s12925_s29  ;;  %v8138_v63 = vld [vmem:[%s16234_s7 + $0x88] sm:$0xff] }
 0x286   : > { %v13713_v5 = vsel %vm4420_vm12, %v4411_v2, %v4413_v4  ;;  %4485 = vrot.lane.b32.xlu1 %v13708_v3, %s12925_s29 }
 0x288   : > { %v4415_v6 = vpop.permute.xlu1 %4414 }
 0x289   : > { %v13718_v7 = vsel %vm4420_vm12, %v4413_v4, %v4415_v6  ;;  %v4417_v8 = vpop.permute.xlu0 %4416  ;;  %4483 = vrot.lane.b32.xlu0 %v13703_v1, %s12925_s29  ;;  %v8122_v4 = vld [vmem:[%s16234_s7 + $0x8] sm:$0xff] }
 0x28a   : > { %v13723_v9 = vsel %vm4420_vm12, %v4415_v6, %v4417_v8  ;;  %4489 = vrot.lane.b32.xlu1 %v13718_v7, %s12925_s29  ;;  %v8139_v6 = vld [vmem:[%s16234_s7 + $0x90] sm:$0xff] }
 0x28c   : > { %v4419_v10 = vpop.permute.xlu1 %4418 }
 0x28d   : > { %v4429_v11 = vsel %vm4420_vm12, %v4417_v8, %v4419_v10  ;;  %4487 = vrot.lane.b32.xlu0 %v13713_v5, %s12925_s29  ;;  %v8123_v8 = vld [vmem:[%s16234_s7 + $0x10] sm:$0xff] }
 0x28e   : > { %4451 = vst.msk [vmem:[#allocation2 + $0x48] sm:$0xff] %vm4450_vm13, %v4429_v11 }
 0x291   : > { %4491 = vrot.lane.b32.xlu0 %v13723_v9, %s12925_s29 }
 0x295   : > { %v13732_v12 = vld [vmem:[#allocation2 + $0x48] sm:$0xff]  ;;  %5235 = vrot.lane.b32.xlu0 %v13688_v60, %s16254_s30 }
 0x296   : > { %4493 = vrot.lane.b32.xlu1 %v13732_v12, %s12925_s29  ;;  %s16270_s29 = smov 93  }
 0x299   : > { %5233 = vrot.lane.b32.xlu0 %v13695_v61, %s16254_s30 }
 0x29a   : > { %5237 = vrot.lane.b32.xlu1 %v13691_v53, %s16254_s30 }
 0x29d   : > { %5241 = vrot.lane.b32.xlu0 %v13703_v1, %s16254_s30 }
 0x29e   : > { %5239 = vrot.lane.b32.xlu1 %v13698_v62, %s16254_s30 }
 0x2a1   : > { %5245 = vrot.lane.b32.xlu0 %v13713_v5, %s16254_s30 }
 0x2a2   : > { %5243 = vrot.lane.b32.xlu1 %v13708_v3, %s16254_s30 }
 0x2a5   : > { %5249 = vrot.lane.b32.xlu0 %v13723_v9, %s16254_s30 }
 0x2a6   : > { %5247 = vrot.lane.b32.xlu1 %v13718_v7, %s16254_s30 }
 0x2a9   : > { %5644 = vrot.lane.b32.xlu0 %v13688_v60, %s16270_s29 }
 0x2aa   : > { %5251 = vrot.lane.b32.xlu1 %v13732_v12, %s16254_s30  ;;  %s16277_s30 = smov 126  }
 0x2ad   : > { %5642 = vrot.lane.b32.xlu0 %v13695_v61, %s16270_s29 }
 0x2ae   : > { %5646 = vrot.lane.b32.xlu1 %v13691_v53, %s16270_s29 }
 0x2b1   : > { %5650 = vrot.lane.b32.xlu0 %v13703_v1, %s16270_s29 }
 0x2b2   : > { %5648 = vrot.lane.b32.xlu1 %v13698_v62, %s16270_s29 }
 0x2b5   : > { %5654 = vrot.lane.b32.xlu0 %v13713_v5, %s16270_s29 }
 0x2b6   : > { %5652 = vrot.lane.b32.xlu1 %v13708_v3, %s16270_s29 }
 0x2b9   : > { %5658 = vrot.lane.b32.xlu0 %v13723_v9, %s16270_s29 }
 0x2ba   : > { %5656 = vrot.lane.b32.xlu1 %v13718_v7, %s16270_s29 }
 0x2bd   : > { %6053 = vrot.lane.b32.xlu0 %v13688_v60, %s16271_s20 }
 0x2be   : > { %5660 = vrot.lane.b32.xlu1 %v13732_v12, %s16270_s29  ;;  %s12937_s29 = smov [#allocation3]  }
 0x2c1   : > { %6051 = vrot.lane.b32.xlu0 %v13695_v61, %s16271_s20 }
 0x2c2   : > { %6055 = vrot.lane.b32.xlu1 %v13691_v53, %s16271_s20 }
 0x2c5   : > { %6059 = vrot.lane.b32.xlu0 %v13703_v1, %s16271_s20 }
 0x2c6   : > { %6057 = vrot.lane.b32.xlu1 %v13698_v62, %s16271_s20 }
 0x2c9   : > { %6063 = vrot.lane.b32.xlu0 %v13713_v5, %s16271_s20 }
 0x2ca   : > { %6061 = vrot.lane.b32.xlu1 %v13708_v3, %s16271_s20 }
 0x2cd   : > { %6067 = vrot.lane.b32.xlu0 %v13723_v9, %s16271_s20 }
 0x2ce   : > { %6065 = vrot.lane.b32.xlu1 %v13718_v7, %s16271_s20 }
 0x2d1   : > { %6462 = vrot.lane.b32.xlu0 %v13688_v60, %s16272_s19 }
 0x2d2   : > { %6069 = vrot.lane.b32.xlu1 %v13732_v12, %s16271_s20  ;;  %s16274_s20 = smov 57  }
 0x2d5   : > { %6460 = vrot.lane.b32.xlu0 %v13695_v61, %s16272_s19 }
 0x2d6   : > { %6464 = vrot.lane.b32.xlu1 %v13691_v53, %s16272_s19 }
 0x2d9   : > { %6468 = vrot.lane.b32.xlu0 %v13703_v1, %s16272_s19 }
 0x2da   : > { %6466 = vrot.lane.b32.xlu1 %v13698_v62, %s16272_s19 }
 0x2dd   : > { %6472 = vrot.lane.b32.xlu0 %v13713_v5, %s16272_s19 }
 0x2de   : > { %6470 = vrot.lane.b32.xlu1 %v13708_v3, %s16272_s19 }
 0x2e1   : > { %6476 = vrot.lane.b32.xlu0 %v13723_v9, %s16272_s19 }
 0x2e2   : > { %6474 = vrot.lane.b32.xlu1 %v13718_v7, %s16272_s19 }
 0x2e5   : > { %6871 = vrot.lane.b32.xlu0 %v13688_v60, %s12930_s28 }
 0x2e6   : > { %6478 = vrot.lane.b32.xlu1 %v13732_v12, %s16272_s19  ;;  %s16276_s19 = sld [smem:[#allocation10_spill]] }
 0x2e9   : > { %6869 = vrot.lane.b32.xlu0 %v13695_v61, %s12930_s28 }
 0x2ea   : > { %6873 = vrot.lane.b32.xlu1 %v13691_v53, %s12930_s28 }
 0x2ec   : > { %s537_s1 = scalar_lea.vmem %s16276_s19, %s13074_s18  ;;  %s16256_s19 = sshll.u32 %s13045_s25, 4 }
 0x2ed   : > { %6877 = vrot.lane.b32.xlu0 %v13703_v1, %s12930_s28  ;;  %s16150_s4 = scalar_lea.hbm %s16242_s15, %s16256_s19 }
 0x2ee   : > { %6875 = vrot.lane.b32.xlu1 %v13698_v62, %s12930_s28 }
 0x2f0   : > { %v4480_v13 = vpop.permute.xlu1 %4479 }
 0x2f1   : > { %6881 = vrot.lane.b32.xlu0 %v13713_v5, %s12930_s28 }
 0x2f2   : > { %6879 = vrot.lane.b32.xlu1 %v13708_v3, %s12930_s28 }
 0x2f3   : > { %v4476_v14 = vpop.permute.xlu0 %4475 }
 0x2f4   : > { %v4482_v16 = vpop.permute.xlu1 %4481 }
 0x2f5   : > { %6885 = vrot.lane.b32.xlu0 %v13723_v9, %s12930_s28  ;;  %v4497_v22 = vsel %vm583_vm1, %v4480_v13, %v4482_v16 }
 0x2f6   : > { %6883 = vrot.lane.b32.xlu1 %v13718_v7, %s12930_s28 }
 0x2f7   : > { %v4478_v15 = vpop.permute.xlu0 %4477 }
 0x2f8   : > { %v4495_v17 = vsel %vm583_vm1, %v4476_v14, %v4478_v15  ;;  %v4496_v18 = vsel %vm583_vm1, %v4478_v15, %v4480_v13  ;;  %v4486_v23 = vpop.permute.xlu1 %4485 }
 0x2f9   : > { %4518 = vmatprep.subr.mxu1 %v4496_v18  ;;  %7280 = vrot.lane.b32.xlu0 %v13688_v60, %s16274_s20 }
 0x2fa   : > { %6887 = vrot.lane.b32.xlu1 %v13732_v12, %s12930_s28  ;;  %4519 = vmatpush1.msra.mxu1 %v4495_v17  ;;  %v8142_v17 = vld [vmem:[%s16234_s7 + $0xa8] sm:$0xff]  ;;  %s16141_s28 = sand.u32 1, %s12914_s22  }
 0x2fb   : > { %v4484_v20 = vpop.permute.xlu0 %4483  ;;  %10822 = vmatmul.mubr.msk.f32.vlgmr.msra.gmra.mrb[8].mxu1 %vm4514_vm14, %v10821_v19  ;;  %s10552_s18 = scalar_lea.sflag [#allocation4], %s16141_s28 }
 0x2fc   : > { %v4498_v21 = vsel %vm583_vm1, %v4482_v16, %v4484_v20  ;;  %4653 = vmatprep.mubr.f32.mxu1 %v13670_v38  ;;  %v4499_v26 = vsel %vm583_vm1, %v4484_v20, %v4486_v23  ;;  %v4490_v27 = vpop.permute.xlu1 %4489  ;;  %v8141_v16 = vld [vmem:[%s16234_s7 + $0xa0] sm:$0xff]  ;;  %v8126_v20 = vld [vmem:[%s16234_s7 + $0x28] sm:$0xff] }
 0x2fd   : > { %7278 = vrot.lane.b32.xlu0 %v13695_v61, %s16274_s20  ;;  %4589 = vmatprep.subr.mxu1 %v4498_v21  ;;  %v11960_v18 = vpack.c.bf16 %v8142_v17, %v8141_v16 }
 0x2fe   : > { %7282 = vrot.lane.b32.xlu1 %v13691_v53, %s16274_s20  ;;  %4590 = vmatpush1.msra.mxu1 %v4497_v22 }
 0x2ff   : > { %v4488_v24 = vpop.permute.xlu0 %4487  ;;  %10823 = vmatmul.mubr.msk.f32.vlgmr.msra.gmra.mrb[10].mxu1 %vm4514_vm14, %v10821_v19 }
 0x300   : > { %v4500_v25 = vsel %vm583_vm1, %v4486_v23, %v4488_v24  ;;  %4724 = vmatprep.mubr.f32.mxu1 %v13670_v38  ;;  %v4501_v30 = vsel %vm583_vm1, %v4488_v24, %v4490_v27  ;;  %v14015_v23 = vld [vmem:[%s16273_s5 + $0xc] sm:$0xf] }
 0x301   : > { %7286 = vrot.lane.b32.xlu0 %v13703_v1, %s16274_s20  ;;  %4660 = vmatprep.subr.mxu1 %v4500_v25 }
 0x302   : > { %7284 = vrot.lane.b32.xlu1 %v13698_v62, %s16274_s20  ;;  %4661 = vmatpush1.msra.mxu1 %v4499_v26 }
 0x303   : > { %v4492_v28 = vpop.permute.xlu0 %4491  ;;  %10824 = vmatmul.mubr.msk.f32.vlgmr.msra.gmra.mrb[12].mxu1 %vm4514_vm14, %v10821_v19 }
 0x304   : > { %v4502_v29 = vsel %vm583_vm1, %v4490_v27, %v4492_v28  ;;  %4795 = vmatprep.mubr.f32.mxu1 %v13670_v38  ;;  %v8143_v27 = vld [vmem:[%s16234_s7 + $0xb0] sm:$0xff] }
 0x305   : > { %7290 = vrot.lane.b32.xlu0 %v13713_v5, %s16274_s20  ;;  %4731 = vmatprep.subr.mxu1 %v4502_v29  ;;  %v8127_v29 = vld [vmem:[%s16234_s7 + $0x30] sm:$0xff] }
 0x306   : > { %7288 = vrot.lane.b32.xlu1 %v13708_v3, %s16274_s20  ;;  %4732 = vmatpush1.msra.mxu1 %v4501_v30 }
 0x307   : > { %v5236_v31 = vpop.permute.xlu0 %5235  ;;  %10825 = vmatmul.mubr.msk.f32.vlgmr.msra.gmra.mrb[14].mxu1 %vm4514_vm14, %v10821_v19 }
 0x308   : > { %v4494_v32 = vpop.permute.xlu1 %4493  ;;  %4866 = vmatprep.mubr.f32.mxu1 %v13670_v38 }
 0x309   : > { %v4503_v33 = vsel %vm583_vm1, %v4492_v28, %v4494_v32  ;;  %4802 = vmatprep.subr.mxu1 %v4494_v32  ;;  %7294 = vrot.lane.b32.xlu0 %v13723_v9, %s16274_s20  ;;  %v8144_v28 = vld [vmem:[%s16234_s7 + $0xb8] sm:$0xff]  ;;  %vm12936_vm1 = vmmov 0  }
 0x30a   : > { %7292 = vrot.lane.b32.xlu1 %v13718_v7, %s16274_s20  ;;  %4803 = vmatpush1.msra.mxu1 %v4503_v33  ;;  %v11964_v30 = vpack.c.bf16 %v8144_v28, %v8143_v27  ;;  %v10850_v27 = vld [vmem:[%s16273_s5 + $0x14] sm:$0xf] }
 0x30b   : > { %4876 = vmatprep.subr.mxu1 %v13688_v60  ;;  %v5234_v34 = vpop.permute.xlu0 %5233  ;;  %10826 = vmatmul.mubr.msk.f32.vlgmr.msra.gmra.mrb[16].mxu1 %vm4514_vm14, %v10821_v19  ;;  %v8125_v19 = vld [vmem:[%s16234_s7 + $0x20] sm:$0xff] }
 0x30c   : > { %v5238_v35 = vpop.permute.xlu1 %5237  ;;  %4877 = vmatpush1.msra.mxu1 %v13695_v61  ;;  %4940 = vmatprep.mubr.f32.mxu1 %v13670_v38  ;;  %v5253_v48 = vsel %vm1373_vm3, %v5234_v34, %v5236_v31  ;;  %v11962_v24 = vpack.c.bf16 %v8126_v20, %v8125_v19 }
 0x30d   : > { %4947 = vmatprep.subr.mxu1 %v13698_v62  ;;  %7689 = vrot.lane.b32.xlu0 %v13688_v60, %s16275_s26  ;;  %v5254_v46 = vsel %vm1373_vm3, %v5236_v31, %v5238_v35  ;;  %v8128_v31 = vld [vmem:[%s16234_s7 + $0x38] sm:$0xff] }
 0x30e   : > { %7296 = vrot.lane.b32.xlu1 %v13732_v12, %s16274_s20  ;;  %v11966_v34 = vpack.c.bf16 %v8128_v31, %v8127_v29  ;;  %s12832_s20 = sshll.u32 %s12937_s29, 4  ;;  %s12833_s20 = int_to_ptr.vmem [resolvable:$false] %s12832_s20 }
 0x30f   : > { %v5242_v37 = vpop.permute.xlu0 %5241  ;;  %10827 = vmatmul.mubr.msk.f32.vlgmr.msra.gmra.mrb[8].mxu1 %vm4514_vm14, %v4452_v36 }
 0x310   : > { %v5240_v39 = vpop.permute.xlu1 %5239  ;;  %4948 = vmatpush1.msra.mxu1 %v13691_v53  ;;  %5011 = vmatprep.mubr.f32.mxu1 %v13670_v38 }
 0x311   : > { %5018 = vmatprep.subr.mxu1 %v13708_v3  ;;  %7687 = vrot.lane.b32.xlu0 %v13695_v61, %s16275_s26  ;;  %v5256_v51 = vsel %vm1373_vm3, %v5240_v39, %v5242_v37  ;;  %v5255_v55 = vsel %vm1373_vm3, %v5238_v35, %v5240_v39  ;;  %v8146_v39 = vld [vmem:[%s16234_s7 + $0xc8] sm:$0xff] }
 0x312   : > { %7691 = vrot.lane.b32.xlu1 %v13691_v53, %s16275_s26 }
 0x313   : > { %v5246_v40 = vpop.permute.xlu0 %5245  ;;  %10828 = vmatmul.mubr.msk.f32.vlgmr.msra.gmra.mrb[10].mxu1 %vm4514_vm14, %v4452_v36 }
 0x314   : > { %v5244_v41 = vpop.permute.xlu1 %5243  ;;  %5019 = vmatpush1.msra.mxu1 %v13703_v1  ;;  %5082 = vmatprep.mubr.f32.mxu1 %v13670_v38 }
 0x315   : > { %5089 = vmatprep.subr.mxu1 %v13718_v7  ;;  %7695 = vrot.lane.b32.xlu0 %v13703_v1, %s16275_s26  ;;  %v5258_v57 = vsel %vm1373_vm3, %v5244_v41, %v5246_v40  ;;  %v5257_v54 = vsel %vm1373_vm3, %v5242_v37, %v5244_v41  ;;  %v8121_v1 = vld [vmem:[%s16234_s7] sm:$0xff] }
 0x316   : > { %7693 = vrot.lane.b32.xlu1 %v13698_v62, %s16275_s26  ;;  %v8137_v62 = vld [vmem:[%s16234_s7 + $0x80] sm:$0xff] }
 0x317   : > { %v13902_v42 = vpop.permute.xlu0 %5249  ;;  %10829 = vmatmul.mubr.msk.f32.vlgmr.msra.gmra.mrb[12].mxu1 %vm4514_vm14, %v4452_v36  ;;  %v8145_v37 = vld [vmem:[%s16234_s7 + $0xc0] sm:$0xff] }
 0x318   : > { %v5248_v43 = vpop.permute.xlu1 %5247  ;;  %5090 = vmatpush1.msra.mxu1 %v13713_v5  ;;  %5153 = vmatprep.mubr.f32.mxu1 %v13670_v38  ;;  %v11968_v41 = vpack.c.bf16 %v8146_v39, %v8145_v37 }
 0x319   : > { %5160 = vmatprep.subr.mxu1 %v13732_v12  ;;  %7699 = vrot.lane.b32.xlu0 %v13713_v5, %s16275_s26  ;;  %v5260_v53 = vsel %vm1373_vm3, %v5248_v43, %v13902_v42  ;;  %v5259_v0 = vsel %vm1373_vm3, %v5246_v40, %v5248_v43  ;;  %v11954_v5 = vpack.c.bf16 %v8122_v4, %v8121_v1  ;;  %v8129_v40 = vld [vmem:[%s16234_s7 + $0x40] sm:$0xff] }
 0x31a   : > { %7697 = vrot.lane.b32.xlu1 %v13708_v3, %s16275_s26  ;;  %v11952_v3 = vpack.c.bf16 %v8138_v63, %v8137_v62 }
 0x31b   : > { %v13912_v44 = vpop.permute.xlu0 %5644  ;;  %10830 = vmatmul.mubr.msk.f32.vlgmr.msra.gmra.mrb[14].mxu1 %vm4514_vm14, %v4452_v36 }
 0x31c   : > { %v5252_v45 = vpop.permute.xlu1 %5251  ;;  %5161 = vmatpush1.msra.mxu1 %v13723_v9  ;;  %5224 = vmatprep.mubr.f32.mxu1 %v13670_v38 }
 0x31d   : > { %5275 = vmatprep.subr.mxu1 %v5254_v46  ;;  %7703 = vrot.lane.b32.xlu0 %v13723_v9, %s16275_s26  ;;  %v8124_v9 = vld [vmem:[%s16234_s7 + $0x18] sm:$0xff]  ;;  %v5261_v10 = vsel %vm1373_vm3, %v13902_v42, %v5252_v45  ;;  %v8130_v42 = vld [vmem:[%s16234_s7 + $0x48] sm:$0xff]  ;;  %vm10442_vm3 = vcmask 523264  }
 0x31e   : > { %7701 = vrot.lane.b32.xlu1 %v13718_v7, %s16275_s26  ;;  %11953 = vmatprep.subr.bf16.mxu0 %v11952_v3  ;;  %v8140_v7 = vld [vmem:[%s16234_s7 + $0x98] sm:$0xff]  ;;  %v11958_v13 = vpack.c.bf16 %v8124_v9, %v8123_v8 }
 0x31f   : > { %v5643_v49 = vpop.permute.xlu0 %5642  ;;  %10831 = vmatmul.mubr.msk.f32.vlgmr.msra.gmra.mrb[16].mxu1 %vm4514_vm14, %v4452_v36  ;;  %11955 = vmatpush3.bf16.msra.mxu0 %v11954_v5 }
 0x320   : > { %v13927_v50 = vpop.permute.xlu1 %5646  ;;  %5276 = vmatpush1.msra.mxu1 %v5253_v48  ;;  %5339 = vmatprep.mubr.f32.mxu1 %v13670_v38  ;;  %v5662_v21 = vsel %vm1793_vm4, %v5643_v49, %v13912_v44  ;;  %v8147_v48 = vld [vmem:[%s16234_s7 + $0xd0] sm:$0xff]  ;;  %v8148_v49 = vld [vmem:[%s16234_s7 + $0xd8] sm:$0xff] }
 0x321   : > { %5346 = vmatprep.subr.mxu1 %v5256_v51  ;;  %8097 = vperm.xlu0 %12813, %v8094_v47   ;;  %v5663_v15 = vsel %vm1793_vm4, %v13912_v44, %v13927_v50  ;;  %v11972_v51 = vpack.c.bf16 %v8148_v49, %v8147_v48  ;;  %v10856_v48 = vld [vmem:[%s16273_s5 + $0x18] sm:$0xf] }
 0x322   : > { %7705 = vrot.lane.b32.xlu1 %v13732_v12, %s16275_s26  ;;  %v11956_v12 = vpack.c.bf16 %v8140_v7, %v8139_v6  ;;  %v10844_v7 = vld [vmem:[%s16273_s5 + $0x10] sm:$0xf] }
 0x323   : > { %v13937_v58 = vpop.permute.xlu0 %5650  ;;  %10833 = vmatmul.mubr.msk.f32.vlgmr.msra.gmra.mrb[8].mxu1 %vm4514_vm14, %v10832_v52 }
 0x324   : > { %v13940_v56 = vpop.permute.xlu1 %5648  ;;  %5347 = vmatpush1.msra.mxu1 %v5255_v55  ;;  %5410 = vmatprep.mubr.f32.mxu1 %v13670_v38 }
 0x325   : > { %5417 = vmatprep.subr.mxu1 %v5258_v57  ;;  %11957 = vmatprep.subr.bf16.mxu0 %v11956_v12  ;;  %v5665_v26 = vsel %vm1793_vm4, %v13940_v56, %v13937_v58  ;;  %v5664_v32 = vsel %vm1793_vm4, %v13927_v50, %v13940_v56  ;;  %v8131_v50 = vld [vmem:[%s16234_s7 + $0x50] sm:$0xff] }
 0x326   : > { %11959 = vmatpush3.bf16.msra.mxu0 %v11958_v13 }
 0x327   : > { %v13945_v59 = vpop.permute.xlu0 %5654  ;;  %10834 = vmatmul.mubr.msk.f32.vlgmr.msra.gmra.mrb[10].mxu1 %vm4514_vm14, %v10832_v52  ;;  %11961 = vmatprep.subr.bf16.mxu0 %v11960_v18 }
 0x328   : > { %v13948_v60 = vpop.permute.xlu1 %5652  ;;  %5418 = vmatpush1.msra.mxu1 %v5257_v54  ;;  %5481 = vmatprep.mubr.f32.mxu1 %v13670_v38  ;;  %v8149_v54 = vld [vmem:[%s16234_s7 + $0xe0] sm:$0xff] }
 0x329   : > { %5488 = vmatprep.subr.mxu1 %v5260_v53  ;;  %v5667_v36 = vsel %vm1793_vm4, %v13948_v60, %v13945_v59  ;;  %v5666_v43 = vsel %vm1793_vm4, %v13937_v58, %v13948_v60  ;;  %v8150_v60 = vld [vmem:[%s16234_s7 + $0xe8] sm:$0xff] }
 0x32a   : > { %11963 = vmatpush3.bf16.msra.mxu0 %v11962_v24  ;;  %v11976_v53 = vpack.c.bf16 %v8150_v60, %v8149_v54 }
 0x32b   : > { %v13954_v61 = vpop.permute.xlu0 %5658  ;;  %10835 = vmatmul.mubr.msk.f32.vlgmr.msra.gmra.mrb[12].mxu1 %vm4514_vm14, %v10832_v52  ;;  %11965 = vmatprep.subr.bf16.mxu0 %v11964_v30 }
 0x32c   : > { %v13966_v2 = vpop.permute.xlu1 %5656  ;;  %5489 = vmatpush1.msra.mxu1 %v5259_v0  ;;  %5552 = vmatprep.mubr.f32.mxu1 %v13670_v38  ;;  %v8134_v0 = vld [vmem:[%s16234_s7 + $0x68] sm:$0xff] }
 0x32d   : > { %5559 = vmatprep.subr.mxu1 %v5252_v45  ;;  %v11970_v45 = vpack.c.bf16 %v8130_v42, %v8129_v40  ;;  %v5669_v47 = vsel %vm1793_vm4, %v13966_v2, %v13954_v61  ;;  %v5668_v55 = vsel %vm1793_vm4, %v13945_v59, %v13966_v2  ;;  %v8133_v59 = vld [vmem:[%s16234_s7 + $0x60] sm:$0xff] }
 0x32e   : > { %11967 = vmatpush3.bf16.msra.mxu0 %v11966_v34  ;;  %v11978_v1 = vpack.c.bf16 %v8134_v0, %v8133_v59 }
 0x32f   : > { %v13986_v11 = vpop.permute.xlu0 %6053  ;;  %10836 = vmatmul.mubr.msk.f32.vlgmr.msra.gmra.mrb[14].mxu1 %vm4514_vm14, %v10832_v52  ;;  %11969 = vmatprep.subr.bf16.mxu0 %v11968_v41 }
 0x330   : > { %v13989_v14 = vpop.permute.xlu1 %5660  ;;  %5560 = vmatpush1.msra.mxu1 %v5261_v10  ;;  %5623 = vmatprep.mubr.f32.mxu1 %v13670_v38 }
 0x331   : > { %5684 = vmatprep.subr.mxu1 %v5663_v15  ;;  %v5670_v62 = vsel %vm1793_vm4, %v13954_v61, %v13989_v14  ;;  %vm10529_vm4 = vcmask 40976  }
 0x332   : > { %11971 = vmatpush3.bf16.msra.mxu0 %v11970_v45 }
 0x333   : > { %v14009_v22 = vpop.permute.xlu0 %6051  ;;  %10837 = vmatmul.mubr.msk.f32.vlgmr.msra.gmra.mrb[16].mxu1 %vm4514_vm14, %v10832_v52  ;;  %v8132_v52 = vld [vmem:[%s16234_s7 + $0x58] sm:$0xff]  ;;  %11973 = vmatprep.subr.bf16.mxu0 %v11972_v51 }
 0x334   : > { %v14017_v25 = vpop.permute.xlu1 %6055  ;;  %5685 = vmatpush1.msra.mxu1 %v5662_v21  ;;  %5748 = vmatprep.mubr.f32.mxu1 %v13670_v38  ;;  %v11974_v56 = vpack.c.bf16 %v8132_v52, %v8131_v50  ;;  %v6071_v61 = vsel %vm2213_vm5, %v14009_v22, %v13986_v11 }
 0x335   : > { %5755 = vmatprep.subr.mxu1 %v5665_v26  ;;  %v6072_v3 = vsel %vm2213_vm5, %v13986_v11, %v14017_v25 }
 0x336   : > { %11975 = vmatpush3.bf16.msra.mxu0 %v11974_v56 }
 0x337   : > { %v14038_v33 = vpop.permute.xlu0 %6059  ;;  %10839 = vmatmul.mubr.msk.f32.vlgmr.msra.gmra.mrb[8].mxu1 %vm4514_vm14, %v14015_v23  ;;  %11977 = vmatprep.subr.bf16.mxu0 %v11976_v53 }
 0x338   : > { %v14042_v35 = vpop.permute.xlu1 %6057  ;;  %5756 = vmatpush1.msra.mxu1 %v5664_v32  ;;  %5819 = vmatprep.mubr.f32.mxu1 %v13670_v38 }
 0x339   : > { %5826 = vmatprep.subr.mxu1 %v5667_v36  ;;  %v6074_v6 = vsel %vm2213_vm5, %v14042_v35, %v14038_v33  ;;  %v6073_v8 = vsel %vm2213_vm5, %v14017_v25, %v14042_v35 }
 0x33a   : > { %11979 = vmatpush3.bf16.msra.mxu0 %v11978_v1  ;;  %v10862_v1 = vld [vmem:[%s16273_s5 + $0x1c] sm:$0xf] }
 0x33b   : > { %v14063_v44 = vpop.permute.xlu0 %6063  ;;  %10840 = vmatmul.mubr.msk.f32.vlgmr.msra.gmra.mrb[10].mxu1 %vm4514_vm14, %v14015_v23 }
 0x33c   : > { %v6062_v46 = vpop.permute.xlu1 %6061  ;;  %5827 = vmatpush1.msra.mxu1 %v5666_v43  ;;  %5890 = vmatprep.mubr.f32.mxu1 %v13670_v38 }
 0x33d   : > { %5897 = vmatprep.subr.mxu1 %v5669_v47  ;;  %v6076_v11 = vsel %vm2213_vm5, %v6062_v46, %v14063_v44  ;;  %v6075_v12 = vsel %vm2213_vm5, %v14038_v33, %v6062_v46 }
 0x33f   : > { %v6068_v58 = vpop.permute.xlu0 %6067  ;;  %10841 = vmatmul.mubr.msk.f32.vlgmr.msra.gmra.mrb[12].mxu1 %vm4514_vm14, %v14015_v23 }
 0x340   : > { %v6066_v57 = vpop.permute.xlu1 %6065  ;;  %5898 = vmatpush1.msra.mxu1 %v5668_v55  ;;  %5961 = vmatprep.mubr.f32.mxu1 %v13670_v38 }
 0x341   : > { %5968 = vmatprep.subr.mxu1 %v13989_v14  ;;  %v6078_v15 = vsel %vm2213_vm5, %v6066_v57, %v6068_v58  ;;  %v6077_v16 = vsel %vm2213_vm5, %v14063_v44, %v6066_v57 }
 0x343   : > { %v6463_v63 = vpop.permute.xlu0 %6462  ;;  %10842 = vmatmul.mubr.msk.f32.vlgmr.msra.gmra.mrb[14].mxu1 %vm4514_vm14, %v14015_v23 }
 0x344   : > { %v6070_v2 = vpop.permute.xlu1 %6069  ;;  %5969 = vmatpush1.msra.mxu1 %v5670_v62  ;;  %6032 = vmatprep.mubr.f32.mxu1 %v13670_v38 }
 0x345   : > { %6093 = vmatprep.subr.mxu1 %v6072_v3  ;;  %v6079_v19 = vsel %vm2213_vm5, %v6068_v58, %v6070_v2  ;;  %vm10516_vm5 = vcmask 8192  }
 0x347   : > { %v6461_v4 = vpop.permute.xlu0 %6460  ;;  %10843 = vmatmul.mubr.msk.f32.vlgmr.msra.gmra.mrb[16].mxu1 %vm4514_vm14, %v14015_v23 }
 0x348   : > { %v6465_v5 = vpop.permute.xlu1 %6464  ;;  %6094 = vmatpush1.msra.mxu1 %v6071_v61  ;;  %6157 = vmatprep.mubr.f32.mxu1 %v13670_v38  ;;  %v6480_v23 = vsel %vm2633_vm6, %v6461_v4, %v6463_v63 }
 0x349   : > { %6164 = vmatprep.subr.mxu1 %v6074_v6  ;;  %v6481_v22 = vsel %vm2633_vm6, %v6463_v63, %v6465_v5 }
 0x34b   : > { %v6469_v9 = vpop.permute.xlu0 %6468  ;;  %10845 = vmatmul.mubr.msk.f32.vlgmr.msra.gmra.mrb[8].mxu1 %vm4514_vm14, %v10844_v7 }
 0x34c   : > { %v6467_v10 = vpop.permute.xlu1 %6466  ;;  %6165 = vmatpush1.msra.mxu1 %v6073_v8  ;;  %6228 = vmatprep.mubr.f32.mxu1 %v13670_v38 }
 0x34d   : > { %6235 = vmatprep.subr.mxu1 %v6076_v11  ;;  %v6483_v26 = vsel %vm2633_vm6, %v6467_v10, %v6469_v9  ;;  %v6482_v28 = vsel %vm2633_vm6, %v6465_v5, %v6467_v10 }
 0x34f   : > { %v6473_v13 = vpop.permute.xlu0 %6472  ;;  %10846 = vmatmul.mubr.msk.f32.vlgmr.msra.gmra.mrb[10].mxu1 %vm4514_vm14, %v10844_v7 }
 0x350   : > { %v6471_v14 = vpop.permute.xlu1 %6470  ;;  %6236 = vmatpush1.msra.mxu1 %v6075_v12  ;;  %6299 = vmatprep.mubr.f32.mxu1 %v13670_v38 }
 0x351   : > { %6306 = vmatprep.subr.mxu1 %v6078_v15  ;;  %v6485_v31 = vsel %vm2633_vm6, %v6471_v14, %v6473_v13  ;;  %v6484_v32 = vsel %vm2633_vm6, %v6469_v9, %v6471_v14 }
 0x353   : > { %v6477_v17 = vpop.permute.xlu0 %6476  ;;  %10847 = vmatmul.mubr.msk.f32.vlgmr.msra.gmra.mrb[12].mxu1 %vm4514_vm14, %v10844_v7 }
 0x354   : > { %v6475_v18 = vpop.permute.xlu1 %6474  ;;  %6307 = vmatpush1.msra.mxu1 %v6077_v16  ;;  %6370 = vmatprep.mubr.f32.mxu1 %v13670_v38 }
 0x355   : > { %6377 = vmatprep.subr.mxu1 %v6070_v2  ;;  %v6487_v35 = vsel %vm2633_vm6, %v6475_v18, %v6477_v17  ;;  %v6486_v36 = vsel %vm2633_vm6, %v6473_v13, %v6475_v18  ;;  %v10868_v18 = vld [vmem:[%s16273_s5 + $0x20] sm:$0xf] }
 0x357   : > { %v6872_v20 = vpop.permute.xlu0 %6871  ;;  %10848 = vmatmul.mubr.msk.f32.vlgmr.msra.gmra.mrb[14].mxu1 %vm4514_vm14, %v10844_v7 }
 0x358   : > { %v6479_v21 = vpop.permute.xlu1 %6478  ;;  %6378 = vmatpush1.msra.mxu1 %v6079_v19  ;;  %6441 = vmatprep.mubr.f32.mxu1 %v13670_v38 }
 0x359   : > { %6502 = vmatprep.subr.mxu1 %v6481_v22  ;;  %v6488_v40 = vsel %vm2633_vm6, %v6477_v17, %v6479_v21  ;;  %vm10540_vm6 = vcmask 24576  }
 0x35b   : > { %v6870_v24 = vpop.permute.xlu0 %6869  ;;  %10849 = vmatmul.mubr.msk.f32.vlgmr.msra.gmra.mrb[16].mxu1 %vm4514_vm14, %v10844_v7 }
 0x35c   : > { %v6874_v25 = vpop.permute.xlu1 %6873  ;;  %6503 = vmatpush1.msra.mxu1 %v6480_v23  ;;  %6566 = vmatprep.mubr.f32.mxu1 %v13670_v38  ;;  %v6889_v44 = vsel %vm3053_vm7, %v6870_v24, %v6872_v20 }
 0x35d   : > { %6573 = vmatprep.subr.mxu1 %v6483_v26  ;;  %v6890_v43 = vsel %vm3053_vm7, %v6872_v20, %v6874_v25  ;;  %v10893_v26 = vld [vmem:[%s16234_s7 + $0x510] sm:$0xff] }
 0x35f   : > { %v6878_v29 = vpop.permute.xlu0 %6877  ;;  %10851 = vmatmul.mubr.msk.f32.vlgmr.msra.gmra.mrb[8].mxu1 %vm4514_vm14, %v10850_v27 }
 0x360   : > { %v6876_v30 = vpop.permute.xlu1 %6875  ;;  %6574 = vmatpush1.msra.mxu1 %v6482_v28  ;;  %6637 = vmatprep.mubr.f32.mxu1 %v13670_v38 }
 0x361   : > { %6644 = vmatprep.subr.mxu1 %v6485_v31  ;;  %v6892_v47 = vsel %vm3053_vm7, %v6876_v30, %v6878_v29  ;;  %v6891_v49 = vsel %vm3053_vm7, %v6874_v25, %v6876_v30  ;;  %v10892_v25 = vld [vmem:[%s16234_s7 + $0x508] sm:$0xff]  ;;  %v10877_v31 = vld [vmem:[%s16234_s7 + $0x490] sm:$0xff] }
 0x362   : > { %v10876_v30 = vld [vmem:[%s16234_s7 + $0x488] sm:$0xff] }
 0x363   : > { %v6882_v33 = vpop.permute.xlu0 %6881  ;;  %10852 = vmatmul.mubr.msk.f32.vlgmr.msra.gmra.mrb[10].mxu1 %vm4514_vm14, %v10850_v27 }
 0x364   : > { %v6880_v34 = vpop.permute.xlu1 %6879  ;;  %6645 = vmatpush1.msra.mxu1 %v6484_v32  ;;  %6708 = vmatprep.mubr.f32.mxu1 %v13670_v38  ;;  %v10894_v32 = vld [vmem:[%s16234_s7 + $0x518] sm:$0xff] }
 0x365   : > { %6715 = vmatprep.subr.mxu1 %v6487_v35  ;;  %v6894_v52 = vsel %vm3053_vm7, %v6880_v34, %v6882_v33  ;;  %v6893_v55 = vsel %vm3053_vm7, %v6878_v29, %v6880_v34  ;;  %v12104_v29 = vpack.c.bf16 %v10893_v26, %v10892_v25  ;;  %v12106_v35 = vpack.c.bf16 %v10877_v31, %v10876_v30  ;;  %v8154_v30 = vld [vmem:[%s16234_s7 + $0x108] sm:$0xff] }
 0x367   : > { %v6886_v37 = vpop.permute.xlu0 %6885  ;;  %10853 = vmatmul.mubr.msk.f32.vlgmr.msra.gmra.mrb[12].mxu1 %vm4514_vm14, %v10850_v27 }
 0x368   : > { %v6884_v39 = vpop.permute.xlu1 %6883  ;;  %6716 = vmatpush1.msra.mxu1 %v6486_v36  ;;  %6779 = vmatprep.mubr.f32.mxu1 %v13670_v38 }
 0x369   : > { %6786 = vmatprep.subr.mxu1 %v6479_v21  ;;  %v6896_v58 = vsel %vm3053_vm7, %v6884_v39, %v6886_v37  ;;  %v6895_v54 = vsel %vm3053_vm7, %v6882_v33, %v6884_v39  ;;  %v10895_v33 = vld [vmem:[%s16234_s7 + $0x520] sm:$0xff] }
 0x36a   : > { %v12108_v36 = vpack.c.bf16 %v10895_v33, %v10894_v32  ;;  %v10879_v39 = vld [vmem:[%s16234_s7 + $0x4a0] sm:$0xff]  ;;  %v8171_v32 = vld [vmem:[%s16234_s7 + $0x190] sm:$0xff]  ;;  %v8172_v33 = vld [vmem:[%s16234_s7 + $0x198] sm:$0xff] }
 0x36b   : > { %v7281_v41 = vpop.permute.xlu0 %7280  ;;  %10854 = vmatmul.mubr.msk.f32.vlgmr.msra.gmra.mrb[14].mxu1 %vm4514_vm14, %v10850_v27 }
 0x36c   : > { %v6888_v42 = vpop.permute.xlu1 %6887  ;;  %6787 = vmatpush1.msra.mxu1 %v6488_v40  ;;  %6850 = vmatprep.mubr.f32.mxu1 %v13670_v38  ;;  %v10896_v40 = vld [vmem:[%s16234_s7 + $0x528] sm:$0xff] }
 0x36d   : > { %6911 = vmatprep.subr.mxu1 %v6890_v43  ;;  %v6897_v60 = vsel %vm3053_vm7, %v6886_v37, %v6888_v42  ;;  %v10878_v37 = vld [vmem:[%s16234_s7 + $0x498] sm:$0xff] }
 0x36f   : > { %v7279_v45 = vpop.permute.xlu0 %7278  ;;  %10855 = vmatmul.mubr.msk.f32.vlgmr.msra.gmra.mrb[16].mxu1 %vm4514_vm14, %v10850_v27 }
 0x370   : > { %v7283_v46 = vpop.permute.xlu1 %7282  ;;  %6912 = vmatpush1.msra.mxu1 %v6889_v44  ;;  %6975 = vmatprep.mubr.f32.mxu1 %v13670_v38  ;;  %v7298_v62 = vsel %vm3473_vm8, %v7279_v45, %v7281_v41  ;;  %v10880_v44 = vld [vmem:[%s16234_s7 + $0x4a8] sm:$0xff]  ;;  %v10881_v45 = vld [vmem:[%s16234_s7 + $0x4b0] sm:$0xff] }
 0x371   : > { %6982 = vmatprep.subr.mxu1 %v6892_v47  ;;  %v7299_v0 = vsel %vm3473_vm8, %v7281_v41, %v7283_v46  ;;  %v10897_v41 = vld [vmem:[%s16234_s7 + $0x530] sm:$0xff]  ;;  %v10899_v47 = vld [vmem:[%s16234_s7 + $0x540] sm:$0xff] }
 0x372   : > { %v12112_v43 = vpack.c.bf16 %v10897_v41, %v10896_v40  ;;  %v10958_v41 = vld [vmem:[%s16234_s7 + $0x718] sm:$0xff] }
 0x373   : > { %v7287_v50 = vpop.permute.xlu0 %7286  ;;  %10857 = vmatmul.mubr.msk.f32.vlgmr.msra.gmra.mrb[8].mxu1 %vm4514_vm14, %v10856_v48 }
 0x374   : > { %v7285_v51 = vpop.permute.xlu1 %7284  ;;  %6983 = vmatpush1.msra.mxu1 %v6891_v49  ;;  %7046 = vmatprep.mubr.f32.mxu1 %v13670_v38 }
 0x375   : > { %7053 = vmatprep.subr.mxu1 %v6894_v52  ;;  %v7301_v63 = vsel %vm3473_vm8, %v7285_v51, %v7287_v50  ;;  %v7300_v61 = vsel %vm3473_vm8, %v7283_v46, %v7285_v51  ;;  %v10898_v46 = vld [vmem:[%s16234_s7 + $0x538] sm:$0xff]  ;;  %v10883_v51 = vld [vmem:[%s16234_s7 + $0x4c0] sm:$0xff]  ;;  %v10900_v52 = vld [vmem:[%s16234_s7 + $0x548] sm:$0xff] }
 0x376   : > { %v12116_v49 = vpack.c.bf16 %v10899_v47, %v10898_v46  ;;  %v8156_v46 = vld [vmem:[%s16234_s7 + $0x118] sm:$0xff] }
 0x377   : > { %10858 = vmatmul.mubr.msk.f32.vlgmr.msra.gmra.mrb[10].mxu1 %vm4514_vm14, %v10856_v48  ;;  %v7291_v57 = vpop.permute.xlu0 %7290 }
 0x378   : > { %7054 = vmatpush1.msra.mxu1 %v6893_v55  ;;  %7117 = vmatprep.mubr.f32.mxu1 %v13670_v38  ;;  %v7289_v56 = vpop.permute.xlu1 %7288  ;;  %v10901_v55 = vld [vmem:[%s16234_s7 + $0x550] sm:$0xff] }
 0x379   : > { %7124 = vmatprep.subr.mxu1 %v6896_v58  ;;  %v7303_v4 = vsel %vm3473_vm8, %v7289_v56, %v7291_v57  ;;  %v7302_v5 = vsel %vm3473_vm8, %v7287_v50, %v7289_v56  ;;  %v10882_v50 = vld [vmem:[%s16234_s7 + $0x4b8] sm:$0xff]  ;;  %v12120_v56 = vpack.c.bf16 %v10901_v55, %v10900_v52 }
 0x37a   : > { %v12118_v58 = vpack.c.bf16 %v10883_v51, %v10882_v50  ;;  %v8173_v50 = vld [vmem:[%s16234_s7 + $0x1a0] sm:$0xff]  ;;  %v8174_v51 = vld [vmem:[%s16234_s7 + $0x1a8] sm:$0xff] }
 0x37b   : > { %10859 = vmatmul.mubr.msk.f32.vlgmr.msra.gmra.mrb[12].mxu1 %vm4514_vm14, %v10856_v48  ;;  %v7295_v53 = vpop.permute.xlu0 %7294 }
 0x37c   : > { %7125 = vmatpush1.msra.mxu1 %v6895_v54  ;;  %7188 = vmatprep.mubr.f32.mxu1 %v13670_v38  ;;  %v7293_v59 = vpop.permute.xlu1 %7292  ;;  %v10885_v54 = vld [vmem:[%s16234_s7 + $0x4d0] sm:$0xff] }
 0x37d   : > { %7195 = vmatprep.subr.mxu1 %v6888_v42  ;;  %v7305_v8 = vsel %vm3473_vm8, %v7293_v59, %v7295_v53  ;;  %v7304_v9 = vsel %vm3473_vm8, %v7291_v57, %v7293_v59  ;;  %v12110_v42 = vpack.c.bf16 %v10879_v39, %v10878_v37  ;;  %v10884_v57 = vld [vmem:[%s16234_s7 + $0x4c8] sm:$0xff]  ;;  %v10903_v59 = vld [vmem:[%s16234_s7 + $0x560] sm:$0xff] }
 0x37f   : > { %10860 = vmatmul.mubr.msk.f32.vlgmr.msra.gmra.mrb[14].mxu1 %vm4514_vm14, %v10856_v48  ;;  %v7690_v3 = vpop.permute.xlu0 %7689 }
 0x380   : > { %7196 = vmatpush1.msra.mxu1 %v6897_v60  ;;  %7259 = vmatprep.mubr.f32.mxu1 %v13670_v38  ;;  %v7297_v2 = vpop.permute.xlu1 %7296  ;;  %v10902_v60 = vld [vmem:[%s16234_s7 + $0x558] sm:$0xff] }
 0x381   : > { %7320 = vmatprep.subr.mxu1 %v7299_v0  ;;  %v7306_v12 = vsel %vm3473_vm8, %v7295_v53, %v7297_v2  ;;  %v12122_v53 = vpack.c.bf16 %v10885_v54, %v10884_v57  ;;  %v12124_v0 = vpack.c.bf16 %v10903_v59, %v10902_v60  ;;  %v10960_v59 = vld [vmem:[%s16234_s7 + $0x728] sm:$0xff] }
 0x383   : > { %10861 = vmatmul.mubr.msk.f32.vlgmr.msra.gmra.mrb[16].mxu1 %vm4514_vm14, %v10856_v48  ;;  %v7688_v7 = vpop.permute.xlu0 %7687  ;;  %v12114_v48 = vpack.c.bf16 %v10881_v45, %v10880_v44  ;;  %v11988_v44 = vpack.c.bf16 %v8172_v33, %v8171_v32  ;;  %v8155_v45 = vld [vmem:[%s16234_s7 + $0x110] sm:$0xff]  ;;  %v8162_v32 = vld [vmem:[%s16234_s7 + $0x148] sm:$0xff] }
 0x384   : > { %7321 = vmatpush1.msra.mxu1 %v7298_v62  ;;  %7384 = vmatprep.mubr.f32.mxu1 %v13670_v38  ;;  %v7692_v6 = vpop.permute.xlu1 %7691  ;;  %v7707_v14 = vsel %vm3893_vm9, %v7688_v7, %v7690_v3  ;;  %v10886_v62 = vld [vmem:[%s16234_s7 + $0x4d8] sm:$0xff]  ;;  %v8151_v7 = vld [vmem:[%s16234_s7 + $0xf0] sm:$0xff]  ;;  %v11990_v60 = vpack.c.bf16 %v8156_v46, %v8155_v45  ;;  %v10967_v45 = vld [vmem:[%s16234_s7 + $0x760] sm:$0xff] }
 0x385   : > { %7391 = vmatprep.subr.mxu1 %v7301_v63  ;;  %v7708_v13 = vsel %vm3893_vm9, %v7690_v3, %v7692_v6  ;;  %v10887_v63 = vld [vmem:[%s16234_s7 + $0x4e0] sm:$0xff]  ;;  %v10905_v3 = vld [vmem:[%s16234_s7 + $0x570] sm:$0xff] }
 0x387   : > { %10863 = vmatmul.mubr.msk.f32.vlgmr.msra.gmra.mrb[8].mxu1 %vm4514_vm14, %v10862_v1  ;;  %v7696_v11 = vpop.permute.xlu0 %7695 }
 0x388   : > { %7392 = vmatpush1.msra.mxu1 %v7300_v61  ;;  %7455 = vmatprep.mubr.f32.mxu1 %v13670_v38  ;;  %v7694_v10 = vpop.permute.xlu1 %7693 }
 0x389   : > { %7462 = vmatprep.subr.mxu1 %v7303_v4  ;;  %v7710_v17 = vsel %vm3893_vm9, %v7694_v10, %v7696_v11  ;;  %v7709_v19 = vsel %vm3893_vm9, %v7692_v6, %v7694_v10  ;;  %v10888_v4 = vld [vmem:[%s16234_s7 + $0x4e8] sm:$0xff]  ;;  %v8135_v10 = vld [vmem:[%s16234_s7 + $0x70] sm:$0xff] }
 0x38b   : > { %10864 = vmatmul.mubr.msk.f32.vlgmr.msra.gmra.mrb[10].mxu1 %vm4514_vm14, %v10862_v1  ;;  %v7700_v16 = vpop.permute.xlu0 %7699 }
 0x38c   : > { %7463 = vmatpush1.msra.mxu1 %v7302_v5  ;;  %7526 = vmatprep.mubr.f32.mxu1 %v13670_v38  ;;  %v7698_v15 = vpop.permute.xlu1 %7697  ;;  %v10889_v5 = vld [vmem:[%s16234_s7 + $0x4f0] sm:$0xff] }
 0x38d   : > { %7533 = vmatprep.subr.mxu1 %v7305_v8  ;;  %v7712_v20 = vsel %vm3893_vm9, %v7698_v15, %v7700_v16  ;;  %v7711_v23 = vsel %vm3893_vm9, %v7696_v11, %v7698_v15  ;;  %v12130_v6 = vpack.c.bf16 %v10889_v5, %v10888_v4  ;;  %v8152_v8 = vld [vmem:[%s16234_s7 + $0xf8] sm:$0xff] }
 0x38e   : > { %v8136_v11 = vld [vmem:[%s16234_s7 + $0x78] sm:$0xff] }
 0x38f   : > { %10865 = vmatmul.mubr.msk.f32.vlgmr.msra.gmra.mrb[12].mxu1 %vm4514_vm14, %v10862_v1  ;;  %v7704_v22 = vpop.permute.xlu0 %7703  ;;  %v8176_v4 = vld [vmem:[%s16234_s7 + $0x1b8] sm:$0xff] }
 0x390   : > { %7534 = vmatpush1.msra.mxu1 %v7304_v9  ;;  %7597 = vmatprep.mubr.f32.mxu1 %v13670_v38  ;;  %v7702_v21 = vpop.permute.xlu1 %7701  ;;  %v11980_v9 = vpack.c.bf16 %v8152_v8, %v8151_v7  ;;  %v10945_v7 = vld [vmem:[%s16234_s7 + $0x6b0] sm:$0xff] }
 0x391   : > { %7604 = vmatprep.subr.mxu1 %v7297_v2  ;;  %v7714_v24 = vsel %vm3893_vm9, %v7702_v21, %v7704_v22  ;;  %v7713_v27 = vsel %vm3893_vm9, %v7700_v16, %v7702_v21  ;;  %v10904_v2 = vld [vmem:[%s16234_s7 + $0x568] sm:$0xff]  ;;  %v10890_v16 = vld [vmem:[%s16234_s7 + $0x4f8] sm:$0xff] }
 0x392   : > { %v12128_v61 = vpack.c.bf16 %v10905_v3, %v10904_v2  ;;  %11981 = vmatprep.subr.bf16.mxu0 %v11980_v9 }
 0x393   : > { %10866 = vmatmul.mubr.msk.f32.vlgmr.msra.gmra.mrb[14].mxu1 %vm4514_vm14, %v10862_v1 }
 0x394   : > { %7605 = vmatpush1.msra.mxu1 %v7306_v12  ;;  %7668 = vmatprep.mubr.f32.mxu1 %v13670_v38  ;;  %v7706_v28 = vpop.permute.xlu1 %7705  ;;  %v11982_v12 = vpack.c.bf16 %v8136_v11, %v8135_v10  ;;  %v10962_v11 = vld [vmem:[%s16234_s7 + $0x738] sm:$0xff] }
 0x395   : > { %7729 = vmatprep.subr.mxu1 %v7708_v13  ;;  %v7715_v34 = vsel %vm3893_vm9, %v7704_v22, %v7706_v28  ;;  %v10906_v13 = vld [vmem:[%s16234_s7 + $0x578] sm:$0xff]  ;;  %v10956_v22 = vld [vmem:[%s16234_s7 + $0x708] sm:$0xff] }
 0x396   : > { %11983 = vmatpush3.bf16.msra.mxu0 %v11982_v12  ;;  %v10963_v12 = vld [vmem:[%s16234_s7 + $0x740] sm:$0xff] }
 0x397   : > { %10867 = vmatmul.mubr.msk.f32.vlgmr.msra.gmra.mrb[16].mxu1 %vm4514_vm14, %v10862_v1  ;;  %v12126_v1 = vpack.c.bf16 %v10887_v63, %v10886_v62  ;;  %v11992_v62 = vpack.c.bf16 %v8174_v51, %v8173_v50  ;;  %v8157_v63 = vld [vmem:[%s16234_s7 + $0x120] sm:$0xff]  ;;  %v8182_v51 = vld [vmem:[%s16234_s7 + $0x1e8] sm:$0xff] }
 0x398   : > { %7730 = vmatpush1.msra.mxu1 %v7707_v14  ;;  %7793 = vmatprep.mubr.f32.mxu1 %v13670_v38  ;;  %v10907_v14 = vld [vmem:[%s16234_s7 + $0x580] sm:$0xff] }
 0x399   : > { %7800 = vmatprep.subr.mxu1 %v7710_v17  ;;  %v12132_v15 = vpack.c.bf16 %v10907_v14, %v10906_v13  ;;  %v10891_v17 = vld [vmem:[%s16234_s7 + $0x500] sm:$0xff] }
 0x39a   : > { %v8181_v50 = vld [vmem:[%s16234_s7 + $0x1e0] sm:$0xff] }
 0x39b   : > { %10869 = vmatmul.mubr.msk.f32.vlgmr.msra.gmra.mrb[8].mxu1 %vm4514_vm14, %v10868_v18 }
 0x39c   : > { %7801 = vmatpush1.msra.mxu1 %v7709_v19  ;;  %7864 = vmatprep.mubr.f32.mxu1 %v13670_v38  ;;  %v8169_v19 = vld [vmem:[%s16234_s7 + $0x180] sm:$0xff] }
 0x39d   : > { %7871 = vmatprep.subr.mxu1 %v7712_v20  ;;  %v8170_v20 = vld [vmem:[%s16234_s7 + $0x188] sm:$0xff] }
 0x39e   : > { %v11984_v21 = vpack.c.bf16 %v8170_v20, %v8169_v19  ;;  %v8177_v19 = vld [vmem:[%s16234_s7 + $0x1c0] sm:$0xff]  ;;  %v8178_v20 = vld [vmem:[%s16234_s7 + $0x1c8] sm:$0xff] }
 0x39f   : > { %10870 = vmatmul.mubr.msk.f32.vlgmr.msra.gmra.mrb[10].mxu1 %vm4514_vm14, %v10868_v18 }
 0x3a0   : > { %7872 = vmatpush1.msra.mxu1 %v7711_v23  ;;  %7935 = vmatprep.mubr.f32.mxu1 %v13670_v38  ;;  %v10957_v23 = vld [vmem:[%s16234_s7 + $0x710] sm:$0xff]  ;;  %v14351_v25 = vpop.permute.xlu0 %8097 }
 0x3a1   : > { %7942 = vmatprep.subr.mxu1 %v7714_v24  ;;  %11985 = vmatprep.subr.bf16.mxu0 %v11984_v21  ;;  %v12168_v24 = vpack.c.bf16 %v10957_v23, %v10956_v22  ;;  %v12180_v21 = vpack.c.bf16 %v10963_v12, %v10962_v11  ;;  %v10946_v22 = vld [vmem:[%s16234_s7 + $0x6b8] sm:$0xff]  ;;  %v10947_v23 = vld [vmem:[%s16234_s7 + $0x6c0] sm:$0xff]  ;;  %v8167_v11 = vld [vmem:[%s16234_s7 + $0x170] sm:$0xff] }
 0x3a2   : > { %v12182_v33 = vpack.c.bf16 %v10947_v23, %v10946_v22  ;;  %v8168_v12 = vld [vmem:[%s16234_s7 + $0x178] sm:$0xff]  ;;  %v11039_v22 = vld [vmem:[%s16234_s7 + $0x990] sm:$0xff] }
 0x3a3   : > { %10871 = vmatmul.mubr.msk.f32.vlgmr.msra.gmra.mrb[12].mxu1 %vm4514_vm14, %v10868_v18 }
 0x3a4   : > { %7943 = vmatpush1.msra.mxu1 %v7713_v27  ;;  %8006 = vmatprep.mubr.f32.mxu1 %v13670_v38 }
 0x3a5   : > { %8013 = vmatprep.subr.mxu1 %v7706_v28 }
 0x3a7   : > { %10872 = vmatmul.mubr.msk.f32.vlgmr.msra.gmra.mrb[14].mxu1 %vm4514_vm14, %v10868_v18 }
 0x3a8   : > { %8014 = vmatpush1.msra.mxu1 %v7715_v34  ;;  %8077 = vmatprep.mubr.f32.mxu1 %v13670_v38 }
 0x3a9   : > { %12105 = vmatprep.subr.bf16.mxu1 %v12104_v29  ;;  %v8153_v29 = vld [vmem:[%s16234_s7 + $0x100] sm:$0xff] }
 0x3aa   : > { %v11986_v40 = vpack.c.bf16 %v8154_v30, %v8153_v29  ;;  %v12000_v30 = vpack.c.bf16 %v8178_v20, %v8177_v19  ;;  %v10954_v19 = vld [vmem:[%s16234_s7 + $0x6f8] sm:$0xff]  ;;  %v10955_v20 = vld [vmem:[%s16234_s7 + $0x700] sm:$0xff] }
 0x3ab   : > { %10873 = vmatmul.mubr.msk.f32.vlgmr.msra.gmra.mrb[16].mxu1 %vm4514_vm14, %v10868_v18  ;;  %v12134_v18 = vpack.c.bf16 %v10891_v17, %v10890_v16  ;;  %v8160_v16 = vld [vmem:[%s16234_s7 + $0x138] sm:$0xff] }
 0x3ac   : > { %12107 = vmatpush3.bf16.msra.mxu1 %v12106_v35  ;;  %v10940_v35 = vld [vmem:[%s16234_s7 + $0x688] sm:$0xff] }
 0x3ad   : > { %12109 = vmatprep.subr.bf16.mxu1 %v12108_v36  ;;  %v10941_v36 = vld [vmem:[%s16234_s7 + $0x690] sm:$0xff] }
 0x3b0   : > { %12111 = vmatpush3.bf16.msra.mxu1 %v12110_v42  ;;  %v10959_v42 = vld [vmem:[%s16234_s7 + $0x720] sm:$0xff] }
 0x3b1   : > { %12113 = vmatprep.subr.bf16.mxu1 %v12112_v43  ;;  %v12172_v55 = vpack.c.bf16 %v10959_v42, %v10958_v41  ;;  %v10948_v41 = vld [vmem:[%s16234_s7 + $0x6c8] sm:$0xff]  ;;  %v10949_v42 = vld [vmem:[%s16234_s7 + $0x6d0] sm:$0xff] }
 0x3b4   : > { %12115 = vmatpush3.bf16.msra.mxu1 %v12114_v48 }
 0x3b5   : > { %12117 = vmatprep.subr.bf16.mxu1 %v12116_v49  ;;  %v12170_v49 = vpack.c.bf16 %v10941_v36, %v10940_v35  ;;  %v8179_v35 = vld [vmem:[%s16234_s7 + $0x1d0] sm:$0xff]  ;;  %v8180_v36 = vld [vmem:[%s16234_s7 + $0x1d8] sm:$0xff] }
 0x3b6   : > { %v12004_v46 = vpack.c.bf16 %v8180_v36, %v8179_v35  ;;  %v11023_v35 = vld [vmem:[%s16234_s7 + $0x910] sm:$0xff]  ;;  %v11024_v36 = vld [vmem:[%s16234_s7 + $0x918] sm:$0xff] }
 0x3b8   : > { %12119 = vmatpush3.bf16.msra.mxu1 %v12118_v58  ;;  %v10942_v58 = vld [vmem:[%s16234_s7 + $0x698] sm:$0xff] }
 0x3b9   : > { %12121 = vmatprep.subr.bf16.mxu1 %v12120_v56  ;;  %v10943_v56 = vld [vmem:[%s16234_s7 + $0x6a0] sm:$0xff] }
 0x3ba   : > { %v12174_v3 = vpack.c.bf16 %v10943_v56, %v10942_v58  ;;  %v10951_v58 = vld [vmem:[%s16234_s7 + $0x6e0] sm:$0xff] }
 0x3bc   : > { %12123 = vmatpush3.bf16.msra.mxu1 %v12122_v53  ;;  %v10961_v53 = vld [vmem:[%s16234_s7 + $0x730] sm:$0xff] }
 0x3bd   : > { %12125 = vmatprep.subr.bf16.mxu1 %v12124_v0  ;;  %v12176_v5 = vpack.c.bf16 %v10961_v53, %v10960_v59  ;;  %v10969_v59 = vld [vmem:[%s16234_s7 + $0x770] sm:$0xff]  ;;  %v12008_v53 = vpack.c.bf16 %v8182_v51, %v8181_v50 }
 0x3c0   : > { %12127 = vmatpush3.bf16.msra.mxu1 %v12126_v1  ;;  %v8158_v1 = vld [vmem:[%s16234_s7 + $0x128] sm:$0xff] }
 0x3c1   : > { %12129 = vmatprep.subr.bf16.mxu1 %v12128_v61  ;;  %v8175_v61 = vld [vmem:[%s16234_s7 + $0x1b0] sm:$0xff]  ;;  %v11994_v10 = vpack.c.bf16 %v8158_v1, %v8157_v63 }
 0x3c2   : > { %v11996_v14 = vpack.c.bf16 %v8176_v4, %v8175_v61  ;;  %v8183_v1 = vld [vmem:[%s16234_s7 + $0x1f0] sm:$0xff]  ;;  %v10952_v61 = vld [vmem:[%s16234_s7 + $0x6e8] sm:$0xff] }
 0x3c3   : > { %v10953_v4 = vld [vmem:[%s16234_s7 + $0x6f0] sm:$0xff] }
 0x3c4   : > { %12131 = vmatpush3.bf16.msra.mxu1 %v12130_v6  ;;  %v10944_v6 = vld [vmem:[%s16234_s7 + $0x6a8] sm:$0xff] }
 0x3c5   : > { %12133 = vmatprep.subr.bf16.mxu1 %v12132_v15  ;;  %v8159_v15 = vld [vmem:[%s16234_s7 + $0x130] sm:$0xff] }
 0x3c8   : > { %12135 = vmatpush3.bf16.msra.mxu1 %v12134_v18  ;;  %v12178_v18 = vpack.c.bf16 %v10945_v7, %v10944_v6  ;;  %v10970_v6 = vld [vmem:[%s16234_s7 + $0x778] sm:$0xff]  ;;  %v10971_v7 = vld [vmem:[%s16234_s7 + $0x780] sm:$0xff] }
 0x3c9   : > { %12169 = vmatprep.subr.bf16.mxu1 %v12168_v24 }
 0x46e   : > { %v7795_v26 = vpop.f32.mrb[8].mxu1 }
 0x46f   : > { %v8100_v27 = vadd.f32 %v14351_v25, %v7795_v26  ;;  %v7797_v28 = vpop.f32.mrb[9].mxu1  ;;  %v11998_v26 = vpack.c.bf16 %v8160_v16, %v8159_v15  ;;  %v8201_v15 = vld [vmem:[%s16234_s7 + $0x280] sm:$0xff]  ;;  %v8202_v16 = vld [vmem:[%s16234_s7 + $0x288] sm:$0xff] }
 0x470   : > { %v8101_v31 = vadd.f32 %v14351_v25, %v7797_v28  ;;  %v10965_v28 = vld [vmem:[%s16234_s7 + $0x750] sm:$0xff] }
 0x471   : > { %v14367_v34 = vmax.f32 %v8100_v27, 0.0  ;;  %v10964_v27 = vld [vmem:[%s16234_s7 + $0x748] sm:$0xff] }
 0x472   : > { %v14375_v37 = vmax.f32 %v8101_v31, 0.0  ;;  %v14377_v39 = vpop.f32.mrb[10].mxu1  ;;  %v8161_v31 = vld [vmem:[%s16234_s7 + $0x140] sm:$0xff] }
 0x473   : > { %v7868_v43 = vpop.f32.mrb[11].mxu1  ;;  %v8780_v52 = vrot.slane %v14367_v34, 1  ;;  %v8102_v23 = vadd.f32 %v14351_v25, %v14377_v39  ;;  %v8204_v39 = vld [vmem:[%s16234_s7 + $0x298] sm:$0xff] }
 0x474   : > { %v8103_v47 = vadd.f32 %v14351_v25, %v7868_v43  ;;  %8338 = vmatprep.mubr.f32.mxu0 %v14375_v37  ;;  %v8781_v48 = vrot.slane %v14375_v37, 1  ;;  %v12002_v43 = vpack.c.bf16 %v8162_v32, %v8161_v31  ;;  %v8203_v31 = vld [vmem:[%s16234_s7 + $0x290] sm:$0xff] }
 0x475   : > { %8339 = vmatmul.mubr.f32.vlgmr.msra.gmra.mrb[6].mxu0 %v14367_v34 }
 0x476   : > { %v14408_v57 = vmax.f32 %v8103_v47, 0.0  ;;  %11987 = vmatpush3.bf16.msra.mxu0 %v11986_v40  ;;  %v14410_v54 = vpop.f32.mrb[12].mxu1  ;;  %8868 = vmatprep.mubr.f32.mxu1 %v8781_v48  ;;  %v12184_v40 = vpack.c.bf16 %v10965_v28, %v10964_v27  ;;  %v8163_v47 = vld [vmem:[%s16234_s7 + $0x150] sm:$0xff]  ;;  %v8164_v48 = vld [vmem:[%s16234_s7 + $0x158] sm:$0xff]  ;;  %v8185_v27 = vld [vmem:[%s16234_s7 + $0x200] sm:$0xff] }
 0x477   : > { %v7939_v0 = vpop.f32.mrb[13].mxu1  ;;  %8869 = vmatmul.mubr.f32.vlgmr.msra.gmra.mrb[18].mxu1 %v8780_v52  ;;  %11989 = vmatprep.subr.bf16.mxu0 %v11988_v44  ;;  %v10966_v44 = vld [vmem:[%s16234_s7 + $0x758] sm:$0xff]  ;;  %v12006_v56 = vpack.c.bf16 %v8164_v48, %v8163_v47  ;;  %v8186_v28 = vld [vmem:[%s16234_s7 + $0x208] sm:$0xff]  ;;  %v12258_v47 = vpack.c.bf16 %v11024_v36, %v11023_v35  ;;  %v8205_v48 = vld [vmem:[%s16234_s7 + $0x2a0] sm:$0xff] }
 0x478   : > { %v8105_v2 = vadd.f32 %v14351_v25, %v7939_v0  ;;  %12171 = vmatpush3.bf16.msra.mxu1 %v12170_v49  ;;  %8408 = vmatprep.mubr.f32.mxu0 %v14408_v57  ;;  %v12186_v49 = vpack.c.bf16 %v10949_v42, %v10948_v41  ;;  %v12188_v52 = vpack.c.bf16 %v10967_v45, %v10966_v44  ;;  %v8165_v0 = vld [vmem:[%s16234_s7 + $0x160] sm:$0xff]  ;;  %v11042_v42 = vld [vmem:[%s16234_s7 + $0x9a8] sm:$0xff]  ;;  %v8187_v45 = vld [vmem:[%s16234_s7 + $0x210] sm:$0xff] }
 0x479   : > { %12173 = vmatprep.subr.bf16.mxu1 %v12172_v55  ;;  %v10950_v55 = vld [vmem:[%s16234_s7 + $0x6d8] sm:$0xff]  ;;  %v11041_v41 = vld [vmem:[%s16234_s7 + $0x9a0] sm:$0xff]  ;;  %v12020_v44 = vpack.c.bf16 %v8204_v39, %v8203_v31  ;;  %v11031_v39 = vld [vmem:[%s16234_s7 + $0x950] sm:$0xff] }
 0x47a   : > { %v14438_v8 = vmax.f32 %v8105_v2, 0.0  ;;  %11991 = vmatpush3.bf16.msra.mxu0 %v11990_v60  ;;  %v14440_v9 = vpop.f32.mrb[14].mxu1  ;;  %v10968_v60 = vld [vmem:[%s16234_s7 + $0x768] sm:$0xff]  ;;  %v12190_v63 = vpack.c.bf16 %v10951_v58, %v10950_v55  ;;  %v8184_v2 = vld [vmem:[%s16234_s7 + $0x1f8] sm:$0xff]  ;;  %v12260_v51 = vpack.c.bf16 %v11042_v42, %v11041_v41  ;;  %v9302_v58 = vrot.slane %v14375_v37, 2  ;;  %v11049_v36 = vld [vmem:[%s16234_s7 + $0x9e0] sm:$0xff] }
 0x47b   : > { %v14448_v13 = vpop.f32.mrb[15].mxu1  ;;  %11993 = vmatprep.subr.bf16.mxu0 %v11992_v62  ;;  %v8166_v62 = vld [vmem:[%s16234_s7 + $0x168] sm:$0xff]  ;;  %v8195_v42 = vld [vmem:[%s16234_s7 + $0x250] sm:$0xff] }
 0x47c   : > { %12175 = vmatpush3.bf16.msra.mxu1 %v12174_v3  ;;  %v8785_v17 = vrot.slane %v14438_v8, 1  ;;  %v12192_v3 = vpack.c.bf16 %v10969_v59, %v10968_v60  ;;  %v11026_v55 = vld [vmem:[%s16234_s7 + $0x928] sm:$0xff]  ;;  %v11043_v60 = vld [vmem:[%s16234_s7 + $0x9b0] sm:$0xff]  ;;  %v11044_v59 = vld [vmem:[%s16234_s7 + $0x9b8] sm:$0xff] }
 0x47d   : > { %12177 = vmatprep.subr.bf16.mxu1 %v12176_v5  ;;  %v12010_v5 = vpack.c.bf16 %v8166_v62, %v8165_v0  ;;  %v8189_v0 = vld [vmem:[%s16234_s7 + $0x220] sm:$0xff]  ;;  %v8190_v62 = vld [vmem:[%s16234_s7 + $0x228] sm:$0xff] }
 0x47e   : > { %11995 = vmatpush3.bf16.msra.mxu0 %v11994_v10  ;;  %v14469_v24 = vpop.f32.mrb[16].mxu1  ;;  %9008 = vmatprep.mubr.f32.mxu1 %v8785_v17  ;;  %v12012_v10 = vpack.c.bf16 %v8184_v2, %v8183_v1  ;;  %v8104_v17 = vadd.f32 %v14351_v25, %v14410_v54  ;;  %v11040_v54 = vld [vmem:[%s16234_s7 + $0x998] sm:$0xff]  ;;  %v8207_v1 = vld [vmem:[%s16234_s7 + $0x2b0] sm:$0xff] }
 0x47f   : > { %v14477_v29 = vpop.f32.mrb[17].mxu1  ;;  %11997 = vmatprep.subr.bf16.mxu0 %v11996_v14  ;;  %v12194_v14 = vpack.c.bf16 %v10953_v4, %v10952_v61  ;;  %v8208_v2 = vld [vmem:[%s16234_s7 + $0x2b8] sm:$0xff]  ;;  %v11027_v61 = vld [vmem:[%s16234_s7 + $0x930] sm:$0xff] }
 0x480   : > { %12179 = vmatpush3.bf16.msra.mxu1 %v12178_v18  ;;  %v12196_v18 = vpack.c.bf16 %v10971_v7, %v10970_v6  ;;  %v14591_v32 = vmax.f32 %v8104_v17, 0.0  ;;  %v11028_v4 = vld [vmem:[%s16234_s7 + $0x938] sm:$0xff]  ;;  %v11045_v6 = vld [vmem:[%s16234_s7 + $0x9c0] sm:$0xff]  ;;  %v11046_v7 = vld [vmem:[%s16234_s7 + $0x9c8] sm:$0xff] }
 0x481   : > { %12181 = vmatprep.subr.bf16.mxu1 %v12180_v21  ;;  %v12014_v21 = vpack.c.bf16 %v8168_v12, %v8167_v11  ;;  %v8191_v11 = vld [vmem:[%s16234_s7 + $0x230] sm:$0xff]  ;;  %v8192_v12 = vld [vmem:[%s16234_s7 + $0x238] sm:$0xff]  ;;  %v12268_v17 = vpack.c.bf16 %v11046_v7, %v11045_v6 }
 0x482   : > { %11999 = vmatpush3.bf16.msra.mxu0 %v11998_v26  ;;  %v12016_v26 = vpack.c.bf16 %v8202_v16, %v8201_v15  ;;  %v8784_v50 = vrot.slane %v14591_v32, 1  ;;  %v8209_v15 = vld [vmem:[%s16234_s7 + $0x2c0] sm:$0xff]  ;;  %v8210_v16 = vld [vmem:[%s16234_s7 + $0x2c8] sm:$0xff]  ;;  %v8200_v6 = vld [vmem:[%s16234_s7 + $0x278] sm:$0xff] }
 0x483   : > { %12001 = vmatprep.subr.bf16.mxu0 %v12000_v30  ;;  %v12198_v30 = vpack.c.bf16 %v10955_v20, %v10954_v19  ;;  %v11030_v19 = vld [vmem:[%s16234_s7 + $0x948] sm:$0xff]  ;;  %v12030_v20 = vpack.c.bf16 %v8192_v12, %v8191_v11 }
 0x484   : > { %12183 = vmatpush3.bf16.msra.mxu1 %v12182_v33  ;;  %v12256_v33 = vpack.c.bf16 %v11040_v54, %v11039_v22  ;;  %v11048_v22 = vld [vmem:[%s16234_s7 + $0x9d8] sm:$0xff]  ;;  %v12032_v54 = vpack.c.bf16 %v8210_v16, %v8209_v15  ;;  %v8234_v11 = vld [vmem:[%s16234_s7 + $0x388] sm:$0xff] }
 0x485   : > { %12185 = vmatprep.subr.bf16.mxu1 %v12184_v40  ;;  %v12018_v40 = vpack.c.bf16 %v8186_v28, %v8185_v27  ;;  %v8211_v28 = vld [vmem:[%s16234_s7 + $0x2d0] sm:$0xff]  ;;  %v11038_v15 = vld [vmem:[%s16234_s7 + $0x988] sm:$0xff] }
 0x486   : > { %12003 = vmatpush3.bf16.msra.mxu0 %v12002_v43  ;;  %v14605_v43 = vmax.f32 %v8102_v23, 0.0  ;;  %v8193_v23 = vld [vmem:[%s16234_s7 + $0x240] sm:$0xff] }
 0x487   : > { %12005 = vmatprep.subr.bf16.mxu0 %v12004_v46  ;;  %v8188_v46 = vld [vmem:[%s16234_s7 + $0x218] sm:$0xff] }
 0x488   : > { %12187 = vmatpush3.bf16.msra.mxu1 %v12186_v49  ;;  %v8206_v49 = vld [vmem:[%s16234_s7 + $0x2a8] sm:$0xff] }
 0x489   : > { %12189 = vmatprep.subr.bf16.mxu1 %v12188_v52  ;;  %v11025_v52 = vld [vmem:[%s16234_s7 + $0x920] sm:$0xff] }
 0x48a   : > { %12007 = vmatpush3.bf16.msra.mxu0 %v12006_v56  ;;  %v12022_v56 = vpack.c.bf16 %v8188_v46, %v8187_v45  ;;  %v8213_v46 = vld [vmem:[%s16234_s7 + $0x2e0] sm:$0xff] }
 0x48b   : > { %12009 = vmatprep.subr.bf16.mxu0 %v12008_v53  ;;  %v12024_v53 = vpack.c.bf16 %v8206_v49, %v8205_v48  ;;  %v11033_v49 = vld [vmem:[%s16234_s7 + $0x960] sm:$0xff] }
 0x48c   : > { %12191 = vmatpush3.bf16.msra.mxu1 %v12190_v63  ;;  %v12262_v63 = vpack.c.bf16 %v11026_v55, %v11025_v52  ;;  %v11051_v52 = vld [vmem:[%s16234_s7 + $0x9f0] sm:$0xff]  ;;  %v11052_v55 = vld [vmem:[%s16234_s7 + $0x9f8] sm:$0xff] }
 0x48d   : > { %12193 = vmatprep.subr.bf16.mxu1 %v12192_v3  ;;  %v12264_v3 = vpack.c.bf16 %v11044_v59, %v11043_v60  ;;  %v8198_v60 = vld [vmem:[%s16234_s7 + $0x268] sm:$0xff] }
 0x48e   : > { %12011 = vmatpush3.bf16.msra.mxu0 %v12010_v5  ;;  %v12026_v5 = vpack.c.bf16 %v8190_v62, %v8189_v0  ;;  %v8216_v0 = vld [vmem:[%s16234_s7 + $0x2f8] sm:$0xff]  ;;  %v12280_v62 = vpack.c.bf16 %v11052_v55, %v11051_v52 }
 0x48f   : > { %12013 = vmatprep.subr.bf16.mxu0 %v12012_v10  ;;  %v12028_v10 = vpack.c.bf16 %v8208_v2, %v8207_v1  ;;  %v11036_v1 = vld [vmem:[%s16234_s7 + $0x978] sm:$0xff] }
 0x490   : > { %12195 = vmatpush3.bf16.msra.mxu1 %v12194_v14  ;;  %v12266_v14 = vpack.c.bf16 %v11028_v4, %v11027_v61  ;;  %v11054_v61 = vld [vmem:[%s16234_s7 + $0xa08] sm:$0xff]  ;;  %v11076_v52 = vld [vmem:[%s16234_s7 + $0xab8] sm:$0xff] }
 0x491   : > { %12197 = vmatprep.subr.bf16.mxu1 %v12196_v18  ;;  %v11029_v18 = vld [vmem:[%s16234_s7 + $0x940] sm:$0xff] }
 0x492   : > { %12015 = vmatpush3.bf16.msra.mxu0 %v12014_v21  ;;  %v11047_v21 = vld [vmem:[%s16234_s7 + $0x9d0] sm:$0xff]  ;;  %v12270_v27 = vpack.c.bf16 %v11030_v19, %v11029_v18  ;;  %v11072_v18 = vld [vmem:[%s16234_s7 + $0xa98] sm:$0xff] }
 0x493   : > { %12017 = vmatprep.subr.bf16.mxu0 %v12016_v26  ;;  %v8194_v26 = vld [vmem:[%s16234_s7 + $0x248] sm:$0xff]  ;;  %v12272_v31 = vpack.c.bf16 %v11048_v22, %v11047_v21  ;;  %v8107_v22 = vadd.f32 %v14351_v25, %v14448_v13  ;;  %v11056_v13 = vld [vmem:[%s16234_s7 + $0xa18] sm:$0xff] }
 0x494   : > { %12199 = vmatpush3.bf16.msra.mxu1 %v12198_v30  ;;  %v8212_v30 = vld [vmem:[%s16234_s7 + $0x2d8] sm:$0xff]  ;;  %v12034_v35 = vpack.c.bf16 %v8194_v26, %v8193_v23  ;;  %v8218_v21 = vld [vmem:[%s16234_s7 + $0x308] sm:$0xff]  ;;  %v8235_v23 = vld [vmem:[%s16234_s7 + $0x390] sm:$0xff] }
 0x495   : > { %8409 = vmatmul.mubr.f32.vlgmr.msra.gmra.mrb[8].mxu0 %v14605_v43  ;;  %12257 = vmatprep.subr.bf16.mxu1 %v12256_v33  ;;  %v11032_v33 = vld [vmem:[%s16234_s7 + $0x958] sm:$0xff]  ;;  %v12036_v41 = vpack.c.bf16 %v8212_v30, %v8211_v28  ;;  %v11055_v28 = vld [vmem:[%s16234_s7 + $0xa10] sm:$0xff] }
 0x496   : > { %12019 = vmatpush3.bf16.msra.mxu0 %v12018_v40  ;;  %8478 = vmatprep.mubr.f32.mxu0 %v14438_v8  ;;  %v11050_v40 = vld [vmem:[%s16234_s7 + $0x9e8] sm:$0xff]  ;;  %v12274_v45 = vpack.c.bf16 %v11032_v33, %v11031_v39  ;;  %v8236_v26 = vld [vmem:[%s16234_s7 + $0x398] sm:$0xff] }
 0x497   : > { %9009 = vmatmul.mubr.f32.vlgmr.msra.gmra.mrb[20].mxu1 %v8784_v50  ;;  %12021 = vmatprep.subr.bf16.mxu0 %v12020_v44  ;;  %v8196_v44 = vld [vmem:[%s16234_s7 + $0x258] sm:$0xff]  ;;  %v12276_v48 = vpack.c.bf16 %v11050_v40, %v11049_v36  ;;  %v11034_v50 = vld [vmem:[%s16234_s7 + $0x968] sm:$0xff]  ;;  %v12052_v33 = vpack.c.bf16 %v8236_v26, %v8235_v23  ;;  %v14811_v40 = vmax.f32 %v8107_v22, 0.0  ;;  %v8243_v22 = vld [vmem:[%s16234_s7 + $0x3d0] sm:$0xff] }
 0x498   : > { %12259 = vmatpush3.bf16.msra.mxu1 %v12258_v47  ;;  %9389 = vmatprep.mubr.f32.mxu1 %v9302_v58  ;;  %v8214_v47 = vld [vmem:[%s16234_s7 + $0x2e8] sm:$0xff]  ;;  %v12278_v59 = vpack.c.bf16 %v11034_v50, %v11033_v49  ;;  %v8220_v36 = vld [vmem:[%s16234_s7 + $0x318] sm:$0xff]  ;;  %v9304_v49 = vrot.slane %v14408_v57, 2  ;;  %v11063_v26 = vld [vmem:[%s16234_s7 + $0xa50] sm:$0xff] }
 0x499   : > { %12261 = vmatprep.subr.bf16.mxu1 %v12260_v51  ;;  %v12038_v51 = vpack.c.bf16 %v8196_v44, %v8195_v42  ;;  %v12040_v58 = vpack.c.bf16 %v8214_v47, %v8213_v46  ;;  %v11074_v39 = vld [vmem:[%s16234_s7 + $0xaa8] sm:$0xff]  ;;  %v8237_v42 = vld [vmem:[%s16234_s7 + $0x3a0] sm:$0xff] }
 0x49a   : > { %12023 = vmatpush3.bf16.msra.mxu0 %v12022_v56  ;;  %v8197_v56 = vld [vmem:[%s16234_s7 + $0x260] sm:$0xff]  ;;  %v8238_v44 = vld [vmem:[%s16234_s7 + $0x3a8] sm:$0xff] }
 0x49b   : > { %12025 = vmatprep.subr.bf16.mxu0 %v12024_v53  ;;  %v8215_v53 = vld [vmem:[%s16234_s7 + $0x2f0] sm:$0xff]  ;;  %v12042_v2 = vpack.c.bf16 %v8198_v60, %v8197_v56  ;;  %v11057_v47 = vld [vmem:[%s16234_s7 + $0xa20] sm:$0xff]  ;;  %v12056_v55 = vpack.c.bf16 %v8238_v44, %v8237_v42  ;;  %v8222_v56 = vld [vmem:[%s16234_s7 + $0x328] sm:$0xff] }
 0x49c   : > { %12263 = vmatpush3.bf16.msra.mxu1 %v12262_v63  ;;  %v11035_v63 = vld [vmem:[%s16234_s7 + $0x970] sm:$0xff]  ;;  %v12044_v4 = vpack.c.bf16 %v8216_v0, %v8215_v53  ;;  %v8240_v53 = vld [vmem:[%s16234_s7 + $0x3b8] sm:$0xff]  ;;  %v11065_v44 = vld [vmem:[%s16234_s7 + $0xa60] sm:$0xff] }
 0x49d   : > { %12265 = vmatprep.subr.bf16.mxu1 %v12264_v3  ;;  %v11053_v3 = vld [vmem:[%s16234_s7 + $0xa00] sm:$0xff]  ;;  %v12282_v7 = vpack.c.bf16 %v11036_v1, %v11035_v63  ;;  %v11060_v63 = vld [vmem:[%s16234_s7 + $0xa38] sm:$0xff] }
 0x49e   : > { %12027 = vmatpush3.bf16.msra.mxu0 %v12026_v5  ;;  %v8199_v5 = vld [vmem:[%s16234_s7 + $0x270] sm:$0xff]  ;;  %v12284_v12 = vpack.c.bf16 %v11054_v61, %v11053_v3  ;;  %v11078_v3 = vld [vmem:[%s16234_s7 + $0xac8] sm:$0xff] }
 0x49f   : > { %12029 = vmatprep.subr.bf16.mxu0 %v12028_v10  ;;  %v8233_v10 = vld [vmem:[%s16234_s7 + $0x380] sm:$0xff]  ;;  %v12046_v16 = vpack.c.bf16 %v8200_v6, %v8199_v5  ;;  %v8224_v5 = vld [vmem:[%s16234_s7 + $0x338] sm:$0xff] }
 0x4a0   : > { %12267 = vmatpush3.bf16.msra.mxu1 %v12266_v14  ;;  %v11037_v14 = vld [vmem:[%s16234_s7 + $0x980] sm:$0xff]  ;;  %v12048_v19 = vpack.c.bf16 %v8234_v11, %v8233_v10  ;;  %v8242_v10 = vld [vmem:[%s16234_s7 + $0x3c8] sm:$0xff] }
 0x4a1   : > { %12269 = vmatprep.subr.bf16.mxu1 %v12268_v17  ;;  %v11071_v17 = vld [vmem:[%s16234_s7 + $0xa90] sm:$0xff] }
 0x4a2   : > { %12031 = vmatpush3.bf16.msra.mxu0 %v12030_v20  ;;  %v8217_v20 = vld [vmem:[%s16234_s7 + $0x300] sm:$0xff] }
 0x4a3   : > { %12033 = vmatprep.subr.bf16.mxu0 %v12032_v54  ;;  %v12286_v54 = vpack.c.bf16 %v11038_v15, %v11037_v14  ;;  %v12050_v30 = vpack.c.bf16 %v8218_v21, %v8217_v20  ;;  %v11062_v14 = vld [vmem:[%s16234_s7 + $0xa48] sm:$0xff] }
 0x4a4   : > { %12271 = vmatpush3.bf16.msra.mxu1 %v12270_v27  ;;  %v12288_v27 = vpack.c.bf16 %v11072_v18, %v11071_v17  ;;  %v11080_v17 = vld [vmem:[%s16234_s7 + $0xad8] sm:$0xff]  ;;  %v8226_v20 = vld [vmem:[%s16234_s7 + $0x348] sm:$0xff] }
 0x4a5   : > { %12273 = vmatprep.subr.bf16.mxu1 %v12272_v31  ;;  %v11073_v31 = vld [vmem:[%s16234_s7 + $0xaa0] sm:$0xff] }
 0x4a6   : > { %12035 = vmatpush3.bf16.msra.mxu0 %v12034_v35  ;;  %v8219_v35 = vld [vmem:[%s16234_s7 + $0x310] sm:$0xff]  ;;  %v12292_v46 = vpack.c.bf16 %v11074_v39, %v11073_v31 }
 0x4a7   : > { %12037 = vmatprep.subr.bf16.mxu0 %v12036_v41  ;;  %v12290_v41 = vpack.c.bf16 %v11056_v13, %v11055_v28  ;;  %v12054_v50 = vpack.c.bf16 %v8220_v36, %v8219_v35  ;;  %v11081_v13 = vld [vmem:[%s16234_s7 + $0xae0] sm:$0xff]  ;;  %v8227_v39 = vld [vmem:[%s16234_s7 + $0x350] sm:$0xff] }
 0x4a8   : > { %12275 = vmatpush3.bf16.msra.mxu1 %v12274_v45  ;;  %v9301_v45 = vrot.slane %v14367_v34, 2  ;;  %v8245_v36 = vld [vmem:[%s16234_s7 + $0x3e0] sm:$0xff] }
 0x4a9   : > { %12277 = vmatprep.subr.bf16.mxu1 %v12276_v48  ;;  %v11058_v48 = vld [vmem:[%s16234_s7 + $0xa28] sm:$0xff] }
 0x4aa   : > { %12039 = vmatpush3.bf16.msra.mxu0 %v12038_v51  ;;  %v11075_v51 = vld [vmem:[%s16234_s7 + $0xab0] sm:$0xff]  ;;  %v12294_v60 = vpack.c.bf16 %v11058_v48, %v11057_v47  ;;  %v11084_v48 = vld [vmem:[%s16234_s7 + $0xaf8] sm:$0xff] }
 0x4ab   : > { %12041 = vmatprep.subr.bf16.mxu0 %v12040_v58  ;;  %v8221_v58 = vld [vmem:[%s16234_s7 + $0x320] sm:$0xff]  ;;  %v12296_v0 = vpack.c.bf16 %v11076_v52, %v11075_v51  ;;  %v11083_v47 = vld [vmem:[%s16234_s7 + $0xaf0] sm:$0xff]  ;;  %v8230_v51 = vld [vmem:[%s16234_s7 + $0x368] sm:$0xff] }
 0x4ac   : > { %12279 = vmatpush3.bf16.msra.mxu1 %v12278_v59  ;;  %v8239_v59 = vld [vmem:[%s16234_s7 + $0x3b0] sm:$0xff]  ;;  %v12058_v1 = vpack.c.bf16 %v8222_v56, %v8221_v58  ;;  %v8248_v58 = vld [vmem:[%s16234_s7 + $0x3f8] sm:$0xff]  ;;  %v12312_v56 = vpack.c.bf16 %v11084_v48, %v11083_v47 }
 0x4ad   : > { %12281 = vmatprep.subr.bf16.mxu1 %v12280_v62  ;;  %v11059_v62 = vld [vmem:[%s16234_s7 + $0xa30] sm:$0xff]  ;;  %v12060_v61 = vpack.c.bf16 %v8240_v53, %v8239_v59  ;;  %v11068_v59 = vld [vmem:[%s16234_s7 + $0xa78] sm:$0xff] }
 0x4ae   : > { %12043 = vmatpush3.bf16.msra.mxu0 %v12042_v2  ;;  %v11077_v2 = vld [vmem:[%s16234_s7 + $0xac0] sm:$0xff]  ;;  %v12298_v6 = vpack.c.bf16 %v11060_v63, %v11059_v62  ;;  %v11086_v62 = vld [vmem:[%s16234_s7 + $0xb08] sm:$0xff]  ;;  %v11124_v47 = vld [vmem:[%s16234_s7 + $0xc38] sm:$0xff] }
 0x4af   : > { %12045 = vmatprep.subr.bf16.mxu0 %v12044_v4  ;;  %v8223_v4 = vld [vmem:[%s16234_s7 + $0x330] sm:$0xff]  ;;  %v12300_v11 = vpack.c.bf16 %v11078_v3, %v11077_v2  ;;  %v8232_v2 = vld [vmem:[%s16234_s7 + $0x378] sm:$0xff] }
 0x4b0   : > { %12283 = vmatpush3.bf16.msra.mxu1 %v12282_v7  ;;  %v8241_v7 = vld [vmem:[%s16234_s7 + $0x3c0] sm:$0xff]  ;;  %v12062_v15 = vpack.c.bf16 %v8224_v5, %v8223_v4  ;;  %v11070_v5 = vld [vmem:[%s16234_s7 + $0xa88] sm:$0xff] }
 0x4b1   : > { %12285 = vmatprep.subr.bf16.mxu1 %v12284_v12  ;;  %v11061_v12 = vld [vmem:[%s16234_s7 + $0xa40] sm:$0xff]  ;;  %v12064_v18 = vpack.c.bf16 %v8242_v10, %v8241_v7  ;;  %v11135_v7 = vld [vmem:[%s16234_s7 + $0xc90] sm:$0xff]  ;;  %v11136_v10 = vld [vmem:[%s16234_s7 + $0xc98] sm:$0xff] }
 0x4b2   : > { %12047 = vmatpush3.bf16.msra.mxu0 %v12046_v16  ;;  %v11079_v16 = vld [vmem:[%s16234_s7 + $0xad0] sm:$0xff]  ;;  %v12302_v21 = vpack.c.bf16 %v11062_v14, %v11061_v12  ;;  %v11069_v4 = vld [vmem:[%s16234_s7 + $0xa80] sm:$0xff]  ;;  %v8250_v14 = vld [vmem:[%s16234_s7 + $0x408] sm:$0xff] }
 0x4b3   : > { %12049 = vmatprep.subr.bf16.mxu0 %v12048_v19  ;;  %v8225_v19 = vld [vmem:[%s16234_s7 + $0x340] sm:$0xff]  ;;  %v12304_v23 = vpack.c.bf16 %v11080_v17, %v11079_v16  ;;  %v12318_v16 = vpack.c.bf16 %v11070_v5, %v11069_v4  ;;  %v12352_v17 = vpack.c.bf16 %v11136_v10, %v11135_v7  ;;  %v8259_v7 = vld [vmem:[%s16234_s7 + $0x450] sm:$0xff]  ;;  %v8260_v10 = vld [vmem:[%s16234_s7 + $0x458] sm:$0xff] }
 0x4b4   : > { %12287 = vmatpush3.bf16.msra.mxu1 %v12286_v54  ;;  %v8244_v54 = vld [vmem:[%s16234_s7 + $0x3d8] sm:$0xff]  ;;  %v12066_v28 = vpack.c.bf16 %v8226_v20, %v8225_v19  ;;  %v8249_v12 = vld [vmem:[%s16234_s7 + $0x400] sm:$0xff] }
 0x4b5   : > { %8479 = vmatmul.mubr.f32.vlgmr.msra.gmra.mrb[10].mxu0 %v14591_v32  ;;  %12289 = vmatprep.subr.bf16.mxu1 %v12288_v27  ;;  %v11064_v27 = vld [vmem:[%s16234_s7 + $0xa58] sm:$0xff]  ;;  %v12068_v31 = vpack.c.bf16 %v8244_v54, %v8243_v22  ;;  %v12081_v19 = vpack.c.bf16 %v8250_v14, %v8249_v12  ;;  %v11137_v20 = vld [vmem:[%s16234_s7 + $0xca0] sm:$0xff]  ;;  %v12935_v22 = vmov 0.0|0.0   ;;  %v8251_v54 = vld [vmem:[%s16234_s7 + $0x410] sm:$0xff] }
 0x4b6   : > { %12051 = vmatpush3.bf16.msra.mxu0 %v12050_v30  ;;  %8548 = vmatprep.mubr.f32.mxu0 %v14811_v40  ;;  %v11082_v30 = vld [vmem:[%s16234_s7 + $0xae8] sm:$0xff]  ;;  %v12306_v35 = vpack.c.bf16 %v11064_v27, %v11063_v26  ;;  %v11145_v5 = vld [vmem:[%s16234_s7 + $0xce0] sm:$0xff] }
 0x4b7   : > { %9390 = vmatmul.mubr.f32.vlgmr.msra.gmra.mrb[22].mxu1 %v9301_v45  ;;  %12053 = vmatprep.subr.bf16.mxu0 %v12052_v33  ;;  %v8228_v33 = vld [vmem:[%s16234_s7 + $0x358] sm:$0xff]  ;;  %v12308_v42 = vpack.c.bf16 %v11082_v30, %v11081_v13  ;;  %v11066_v45 = vld [vmem:[%s16234_s7 + $0xa68] sm:$0xff]  ;;  %v11121_v30 = vld [vmem:[%s16234_s7 + $0xc20] sm:$0xff] }
 0x4b8   : > { %12291 = vmatpush3.bf16.msra.mxu1 %v12290_v41  ;;  %9459 = vmatprep.mubr.f32.mxu1 %v9304_v49  ;;  %v8246_v41 = vld [vmem:[%s16234_s7 + $0x3e8] sm:$0xff]  ;;  %v12310_v52 = vpack.c.bf16 %v11066_v45, %v11065_v44  ;;  %v11129_v14 = vld [vmem:[%s16234_s7 + $0xc60] sm:$0xff] }
 0x4b9   : > { %12293 = vmatprep.subr.bf16.mxu1 %v12292_v46  ;;  %v12070_v46 = vpack.c.bf16 %v8228_v33, %v8227_v39  ;;  %v12072_v49 = vpack.c.bf16 %v8246_v41, %v8245_v36  ;;  %v9308_v39 = vrot.slane %v14811_v40, 2  ;;  %v11140_v36 = vld [vmem:[%s16234_s7 + $0xcb8] sm:$0xff]  ;;  %v8253_v41 = vld [vmem:[%s16234_s7 + $0x420] sm:$0xff] }
 0x4ba   : > { %12055 = vmatpush3.bf16.msra.mxu0 %v12054_v50  ;;  %v8229_v50 = vld [vmem:[%s16234_s7 + $0x360] sm:$0xff] }
 0x4bb   : > { %12057 = vmatprep.subr.bf16.mxu0 %v12056_v55  ;;  %v8247_v55 = vld [vmem:[%s16234_s7 + $0x3f0] sm:$0xff]  ;;  %v12074_v53 = vpack.c.bf16 %v8230_v51, %v8229_v50  ;;  %v11142_v50 = vld [vmem:[%s16234_s7 + $0xcc8] sm:$0xff] }
 0x4bc   : > { %12295 = vmatpush3.bf16.msra.mxu1 %v12294_v60  ;;  %v11067_v60 = vld [vmem:[%s16234_s7 + $0xa70] sm:$0xff]  ;;  %v12076_v63 = vpack.c.bf16 %v8248_v58, %v8247_v55 }
 0x4bd   : > { %12297 = vmatprep.subr.bf16.mxu1 %v12296_v0  ;;  %v11085_v0 = vld [vmem:[%s16234_s7 + $0xb00] sm:$0xff]  ;;  %v12314_v3 = vpack.c.bf16 %v11068_v59, %v11067_v60  ;;  %v8255_v51 = vld [vmem:[%s16234_s7 + $0x430] sm:$0xff]  ;;  %v11126_v60 = vld [vmem:[%s16234_s7 + $0xc48] sm:$0xff] }
 0x4be   : > { %12059 = vmatpush3.bf16.msra.mxu0 %v12058_v1  ;;  %v8231_v1 = vld [vmem:[%s16234_s7 + $0x370] sm:$0xff] }
 0x4bf   : > { %12061 = vmatprep.subr.bf16.mxu0 %v12060_v61  ;;  %v12316_v61 = vpack.c.bf16 %v11086_v62, %v11085_v0  ;;  %v11144_v0 = vld [vmem:[%s16234_s7 + $0xcd8] sm:$0xff]  ;;  %v8257_v62 = vld [vmem:[%s16234_s7 + $0x440] sm:$0xff] }
 0x4c0   : > { %12299 = vmatpush3.bf16.msra.mxu1 %v12298_v6  ;;  %v12078_v6 = vpack.c.bf16 %v8232_v2, %v8231_v1 }
 0x4c1   : > { %12301 = vmatprep.subr.bf16.mxu1 %v12300_v11  ;;  %v8106_v11 = vadd.f32 %v14351_v25, %v14440_v9  ;;  %v11119_v9 = vld [vmem:[%s16234_s7 + $0xc10] sm:$0xff] }
 0x4c2   : > { %12063 = vmatpush3.bf16.msra.mxu0 %v12062_v15  ;;  %v8109_v15 = vadd.f32 %v14351_v25, %v14477_v29  ;;  %v11138_v29 = vld [vmem:[%s16234_s7 + $0xca8] sm:$0xff] }
 0x4c3   : > { %12065 = vmatprep.subr.bf16.mxu0 %v12064_v18  ;;  %v11120_v18 = vld [vmem:[%s16234_s7 + $0xc18] sm:$0xff]  ;;  %v12356_v13 = vpack.c.bf16 %v11138_v29, %v11137_v20 }
 0x4c4   : > { %12303 = vmatpush3.bf16.msra.mxu1 %v12302_v21  ;;  %v14995_v21 = vmax.f32 %v8106_v11, 0.0  ;;  %v15004_v26 = vmax.f32 %v8109_v15, 0.0  ;;  %v12354_v27 = vpack.c.bf16 %v11120_v18, %v11119_v9  ;;  %v11130_v15 = vld [vmem:[%s16234_s7 + $0xc68] sm:$0xff]  ;;  %v11148_v9 = vld [vmem:[%s16234_s7 + $0xcf8] sm:$0xff]  ;;  %v8261_v18 = vld [vmem:[%s16234_s7 + $0x460] sm:$0xff] }
 0x4c5   : > { %12305 = vmatprep.subr.bf16.mxu1 %v12304_v23  ;;  %v8252_v23 = vld [vmem:[%s16234_s7 + $0x418] sm:$0xff]  ;;  %v12374_v20 = vpack.c.bf16 %v11130_v15, %v11129_v14  ;;  %v9823_v14 = vrot.slane %v14375_v37, 3 }
 0x4c6   : > { %12067 = vmatpush3.bf16.msra.mxu0 %v12066_v28  ;;  %v9303_v28 = vrot.slane %v14605_v43, 2  ;;  %v12084_v33 = vpack.c.bf16 %v8252_v23, %v8251_v54  ;;  %v11131_v54 = vld [vmem:[%s16234_s7 + $0xc70] sm:$0xff]  ;;  %v11132_v23 = vld [vmem:[%s16234_s7 + $0xc78] sm:$0xff] }
 0x4c7   : > { %12069 = vmatprep.subr.bf16.mxu0 %v12068_v31  ;;  %v11122_v31 = vld [vmem:[%s16234_s7 + $0xc28] sm:$0xff] }
 0x4c8   : > { %12307 = vmatpush3.bf16.msra.mxu1 %v12306_v35  ;;  %v11139_v35 = vld [vmem:[%s16234_s7 + $0xcb0] sm:$0xff]  ;;  %v12358_v44 = vpack.c.bf16 %v11122_v31, %v11121_v30  ;;  %v8264_v31 = vld [vmem:[%s16234_s7 + $0x478] sm:$0xff] }
 0x4c9   : > { %12309 = vmatprep.subr.bf16.mxu1 %v12308_v42  ;;  %v8254_v42 = vld [vmem:[%s16234_s7 + $0x428] sm:$0xff]  ;;  %v12360_v45 = vpack.c.bf16 %v11140_v36, %v11139_v35  ;;  %v8263_v30 = vld [vmem:[%s16234_s7 + $0x470] sm:$0xff]  ;;  %v11133_v35 = vld [vmem:[%s16234_s7 + $0xc80] sm:$0xff] }
 0x4ca   : > { %12071 = vmatpush3.bf16.msra.mxu0 %v12070_v46  ;;  %v11123_v46 = vld [vmem:[%s16234_s7 + $0xc30] sm:$0xff]  ;;  %v12087_v48 = vpack.c.bf16 %v8254_v42, %v8253_v41  ;;  %v11134_v36 = vld [vmem:[%s16234_s7 + $0xc88] sm:$0xff]  ;;  %v12102_v41 = vpack.c.bf16 %v8264_v31, %v8263_v30  ;;  %v11186_v42 = vld [vmem:[%s16234_s7 + $0xe18] sm:$0xff] }
 0x4cb   : > { %12073 = vmatprep.subr.bf16.mxu0 %v12072_v49  ;;  %v11141_v49 = vld [vmem:[%s16234_s7 + $0xcc0] sm:$0xff]  ;;  %v12362_v55 = vpack.c.bf16 %v11124_v47, %v11123_v46  ;;  %v10924_v46 = vld [vmem:[%s16234_s7 + $0x608] sm:$0xff]  ;;  %v10925_v47 = vld [vmem:[%s16234_s7 + $0x610] sm:$0xff] }
 0x4cc   : > { %12311 = vmatpush3.bf16.msra.mxu1 %v12310_v52  ;;  %v8256_v52 = vld [vmem:[%s16234_s7 + $0x438] sm:$0xff]  ;;  %v12364_v58 = vpack.c.bf16 %v11142_v50, %v11141_v49  ;;  %v10908_v50 = vld [vmem:[%s16234_s7 + $0x588] sm:$0xff] }
 0x4cd   : > { %12313 = vmatprep.subr.bf16.mxu1 %v12312_v56  ;;  %v11125_v56 = vld [vmem:[%s16234_s7 + $0xc40] sm:$0xff]  ;;  %v12090_v59 = vpack.c.bf16 %v8256_v52, %v8255_v51  ;;  %v10909_v51 = vld [vmem:[%s16234_s7 + $0x590] sm:$0xff]  ;;  %v11170_v52 = vld [vmem:[%s16234_s7 + $0xd98] sm:$0xff] }
 0x4ce   : > { %12075 = vmatpush3.bf16.msra.mxu0 %v12074_v53  ;;  %v11143_v53 = vld [vmem:[%s16234_s7 + $0xcd0] sm:$0xff]  ;;  %v12366_v1 = vpack.c.bf16 %v11126_v60, %v11125_v56  ;;  %v10927_v56 = vld [vmem:[%s16234_s7 + $0x620] sm:$0xff]  ;;  %v12138_v60 = vpack.c.bf16 %v10909_v51, %v10908_v50  ;;  %v10914_v31 = vld [vmem:[%s16234_s7 + $0x5b8] sm:$0xff] }
 0x4cf   : > { %12077 = vmatprep.subr.bf16.mxu0 %v12076_v63  ;;  %v8258_v63 = vld [vmem:[%s16234_s7 + $0x448] sm:$0xff]  ;;  %v12368_v2 = vpack.c.bf16 %v11144_v0, %v11143_v53  ;;  %v11189_v53 = vld [vmem:[%s16234_s7 + $0xe30] sm:$0xff]  ;;  %v11178_v51 = vld [vmem:[%s16234_s7 + $0xdd8] sm:$0xff] }
 0x4d0   : > { %12315 = vmatpush3.bf16.msra.mxu1 %v12314_v3  ;;  %v11127_v3 = vld [vmem:[%s16234_s7 + $0xc50] sm:$0xff]  ;;  %v12093_v4 = vpack.c.bf16 %v8258_v63, %v8257_v62  ;;  %v10910_v63 = vld [vmem:[%s16234_s7 + $0x598] sm:$0xff] }
 0x4d1   : > { %12317 = vmatprep.subr.bf16.mxu1 %v12316_v61  ;;  %v11128_v61 = vld [vmem:[%s16234_s7 + $0xc58] sm:$0xff]  ;;  %v10917_v50 = vld [vmem:[%s16234_s7 + $0x5d0] sm:$0xff] }
 0x4d2   : > { %12079 = vmatpush3.bf16.msra.mxu0 %v12078_v6  ;;  %v11146_v6 = vld [vmem:[%s16234_s7 + $0xce8] sm:$0xff]  ;;  %v12370_v11 = vpack.c.bf16 %v11128_v61, %v11127_v3  ;;  %v9307_v3 = vrot.slane %v14995_v21, 2 }
 0x4d3   : > { %12080 = vmatprep.subr.bf16.mxu0 %v12935_v22  ;;  %v12372_v12 = vpack.c.bf16 %v11146_v6, %v11145_v5  ;;  %v10928_v5 = vld [vmem:[%s16234_s7 + $0x628] sm:$0xff]  ;;  %v10929_v6 = vld [vmem:[%s16234_s7 + $0x630] sm:$0xff] }
 0x4d4   : > { %12319 = vmatpush3.bf16.msra.mxu1 %v12318_v16  ;;  %v12096_v16 = vpack.c.bf16 %v8260_v10, %v8259_v7  ;;  %v8783_v7 = vrot.slane %v14408_v57, 1 }
 0x4d5   : > { %8549 = vmatmul.mubr.f32.vlgmr.msra.gmra.mrb[12].mxu0 %v14995_v21  ;;  %12353 = vmatprep.subr.bf16.mxu1 %v12352_v17  ;;  %v11147_v17 = vld [vmem:[%s16234_s7 + $0xcf0] sm:$0xff] }
 0x4d6   : > { %12082 = vmatpush1.bf16.msra.mxu0 %v12081_v19  ;;  %10875 = vmatprep.mubr.msk.f32.mxu0 %vm8266_vm15, %v15004_v26  ;;  %v8262_v19 = vld [vmem:[%s16234_s7 + $0x468] sm:$0xff]  ;;  %v12376_v29 = vpack.c.bf16 %v11148_v9, %v11147_v17  ;;  %v12144_v17 = vpack.c.bf16 %v10929_v6, %v10928_v5  ;;  %v11198_v5 = vld [vmem:[%s16234_s7 + $0xe78] sm:$0xff]  ;;  %v11199_v6 = vld [vmem:[%s16234_s7 + $0xe80] sm:$0xff] }
 0x4d7   : > { %9460 = vmatmul.mubr.f32.vlgmr.msra.gmra.mrb[24].mxu1 %v9303_v28  ;;  %12083 = vmatprep.subr.bf16.mxu0 %v12935_v22  ;;  %v11149_v28 = vld [vmem:[%s16234_s7 + $0xd00] sm:$0xff]  ;;  %v10912_v9 = vld [vmem:[%s16234_s7 + $0x5a8] sm:$0xff] }
 0x4d8   : > { %12355 = vmatpush3.bf16.msra.mxu1 %v12354_v27  ;;  %9599 = vmatprep.mubr.f32.mxu1 %v9308_v39  ;;  %v12099_v27 = vpack.c.bf16 %v8262_v19, %v8261_v18  ;;  %v12378_v39 = vpack.c.bf16 %v11132_v23, %v11131_v54  ;;  %v10913_v18 = vld [vmem:[%s16234_s7 + $0x5b0] sm:$0xff]  ;;  %v11174_v19 = vld [vmem:[%s16234_s7 + $0xdb8] sm:$0xff]  ;;  %v10931_v54 = vld [vmem:[%s16234_s7 + $0x640] sm:$0xff] }
 0x4d9   : > { %12357 = vmatprep.subr.bf16.mxu1 %v12356_v13  ;;  %v11150_v13 = vld [vmem:[%s16234_s7 + $0xd08] sm:$0xff] }
 0x4da   : > { %12085 = vmatpush1.bf16.msra.mxu0 %v12084_v33  ;;  %v12380_v33 = vpack.c.bf16 %v11150_v13, %v11149_v28  ;;  %v11192_v23 = vld [vmem:[%s16234_s7 + $0xe48] sm:$0xff]  ;;  %v12146_v28 = vpack.c.bf16 %v10913_v18, %v10912_v9  ;;  %v10938_v9 = vld [vmem:[%s16234_s7 + $0x678] sm:$0xff]  ;;  %v10939_v18 = vld [vmem:[%s16234_s7 + $0x680] sm:$0xff] }
 0x4db   : > { %12086 = vmatprep.subr.bf16.mxu0 %v12935_v22 }
 0x4dc   : > { %12359 = vmatpush3.bf16.msra.mxu1 %v12358_v44  ;;  %v11187_v44 = vld [vmem:[%s16234_s7 + $0xe20] sm:$0xff] }
 0x4dd   : > { %12361 = vmatprep.subr.bf16.mxu1 %v12360_v45  ;;  %v12382_v45 = vpack.c.bf16 %v11134_v36, %v11133_v35  ;;  %v12408_v49 = vpack.c.bf16 %v11187_v44, %v11186_v42  ;;  %v11177_v36 = vld [vmem:[%s16234_s7 + $0xdd0] sm:$0xff]  ;;  %v11194_v44 = vld [vmem:[%s16234_s7 + $0xe58] sm:$0xff] }
 0x4de   : > { %12088 = vmatpush1.bf16.msra.mxu0 %v12087_v48  ;;  %v8108_v48 = vadd.f32 %v14351_v25, %v14469_v24  ;;  %v8265_v25 = vld [vmem:[%s16234_s7 + $0x480] sm:$0x1]  ;;  %v12136_v24 = vpack.c.bf16 %v10925_v47, %v10924_v46  ;;  %v10933_v42 = vld [vmem:[%s16234_s7 + $0x650] sm:$0xff] }
 0x4df   : > { %12089 = vmatprep.subr.bf16.mxu0 %v12935_v22 }
 0x4e0   : > { %12363 = vmatpush3.bf16.msra.mxu1 %v12362_v55  ;;  %v11171_v55 = vld [vmem:[%s16234_s7 + $0xda0] sm:$0xff]  ;;  %v15174_v0 = vmax.f32 %v8108_v48, 0.0 }
 0x4e1   : > { %12365 = vmatprep.subr.bf16.mxu1 %v12364_v58  ;;  %v10926_v58 = vld [vmem:[%s16234_s7 + $0x618] sm:$0xff]  ;;  %v12410_v62 = vpack.c.bf16 %v11171_v55, %v11170_v52  ;;  %v11179_v55 = vld [vmem:[%s16234_s7 + $0xde0] sm:$0xff] }
 0x4e2   : > { %12091 = vmatpush1.bf16.msra.mxu0 %v12090_v59  ;;  %v11188_v59 = vld [vmem:[%s16234_s7 + $0xe28] sm:$0xff]  ;;  %v12140_v61 = vpack.c.bf16 %v10927_v56, %v10926_v58  ;;  %v11197_v56 = vld [vmem:[%s16234_s7 + $0xe70] sm:$0xff] }
 0x4e3   : > { %12092 = vmatprep.subr.bf16.mxu0 %v12935_v22  ;;  %v12412_v10 = vpack.c.bf16 %v11189_v53, %v11188_v59  ;;  %v11196_v58 = vld [vmem:[%s16234_s7 + $0xe68] sm:$0xff]  ;;  %v12426_v59 = vpack.c.bf16 %v11179_v55, %v11178_v51  ;;  %v11253_v55 = vld [vmem:[%s16234_s7 + $0x1030] sm:$0xff] }
 0x4e4   : > { %12367 = vmatpush3.bf16.msra.mxu1 %v12366_v1  ;;  %v10911_v1 = vld [vmem:[%s16234_s7 + $0x5a0] sm:$0xff] }
 0x4e5   : > { %12369 = vmatprep.subr.bf16.mxu1 %v12368_v2  ;;  %v11172_v2 = vld [vmem:[%s16234_s7 + $0xda8] sm:$0xff]  ;;  %v12142_v15 = vpack.c.bf16 %v10911_v1, %v10910_v63  ;;  %v10919_v63 = vld [vmem:[%s16234_s7 + $0x5e0] sm:$0xff] }
 0x4e6   : > { %12094 = vmatpush1.bf16.msra.mxu0 %v12093_v4  ;;  %v11173_v4 = vld [vmem:[%s16234_s7 + $0xdb0] sm:$0xff]  ;;  %v11180_v1 = vld [vmem:[%s16234_s7 + $0xde8] sm:$0xff] }
 0x4e7   : > { %12095 = vmatprep.subr.bf16.mxu0 %v12935_v22 }
 0x4e8   : > { %12371 = vmatpush3.bf16.msra.mxu1 %v12370_v11  ;;  %v11190_v11 = vld [vmem:[%s16234_s7 + $0xe38] sm:$0xff] }
 0x4e9   : > { %12373 = vmatprep.subr.bf16.mxu1 %v12372_v12  ;;  %v11191_v12 = vld [vmem:[%s16234_s7 + $0xe40] sm:$0xff] }
 0x4ea   : > { %12097 = vmatpush1.bf16.msra.mxu0 %v12096_v16  ;;  %v12414_v16 = vpack.c.bf16 %v11173_v4, %v11172_v2  ;;  %v12416_v37 = vpack.c.bf16 %v11191_v12, %v11190_v11  ;;  %v12428_v2 = vpack.c.bf16 %v11197_v56, %v11196_v58  ;;  %v10937_v4 = vld [vmem:[%s16234_s7 + $0x670] sm:$0xff]  ;;  %v10920_v12 = vld [vmem:[%s16234_s7 + $0x5e8] sm:$0xff]  ;;  %v10974_v58 = vld [vmem:[%s16234_s7 + $0x798] sm:$0xff] }
 0x4eb   : > { %12098 = vmatprep.subr.bf16.mxu0 %v12935_v22  ;;  %v10975_v56 = vld [vmem:[%s16234_s7 + $0x7a0] sm:$0xff] }
 0x4ec   : > { %12375 = vmatpush3.bf16.msra.mxu1 %v12374_v20  ;;  %v11175_v20 = vld [vmem:[%s16234_s7 + $0xdc0] sm:$0xff] }
 0x4ed   : > { %12377 = vmatprep.subr.bf16.mxu1 %v12376_v29  ;;  %v10930_v29 = vld [vmem:[%s16234_s7 + $0x638] sm:$0xff]  ;;  %v12418_v13 = vpack.c.bf16 %v11175_v20, %v11174_v19  ;;  %v11200_v19 = vld [vmem:[%s16234_s7 + $0xe88] sm:$0xff] }
 0x4ee   : > { %12100 = vmatpush1.bf16.msra.mxu0 %v12099_v27  ;;  %v11193_v27 = vld [vmem:[%s16234_s7 + $0xe50] sm:$0xff]  ;;  %v12148_v30 = vpack.c.bf16 %v10931_v54, %v10930_v29  ;;  %v12164_v54 = vpack.c.bf16 %v10939_v18, %v10938_v9  ;;  %v11256_v9 = vld [vmem:[%s16234_s7 + $0x1048] sm:$0xff] }
 0x4ef   : > { %12101 = vmatprep.subr.bf16.mxu0 %v12935_v22  ;;  %v12420_v35 = vpack.c.bf16 %v11193_v27, %v11192_v23  ;;  %v10922_v23 = vld [vmem:[%s16234_s7 + $0x5f8] sm:$0xff]  ;;  %v10923_v27 = vld [vmem:[%s16234_s7 + $0x600] sm:$0xff]  ;;  %v11257_v18 = vld [vmem:[%s16234_s7 + $0x1050] sm:$0xff] }
 0x4f0   : > { %12379 = vmatpush3.bf16.msra.mxu1 %v12378_v39  ;;  %v10915_v39 = vld [vmem:[%s16234_s7 + $0x5c0] sm:$0xff] }
 0x4f1   : > { %12381 = vmatprep.subr.bf16.mxu1 %v12380_v33  ;;  %v11176_v33 = vld [vmem:[%s16234_s7 + $0xdc8] sm:$0xff]  ;;  %v12150_v46 = vpack.c.bf16 %v10915_v39, %v10914_v31  ;;  %v10989_v39 = vld [vmem:[%s16234_s7 + $0x810] sm:$0xff] }
 0x4f2   : > { %12103 = vmatpush1.bf16.msra.mxu0 %v12102_v41  ;;  %v10932_v41 = vld [vmem:[%s16234_s7 + $0x648] sm:$0xff]  ;;  %v12422_v47 = vpack.c.bf16 %v11177_v36, %v11176_v33  ;;  %v11250_v33 = vld [vmem:[%s16234_s7 + $0x1018] sm:$0xff]  ;;  %v12166_v36 = vpack.c.bf16 %v10923_v27, %v10922_v23  ;;  %v12484_v27 = vpack.c.bf16 %v11257_v18, %v11256_v9  ;;  %v10987_v9 = vld [vmem:[%s16234_s7 + $0x800] sm:$0xff] }
 0x4f3   : > { %8586 = vmatprep.subr.mxu0 %v13670_v38  ;;  %v12152_v48 = vpack.c.bf16 %v10933_v42, %v10932_v41  ;;  %v10988_v31 = vld [vmem:[%s16234_s7 + $0x808] sm:$0xff] }
 0x4f4   : > { %12383 = vmatpush3.bf16.msra.mxu1 %v12382_v45  ;;  %v11195_v45 = vld [vmem:[%s16234_s7 + $0xe60] sm:$0xff]  ;;  %v12200_v42 = vpack.c.bf16 %v10989_v39, %v10988_v31  ;;  %v11240_v23 = vld [vmem:[%s16234_s7 + $0xfc8] sm:$0xff]  ;;  %v11258_v31 = vld [vmem:[%s16234_s7 + $0x1058] sm:$0xff] }
 0x4f5   : > { %12409 = vmatprep.subr.bf16.mxu1 %v12408_v49  ;;  %v10916_v49 = vld [vmem:[%s16234_s7 + $0x5c8] sm:$0xff]  ;;  %v12424_v52 = vpack.c.bf16 %v11195_v45, %v11194_v44  ;;  %v10973_v45 = vld [vmem:[%s16234_s7 + $0x790] sm:$0xff]  ;;  %v11259_v39 = vld [vmem:[%s16234_s7 + $0x1060] sm:$0xff] }
 0x4f6   : > { %10874 = vmatpush1.msk.msra.mxu0 %vm8270_vm0, %v8265_v25  ;;  %v10934_v25 = vld [vmem:[%s16234_s7 + $0x658] sm:$0xff]  ;;  %v10972_v44 = vld [vmem:[%s16234_s7 + $0x788] sm:$0xff] }
 0x4f7   : > { %8619 = vmatmul.mubr.f32.vlgmr.msra.gmra.mrb[14].mxu0 %v15174_v0  ;;  %12137 = vmatprep.subr.bf16.mxu0 %v12136_v24  ;;  %v10935_v24 = vld [vmem:[%s16234_s7 + $0x660] sm:$0xff]  ;;  %v12202_v51 = vpack.c.bf16 %v10973_v45, %v10972_v44  ;;  %v11242_v44 = vld [vmem:[%s16234_s7 + $0xfd8] sm:$0xff]  ;;  %v12488_v45 = vpack.c.bf16 %v11259_v39, %v11258_v31  ;;  %v9826_v31 = vrot.slane %v14591_v32, 3  ;;  %v8789_v39 = vrot.slane %v15004_v26, 1 }
 0x4f8   : > { %9600 = vmatmul.mubr.f32.vlgmr.msra.gmra.mrb[26].mxu1 %v9307_v3  ;;  %12139 = vmatpush3.bf16.msra.mxu0 %v12138_v60  ;;  %v12154_v60 = vpack.c.bf16 %v10917_v50, %v10916_v49  ;;  %v12156_v53 = vpack.c.bf16 %v10935_v24, %v10934_v25  ;;  %v11181_v3 = vld [vmem:[%s16234_s7 + $0xdf0] sm:$0xff]  ;;  %v10990_v49 = vld [vmem:[%s16234_s7 + $0x818] sm:$0xff]  ;;  %v10991_v50 = vld [vmem:[%s16234_s7 + $0x820] sm:$0xff]  ;;  %v8782_v25 = vrot.slane %v14605_v43, 1 }
 0x4f9   : > { %8938 = vmatprep.mubr.f32.mxu0 %v8783_v7  ;;  %12411 = vmatpush3.bf16.msra.mxu1 %v12410_v62  ;;  %v10918_v62 = vld [vmem:[%s16234_s7 + $0x5d8] sm:$0xff] }
 0x4fa   : > { %9910 = vmatprep.mubr.f32.mxu1 %v9823_v14  ;;  %12141 = vmatprep.subr.bf16.mxu0 %v12140_v61  ;;  %v10936_v61 = vld [vmem:[%s16234_s7 + $0x668] sm:$0xff]  ;;  %v12158_v7 = vpack.c.bf16 %v10919_v63, %v10918_v62  ;;  %v10921_v14 = vld [vmem:[%s16234_s7 + $0x5f0] sm:$0xff] }
 0x4fb   : > { %12413 = vmatprep.subr.bf16.mxu1 %v12412_v10  ;;  %v12430_v10 = vpack.c.bf16 %v11181_v3, %v11180_v1  ;;  %v12160_v11 = vpack.c.bf16 %v10937_v4, %v10936_v61  ;;  %v12162_v20 = vpack.c.bf16 %v10921_v14, %v10920_v12  ;;  %v11237_v62 = vld [vmem:[%s16234_s7 + $0xfb0] sm:$0xff]  ;;  %v10992_v63 = vld [vmem:[%s16234_s7 + $0x828] sm:$0xff]  ;;  %v11255_v61 = vld [vmem:[%s16234_s7 + $0x1040] sm:$0xff]  ;;  %v9827_v4 = vrot.slane %v14438_v8, 3 }
 0x4fc   : > { %12143 = vmatpush3.bf16.msra.mxu0 %v12142_v15  ;;  %v11182_v15 = vld [vmem:[%s16234_s7 + $0xdf8] sm:$0xff]  ;;  %v10993_v1 = vld [vmem:[%s16234_s7 + $0x830] sm:$0xff] }
 0x4fd   : > { %12415 = vmatpush3.bf16.msra.mxu1 %v12414_v16  ;;  %12145 = vmatprep.subr.bf16.mxu0 %v12144_v17  ;;  %v12432_v16 = vpack.c.bf16 %v11199_v6, %v11198_v5  ;;  %v11183_v17 = vld [vmem:[%s16234_s7 + $0xe00] sm:$0xff]  ;;  %v12206_v5 = vpack.c.bf16 %v10975_v56, %v10974_v58  ;;  %v11238_v12 = vld [vmem:[%s16234_s7 + $0xfb8] sm:$0xff]  ;;  %v11244_v58 = vld [vmem:[%s16234_s7 + $0xfe8] sm:$0xff] }
 0x4fe   : > { %12417 = vmatprep.subr.bf16.mxu1 %v12416_v37  ;;  %v11201_v37 = vld [vmem:[%s16234_s7 + $0xe90] sm:$0xff]  ;;  %v12434_v29 = vpack.c.bf16 %v11183_v17, %v11182_v15  ;;  %v11239_v15 = vld [vmem:[%s16234_s7 + $0xfc0] sm:$0xff] }
 0x4ff   : > { %v10995_v17 = vld [vmem:[%s16234_s7 + $0x840] sm:$0xff] }
 0x500   : > { %12147 = vmatpush3.bf16.msra.mxu0 %v12146_v28  ;;  %v11184_v28 = vld [vmem:[%s16234_s7 + $0xe08] sm:$0xff] }
 0x501   : > { %12419 = vmatpush3.bf16.msra.mxu1 %v12418_v13  ;;  %12149 = vmatprep.subr.bf16.mxu0 %v12148_v30  ;;  %v12436_v13 = vpack.c.bf16 %v11201_v37, %v11200_v19  ;;  %v11185_v30 = vld [vmem:[%s16234_s7 + $0xe10] sm:$0xff]  ;;  %v12482_v37 = vpack.c.bf16 %v11239_v15, %v11238_v12 }
 0x502   : > { %12421 = vmatprep.subr.bf16.mxu1 %v12420_v35  ;;  %v11251_v35 = vld [vmem:[%s16234_s7 + $0x1020] sm:$0xff]  ;;  %v12438_v41 = vpack.c.bf16 %v11185_v30, %v11184_v28  ;;  %v11241_v28 = vld [vmem:[%s16234_s7 + $0xfd0] sm:$0xff] }
 0x503   : > { %v10997_v30 = vld [vmem:[%s16234_s7 + $0x850] sm:$0xff] }
 0x504   : > { %12151 = vmatpush3.bf16.msra.mxu0 %v12150_v46  ;;  %v12472_v46 = vpack.c.bf16 %v11251_v35, %v11250_v33  ;;  %v12486_v35 = vpack.c.bf16 %v11241_v28, %v11240_v23  ;;  %v11265_v12 = vld [vmem:[%s16234_s7 + $0x1090] sm:$0xff]  ;;  %v8786_v28 = vrot.slane %v14995_v21, 1 }
 0x505   : > { %12423 = vmatpush3.bf16.msra.mxu1 %v12422_v47  ;;  %12153 = vmatprep.subr.bf16.mxu0 %v12152_v48  ;;  %v11234_v47 = vld [vmem:[%s16234_s7 + $0xf98] sm:$0xff]  ;;  %v11235_v48 = vld [vmem:[%s16234_s7 + $0xfa0] sm:$0xff]  ;;  %v11005_v23 = vld [vmem:[%s16234_s7 + $0x890] sm:$0xff] }
 0x506   : > { %12425 = vmatprep.subr.bf16.mxu1 %v12424_v52  ;;  %v11252_v52 = vld [vmem:[%s16234_s7 + $0x1028] sm:$0xff]  ;;  %v12474_v24 = vpack.c.bf16 %v11235_v48, %v11234_v47  ;;  %v10998_v47 = vld [vmem:[%s16234_s7 + $0x858] sm:$0xff]  ;;  %v10999_v48 = vld [vmem:[%s16234_s7 + $0x860] sm:$0xff] }
 0x507   : > { %v12476_v3 = vpack.c.bf16 %v11253_v55, %v11252_v52  ;;  %v12220_v55 = vpack.c.bf16 %v10999_v48, %v10998_v47  ;;  %v11013_v47 = vld [vmem:[%s16234_s7 + $0x8d0] sm:$0xff] }
 0x508   : > { %12155 = vmatpush3.bf16.msra.mxu0 %v12154_v60  ;;  %v11236_v60 = vld [vmem:[%s16234_s7 + $0xfa8] sm:$0xff] }
 0x509   : > { %12427 = vmatpush3.bf16.msra.mxu1 %v12426_v59  ;;  %12157 = vmatprep.subr.bf16.mxu0 %v12156_v53  ;;  %v9822_v59 = vrot.slane %v14367_v34, 3  ;;  %v12204_v53 = vpack.c.bf16 %v10991_v50, %v10990_v49  ;;  %v11254_v34 = vld [vmem:[%s16234_s7 + $0x1038] sm:$0xff]  ;;  %v12478_v6 = vpack.c.bf16 %v11237_v62, %v11236_v60  ;;  %v11260_v49 = vld [vmem:[%s16234_s7 + $0x1068] sm:$0xff]  ;;  %v11261_v50 = vld [vmem:[%s16234_s7 + $0x1070] sm:$0xff] }
 0x50a   : > { %12429 = vmatprep.subr.bf16.mxu1 %v12428_v2  ;;  %v8787_v2 = vrot.slane %v14811_v40, 1  ;;  %v12480_v14 = vpack.c.bf16 %v11255_v61, %v11254_v34  ;;  %v12492_v56 = vpack.c.bf16 %v11261_v50, %v11260_v49  ;;  %v11245_v60 = vld [vmem:[%s16234_s7 + $0xff0] sm:$0xff]  ;;  %v11262_v62 = vld [vmem:[%s16234_s7 + $0x1078] sm:$0xff]  ;;  %v10984_v34 = vld [vmem:[%s16234_s7 + $0x7e8] sm:$0xff] }
 0x50b   : > { %v10985_v61 = vld [vmem:[%s16234_s7 + $0x7f0] sm:$0xff]  ;;  %v11014_v49 = vld [vmem:[%s16234_s7 + $0x8d8] sm:$0xff]  ;;  %v11015_v50 = vld [vmem:[%s16234_s7 + $0x8e0] sm:$0xff] }
 0x50c   : > { %12159 = vmatpush3.bf16.msra.mxu0 %v12158_v7  ;;  %v12208_v7 = vpack.c.bf16 %v10993_v1, %v10992_v63  ;;  %v11263_v63 = vld [vmem:[%s16234_s7 + $0x1080] sm:$0xff] }
 0x50d   : > { %12431 = vmatpush3.bf16.msra.mxu1 %v12430_v10  ;;  %12161 = vmatprep.subr.bf16.mxu0 %v12160_v11  ;;  %v10976_v10 = vld [vmem:[%s16234_s7 + $0x7a8] sm:$0xff]  ;;  %v10977_v11 = vld [vmem:[%s16234_s7 + $0x7b0] sm:$0xff] }
 0x50e   : > { %12433 = vmatprep.subr.bf16.mxu1 %v12432_v16  ;;  %v10994_v16 = vld [vmem:[%s16234_s7 + $0x838] sm:$0xff]  ;;  %v12210_v19 = vpack.c.bf16 %v10977_v11, %v10976_v10  ;;  %v11003_v10 = vld [vmem:[%s16234_s7 + $0x880] sm:$0xff]  ;;  %v11264_v11 = vld [vmem:[%s16234_s7 + $0x1088] sm:$0xff] }
 0x50f   : > { %v12500_v18 = vpack.c.bf16 %v11265_v12, %v11264_v11  ;;  %v8788_v11 = vrot.slane %v15174_v0, 1 }
 0x510   : > { %12163 = vmatpush3.bf16.msra.mxu0 %v12162_v20  ;;  %v12212_v20 = vpack.c.bf16 %v10995_v17, %v10994_v16  ;;  %v10986_v17 = vld [vmem:[%s16234_s7 + $0x7f8] sm:$0xff] }
 0x511   : > { %12435 = vmatpush3.bf16.msra.mxu1 %v12434_v29  ;;  %12165 = vmatprep.subr.bf16.mxu0 %v12164_v54  ;;  %v10978_v29 = vld [vmem:[%s16234_s7 + $0x7b8] sm:$0xff]  ;;  %v10979_v54 = vld [vmem:[%s16234_s7 + $0x7c0] sm:$0xff] }
 0x512   : > { %12437 = vmatprep.subr.bf16.mxu1 %v12436_v13  ;;  %v10996_v13 = vld [vmem:[%s16234_s7 + $0x848] sm:$0xff]  ;;  %v12214_v33 = vpack.c.bf16 %v10979_v54, %v10978_v29 }
 0x513   : > { %v11004_v54 = vld [vmem:[%s16234_s7 + $0x888] sm:$0xff] }
 0x514   : > { %12167 = vmatpush3.bf16.msra.mxu0 %v12166_v36  ;;  %v12216_v36 = vpack.c.bf16 %v10997_v30, %v10996_v13  ;;  %v11006_v13 = vld [vmem:[%s16234_s7 + $0x898] sm:$0xff]  ;;  %v11007_v30 = vld [vmem:[%s16234_s7 + $0x8a0] sm:$0xff] }
 0x515   : > { %12439 = vmatpush3.bf16.msra.mxu1 %v12438_v41  ;;  %12201 = vmatprep.subr.bf16.mxu0 %v12200_v42  ;;  %v10980_v41 = vld [vmem:[%s16234_s7 + $0x7c8] sm:$0xff]  ;;  %v10981_v42 = vld [vmem:[%s16234_s7 + $0x7d0] sm:$0xff] }
 0x516   : > { %12473 = vmatprep.subr.bf16.mxu1 %v12472_v46  ;;  %v11243_v46 = vld [vmem:[%s16234_s7 + $0xfe0] sm:$0xff] }
 0x517   : > { %8939 = vmatmul.mubr.f32.vlgmr.msra.gmra.mrb[16].mxu0 %v8782_v25  ;;  %v12490_v52 = vpack.c.bf16 %v11243_v46, %v11242_v44  ;;  %v10982_v25 = vld [vmem:[%s16234_s7 + $0x7d8] sm:$0xff]  ;;  %v11011_v44 = vld [vmem:[%s16234_s7 + $0x8c0] sm:$0xff]  ;;  %v11012_v46 = vld [vmem:[%s16234_s7 + $0x8c8] sm:$0xff] }
 0x518   : > { %9911 = vmatmul.mubr.f32.vlgmr.msra.gmra.mrb[28].mxu1 %v9822_v59  ;;  %12203 = vmatpush3.bf16.msra.mxu0 %v12202_v51  ;;  %v12218_v51 = vpack.c.bf16 %v10981_v42, %v10980_v41  ;;  %v11000_v59 = vld [vmem:[%s16234_s7 + $0x868] sm:$0xff]  ;;  %v11010_v42 = vld [vmem:[%s16234_s7 + $0x8b8] sm:$0xff]  ;;  %v12245_v48 = vpack.c.bf16 %v11013_v47, %v11012_v46 }
 0x519   : > { %9078 = vmatprep.mubr.f32.mxu0 %v8787_v2  ;;  %12475 = vmatpush3.bf16.msra.mxu1 %v12474_v24  ;;  %v10983_v24 = vld [vmem:[%s16234_s7 + $0x7e0] sm:$0xff]  ;;  %v12494_v2 = vpack.c.bf16 %v11245_v60, %v11244_v58  ;;  %v11098_v46 = vld [vmem:[%s16234_s7 + $0xb68] sm:$0xff] }
 0x51a   : > { %10050 = vmatprep.mubr.f32.mxu1 %v9827_v4  ;;  %12205 = vmatprep.subr.bf16.mxu0 %v12204_v53  ;;  %v11001_v53 = vld [vmem:[%s16234_s7 + $0x870] sm:$0xff]  ;;  %v12222_v1 = vpack.c.bf16 %v10983_v24, %v10982_v25  ;;  %v11246_v4 = vld [vmem:[%s16234_s7 + $0xff8] sm:$0xff]  ;;  %v11016_v25 = vld [vmem:[%s16234_s7 + $0x8e8] sm:$0xff] }
 0x51b   : > { %12477 = vmatprep.subr.bf16.mxu1 %v12476_v3  ;;  %v12224_v3 = vpack.c.bf16 %v11001_v53, %v11000_v59  ;;  %v11017_v24 = vld [vmem:[%s16234_s7 + $0x8f0] sm:$0xff] }
 0x51c   : > { %12207 = vmatpush3.bf16.msra.mxu0 %v12206_v5  ;;  %v12496_v5 = vpack.c.bf16 %v11263_v63, %v11262_v62  ;;  %v12251_v53 = vpack.c.bf16 %v11017_v24, %v11016_v25  ;;  %v11018_v62 = vld [vmem:[%s16234_s7 + $0x8f8] sm:$0xff]  ;;  %v11019_v63 = vld [vmem:[%s16234_s7 + $0x900] sm:$0xff] }
 0x51d   : > { %12479 = vmatpush3.bf16.msra.mxu1 %v12478_v6  ;;  %12209 = vmatprep.subr.bf16.mxu0 %v12208_v7  ;;  %v11247_v6 = vld [vmem:[%s16234_s7 + $0x1000] sm:$0xff]  ;;  %v11002_v7 = vld [vmem:[%s16234_s7 + $0x878] sm:$0xff] }
 0x51e   : > { %12481 = vmatprep.subr.bf16.mxu1 %v12480_v14  ;;  %v12226_v14 = vpack.c.bf16 %v10985_v61, %v10984_v34  ;;  %v12498_v15 = vpack.c.bf16 %v11247_v6, %v11246_v4  ;;  %v12228_v16 = vpack.c.bf16 %v11003_v10, %v11002_v7  ;;  %v11087_v34 = vld [vmem:[%s16234_s7 + $0xb10] sm:$0xff]  ;;  %v11088_v61 = vld [vmem:[%s16234_s7 + $0xb18] sm:$0xff]  ;;  %v11105_v4 = vld [vmem:[%s16234_s7 + $0xba0] sm:$0xff] }
 0x51f   : > { %v11020_v6 = vld [vmem:[%s16234_s7 + $0x908] sm:$0x1]  ;;  %v12322_v10 = vpack.c.bf16 %v11088_v61, %v11087_v34  ;;  %v11101_v34 = vld [vmem:[%s16234_s7 + $0xb80] sm:$0xff] }
 0x520   : > { %12211 = vmatpush3.bf16.msra.mxu0 %v12210_v19  ;;  %v11248_v19 = vld [vmem:[%s16234_s7 + $0x1008] sm:$0xff] }
 0x521   : > { %12483 = vmatpush3.bf16.msra.mxu1 %v12482_v37  ;;  %12213 = vmatprep.subr.bf16.mxu0 %v12212_v20  ;;  %v11249_v37 = vld [vmem:[%s16234_s7 + $0x1010] sm:$0xff]  ;;  %v12230_v20 = vpack.c.bf16 %v10987_v9, %v10986_v17  ;;  %v11108_v9 = vld [vmem:[%s16234_s7 + $0xbb8] sm:$0xff] }
 0x522   : > { %12485 = vmatprep.subr.bf16.mxu1 %v12484_v27  ;;  %v12502_v29 = vpack.c.bf16 %v11249_v37, %v11248_v19  ;;  %v12233_v27 = vpack.c.bf16 %v11005_v23, %v11004_v54  ;;  %v11107_v17 = vld [vmem:[%s16234_s7 + $0xbb0] sm:$0xff] }
 0x523   : > { %v12328_v19 = vpack.c.bf16 %v11108_v9, %v11107_v17  ;;  %v11091_v37 = vld [vmem:[%s16234_s7 + $0xb30] sm:$0xff]  ;;  %v10198_v9 = vld [vmem:[%s537_s1] sm:$0x1]  ;;  %s528_s1 = scalar_lea.vmem [#allocation3], %s16141_s28 }
 0x524   : > { %12215 = vmatpush3.bf16.msra.mxu0 %v12214_v33  ;;  %v12236_v33 = vpack.c.bf16 %v11007_v30, %v11006_v13  ;;  %v11111_v13 = vld [vmem:[%s16234_s7 + $0xbd0] sm:$0xff]  ;;  %v11112_v30 = vld [vmem:[%s16234_s7 + $0xbd8] sm:$0xff]  ;;  %s10568_s5 = sshll.u32 %s528_s1, 4  ;;  %s16152_s5 = int_to_ptr.vmem [resolvable:$true] %s10568_s5 }
 0x525   : > { %12487 = vmatpush3.bf16.msra.mxu1 %v12486_v35  ;;  %12217 = vmatprep.subr.bf16.mxu0 %v12216_v36  ;;  %v11008_v35 = vld [vmem:[%s16234_s7 + $0x8a8] sm:$0xff]  ;;  %v11009_v36 = vld [vmem:[%s16234_s7 + $0x8b0] sm:$0xff]  ;;  %s12828_s26 = scalar_lea.vmem %s16152_s5, 16  ;;  %p12835_p0 = scmp.lt.s32.totalorder %s16152_s5, %s12833_s20 }
 0x526   : > { %12489 = vmatprep.subr.bf16.mxu1 %v12488_v45  ;;  %v12239_v41 = vpack.c.bf16 %v11009_v36, %v11008_v35  ;;  %v12242_v45 = vpack.c.bf16 %v11011_v44, %v11010_v42  ;;  %v11096_v35 = vld [vmem:[%s16234_s7 + $0xb58] sm:$0xff]  ;;  %v11113_v36 = vld [vmem:[%s16234_s7 + $0xbe0] sm:$0xff]  ;;  %p12829_p11 = scmp.ne.s32.totalorder %s16152_s5, %s12828_s26 }
 0x528   : > { %12219 = vmatpush3.bf16.msra.mxu0 %v12218_v51  ;;  %p12830_p12 = pnand %p12829_p11, %p13062_p5 }
 0x529   : > { %12491 = vmatpush3.bf16.msra.mxu1 %v12490_v52  ;;  %12221 = vmatprep.subr.bf16.mxu0 %v12220_v55  ;;  %v12248_v52 = vpack.c.bf16 %v11015_v50, %v11014_v49  ;;  %v11116_v49 = vld [vmem:[%s16234_s7 + $0xbf8] sm:$0xff] }
 0x52a   : > { %12493 = vmatprep.subr.bf16.mxu1 %v12492_v56  ;;  %p12831_p13 = pneg %p12830_p12 }
 0x52c   : > { %12223 = vmatpush3.bf16.msra.mxu0 %v12222_v1  ;;  %v12254_v1 = vpack.c.bf16 %v11019_v63, %v11018_v62  ;;  %v11117_v63 = vld [vmem:[%s16234_s7 + $0xc00] sm:$0xff] }
 0x52d   : > { %12495 = vmatpush3.bf16.msra.mxu1 %v12494_v2  ;;  %12225 = vmatprep.subr.bf16.mxu0 %v12224_v3  ;;  %v11103_v2 = vld [vmem:[%s16234_s7 + $0xb90] sm:$0xff]  ;;  %v11104_v3 = vld [vmem:[%s16234_s7 + $0xb98] sm:$0xff] }
 0x52e   : > { %12497 = vmatprep.subr.bf16.mxu1 %v12496_v5  ;;  %v11106_v5 = vld [vmem:[%s16234_s7 + $0xba8] sm:$0xff]  ;;  %v12320_v7 = vpack.c.bf16 %v11104_v3, %v11103_v2 }
 0x52f   : > { %v12324_v12 = vpack.c.bf16 %v11106_v5, %v11105_v4  ;;  %v11151_v4 = vld [vmem:[%s16234_s7 + $0xd10] sm:$0xff]  ;;  %v11152_v5 = vld [vmem:[%s16234_s7 + $0xd18] sm:$0xff] }
 0x530   : > { %12227 = vmatpush3.bf16.msra.mxu0 %v12226_v14  ;;  %v11089_v14 = vld [vmem:[%s16234_s7 + $0xb20] sm:$0xff] }
 0x531   : > { %12499 = vmatpush3.bf16.msra.mxu1 %v12498_v15  ;;  %12229 = vmatprep.subr.bf16.mxu0 %v12228_v16  ;;  %v11090_v15 = vld [vmem:[%s16234_s7 + $0xb28] sm:$0xff]  ;;  %v9306_v16 = vrot.slane %v14438_v8, 2  ;;  %v11092_v8 = vld [vmem:[%s16234_s7 + $0xb38] sm:$0xff] }
 0x532   : > { %12501 = vmatprep.subr.bf16.mxu1 %v12500_v18  ;;  %v12326_v18 = vpack.c.bf16 %v11090_v15, %v11089_v14  ;;  %v12330_v54 = vpack.c.bf16 %v11092_v8, %v11091_v37  ;;  %v11156_v15 = vld [vmem:[%s16234_s7 + $0xd38] sm:$0xff]  ;;  %v11159_v8 = vld [vmem:[%s16234_s7 + $0xd50] sm:$0xff] }
 0x534   : > { %12231 = vmatpush3.bf16.msra.mxu0 %v12230_v20  ;;  %v11109_v20 = vld [vmem:[%s16234_s7 + $0xbc0] sm:$0xff] }
 0x535   : > { %12503 = vmatpush3.bf16.msra.mxu1 %v12502_v29  ;;  %12232 = vmatprep.subr.bf16.mxu0 %v12935_v22  ;;  %v11110_v29 = vld [vmem:[%s16234_s7 + $0xbc8] sm:$0xff] }
 0x536   : > { %11906 = vmatprep.subr.mxu1 %v13670_v38  ;;  %v12332_v23 = vpack.c.bf16 %v11110_v29, %v11109_v20  ;;  %v11160_v20 = vld [vmem:[%s16234_s7 + $0xd58] sm:$0xff] }
 0x537   : > { %9079 = vmatmul.mubr.f32.vlgmr.msra.gmra.mrb[18].mxu0 %v8786_v28  ;;  %v11094_v28 = vld [vmem:[%s16234_s7 + $0xb48] sm:$0xff]  ;;  %v12397_v29 = vpack.c.bf16 %v11160_v20, %v11159_v8 }
 0x538   : > { %10051 = vmatmul.mubr.f32.vlgmr.msra.gmra.mrb[30].mxu1 %v9826_v31  ;;  %12234 = vmatpush1.bf16.msra.mxu0 %v12233_v27  ;;  %v11093_v27 = vld [vmem:[%s16234_s7 + $0xb40] sm:$0xff] }
 0x539   : > { %11022 = vmatprep.mubr.msk.f32.mxu0 %vm8266_vm15, %v8789_v39  ;;  %12235 = vmatprep.subr.bf16.mxu0 %v12935_v22  ;;  %v12334_v31 = vpack.c.bf16 %v11094_v28, %v11093_v27  ;;  %v12336_v39 = vpack.c.bf16 %v11112_v30, %v11111_v13 }
 0x53a   : > { %11908 = vmatprep.mubr.msk.f32.mxu1 %vm12936_vm1, %v13670_v38 }
 0x53c   : > { %12237 = vmatpush1.bf16.msra.mxu0 %v12236_v33  ;;  %v11095_v33 = vld [vmem:[%s16234_s7 + $0xb50] sm:$0xff] }
 0x53d   : > { %12238 = vmatprep.subr.bf16.mxu0 %v12935_v22  ;;  %v12338_v42 = vpack.c.bf16 %v11096_v35, %v11095_v33  ;;  %v11163_v33 = vld [vmem:[%s16234_s7 + $0xd70] sm:$0xff]  ;;  %v11164_v35 = vld [vmem:[%s16234_s7 + $0xd78] sm:$0xff] }
 0x540   : > { %12240 = vmatpush1.bf16.msra.mxu0 %v12239_v41  ;;  %v11114_v41 = vld [vmem:[%s16234_s7 + $0xbe8] sm:$0xff] }
 0x541   : > { %12241 = vmatprep.subr.bf16.mxu0 %v12935_v22  ;;  %v12340_v44 = vpack.c.bf16 %v11114_v41, %v11113_v36 }
 0x544   : > { %12243 = vmatpush1.bf16.msra.mxu0 %v12242_v45  ;;  %v11097_v45 = vld [vmem:[%s16234_s7 + $0xb60] sm:$0xff] }
 0x545   : > { %12244 = vmatprep.subr.bf16.mxu0 %v12935_v22 }
 0x548   : > { %12246 = vmatpush1.bf16.msra.mxu0 %v12245_v48  ;;  %v11357_v51 = vpop.f32.mrb[6].mxu0  ;;  %v11115_v48 = vld [vmem:[%s16234_s7 + $0xbf0] sm:$0xff] }
 0x549   : > { %v11358_v55 = vpop.f32.mrb[7].mxu0  ;;  %12247 = vmatprep.subr.bf16.mxu0 %v12935_v22  ;;  %v12344_v24 = vpack.c.bf16 %v11116_v49, %v11115_v48  ;;  %v11219_v48 = vld [vmem:[%s16234_s7 + $0xf20] sm:$0xff]  ;;  %v11202_v49 = vld [vmem:[%s16234_s7 + $0xe98] sm:$0xff] }
 0x54a   : > { %v15586_v58 = vadd.f32 %v11358_v55, %v11357_v51  ;;  %v11497_v56 = vpop.f32.mrb[18].mxu1  ;;  %v12342_v55 = vpack.c.bf16 %v11098_v46, %v11097_v45  ;;  %v11166_v45 = vld [vmem:[%s16234_s7 + $0xd88] sm:$0xff] }
 0x54b   : > { %v11498_v60 = vpop.f32.mrb[19].mxu1 }
 0x54c   : > { %v15588_v59 = vadd.f32 %v11498_v60, %v11497_v56  ;;  %12249 = vmatpush1.bf16.msra.mxu0 %v12248_v52  ;;  %v11099_v56 = vld [vmem:[%s16234_s7 + $0xb70] sm:$0xff]  ;;  %v11100_v60 = vld [vmem:[%s16234_s7 + $0xb78] sm:$0xff] }
 0x54d   : > { %12250 = vmatprep.subr.bf16.mxu0 %v12935_v22  ;;  %v12346_v2 = vpack.c.bf16 %v11100_v60, %v11099_v56  ;;  %v9309_v56 = vrot.slane %v15174_v0, 2 }
 0x550   : > { %12252 = vmatpush1.bf16.msra.mxu0 %v12251_v53 }
 0x551   : > { %12253 = vmatprep.subr.bf16.mxu0 %v12935_v22 }
 0x554   : > { %12255 = vmatpush1.bf16.msra.mxu0 %v12254_v1  ;;  %v11118_v1 = vld [vmem:[%s16234_s7 + $0xc08] sm:$0xff] }
 0x555   : > { %9116 = vmatprep.subr.mxu0 %v13670_v38  ;;  %v12348_v3 = vpack.c.bf16 %v11118_v1, %v11117_v63  ;;  %v11205_v63 = vld [vmem:[%s16234_s7 + $0xeb0] sm:$0xff]  ;;  %v9825_v1 = vrot.slane %v14408_v57, 3  ;;  %v11207_v57 = vld [vmem:[%s16234_s7 + $0xec0] sm:$0xff] }
 0x558   : > { %11021 = vmatpush1.msk.msra.mxu0 %vm8270_vm0, %v11020_v6  ;;  %v12385_v6 = vpack.c.bf16 %v11152_v5, %v11151_v4  ;;  %v11224_v4 = vld [vmem:[%s16234_s7 + $0xf48] sm:$0xff]  ;;  %v11225_v5 = vld [vmem:[%s16234_s7 + $0xf50] sm:$0xff] }
 0x559   : > { %9149 = vmatmul.mubr.f32.vlgmr.msra.gmra.mrb[14].mxu0 %v8788_v11  ;;  %12321 = vmatprep.subr.bf16.mxu0 %v12320_v7  ;;  %v9305_v7 = vrot.slane %v14591_v32, 2  ;;  %v11154_v11 = vld [vmem:[%s16234_s7 + $0xd28] sm:$0xff]  ;;  %v11155_v32 = vld [vmem:[%s16234_s7 + $0xd30] sm:$0xff] }
 0x55a   : > { %12323 = vmatpush3.bf16.msra.mxu0 %v12322_v10  ;;  %9529 = vmatprep.mubr.f32.mxu0 %v9306_v16  ;;  %v11153_v10 = vld [vmem:[%s16234_s7 + $0xd20] sm:$0xff]  ;;  %v12391_v17 = vpack.c.bf16 %v11156_v15, %v11155_v32 }
 0x55b   : > { %12325 = vmatprep.subr.bf16.mxu0 %v12324_v12  ;;  %v9310_v12 = vrot.slane %v15004_v26, 2  ;;  %v12388_v14 = vpack.c.bf16 %v11154_v11, %v11153_v10  ;;  %v10199_v16 = vld [vmem:[%s16236_s9] sm:$0xff]  ;;  %v11208_v10 = vld [vmem:[%s16234_s7 + $0xec8] sm:$0xff]  ;;  %v11209_v11 = vld [vmem:[%s16234_s7 + $0xed0] sm:$0xff] }
 0x55c   : > { %11907 = vmatpush3.msra.mxu1 %v10199_v16  ;;  %v12454_v32 = vpack.c.bf16 %v11209_v11, %v11208_v10  ;;  %v11210_v16 = vld [vmem:[%s16234_s7 + $0xed8] sm:$0xff]  ;;  %v11272_v11 = vld [vmem:[%s16234_s7 + $0x10c8] sm:$0xff] }
 0x55d   : > { %11909 = vmatmul.mubr.msk.f32.vlgmr.msra.gmra.mrb[32].mxu1 %vm4514_vm14, %v10198_v9  ;;  %12560 = vmatprep.subr.bf16.mxu1 %v12935_v22  ;;  %v11228_v9 = vld [vmem:[%s16234_s7 + $0xf68] sm:$0xff] }
 0x55e   : > { %12327 = vmatpush3.bf16.msra.mxu0 %v12326_v18  ;;  %v11157_v18 = vld [vmem:[%s16234_s7 + $0xd40] sm:$0xff]  ;;  %11919 = vmatprep.mubr.msk.f32.mxu1 %vm12936_vm1, %v13670_v38 }
 0x55f   : > { %12329 = vmatprep.subr.bf16.mxu0 %v12328_v19  ;;  %v11158_v19 = vld [vmem:[%s16234_s7 + $0xd48] sm:$0xff] }
 0x560   : > { %v12394_v37 = vpack.c.bf16 %v11158_v19, %v11157_v18  ;;  %v11229_v18 = vld [vmem:[%s16234_s7 + $0xf70] sm:$0xff] }
 0x561   : > { %v12460_v20 = vpack.c.bf16 %v11229_v18, %v11228_v9  ;;  %v11275_v9 = vld [vmem:[%s16234_s7 + $0x10e0] sm:$0xff]  ;;  %v11292_v18 = vld [vmem:[%s16234_s7 + $0x1168] sm:$0xff] }
 0x562   : > { %12331 = vmatpush3.bf16.msra.mxu0 %v12330_v54  ;;  %v11161_v54 = vld [vmem:[%s16234_s7 + $0xd60] sm:$0xff] }
 0x563   : > { %12333 = vmatprep.subr.bf16.mxu0 %v12332_v23  ;;  %v11162_v23 = vld [vmem:[%s16234_s7 + $0xd68] sm:$0xff] }
 0x566   : > { %12335 = vmatpush3.bf16.msra.mxu0 %v12334_v31  ;;  %v12400_v31 = vpack.c.bf16 %v11162_v23, %v11161_v54  ;;  %v11213_v54 = vld [vmem:[%s16234_s7 + $0xef0] sm:$0xff] }
 0x567   : > { %12337 = vmatprep.subr.bf16.mxu0 %v12336_v39 }
 0x568   : > { %v11392_v47 = vpop.f32.mrb[8].mxu0 }
 0x569   : > { %v11393_v50 = vpop.f32.mrb[9].mxu0 }
 0x56a   : > { %v11394_v51 = vadd.f32 %v11393_v50, %v11392_v47  ;;  %v11567_v52 = vpop.f32.mrb[20].mxu1  ;;  %12339 = vmatpush3.bf16.msra.mxu0 %v12338_v42  ;;  %v12403_v42 = vpack.c.bf16 %v11164_v35, %v11163_v33  ;;  %v11218_v47 = vld [vmem:[%s16234_s7 + $0xf18] sm:$0xff]  ;;  %v11203_v50 = vld [vmem:[%s16234_s7 + $0xea0] sm:$0xff] }
 0x56b   : > { %v11568_v25 = vpop.f32.mrb[21].mxu1  ;;  %12341 = vmatprep.subr.bf16.mxu0 %v12340_v44  ;;  %v11165_v44 = vld [vmem:[%s16234_s7 + $0xd80] sm:$0xff] }
 0x56c   : > { %v15690_v53 = vadd.f32 %v11394_v51, %v15586_v58  ;;  %v15692_v62 = vadd.f32 %v11568_v25, %v11567_v52  ;;  %v11102_v58 = vld [vmem:[%s16234_s7 + $0xb88] sm:$0xff]  ;;  %v12406_v46 = vpack.c.bf16 %v11166_v45, %v11165_v44  ;;  %v11221_v52 = vld [vmem:[%s16234_s7 + $0xf30] sm:$0xff]  ;;  %v12440_v25 = vpack.c.bf16 %v11219_v48, %v11218_v47  ;;  %v11215_v44 = vld [vmem:[%s16234_s7 + $0xf00] sm:$0xff] }
 0x56d   : > { %v12350_v61 = vpack.c.bf16 %v11102_v58, %v11101_v34  ;;  %v11220_v51 = vld [vmem:[%s16234_s7 + $0xf28] sm:$0xff] }
 0x56e   : > { %12343 = vmatpush3.bf16.msra.mxu0 %v12342_v55  ;;  %v11167_v55 = vld [vmem:[%s16234_s7 + $0xd90] sm:$0x1]  ;;  %v12444_v60 = vpack.c.bf16 %v11221_v52, %v11220_v51  ;;  %v11283_v51 = vld [vmem:[%s16234_s7 + $0x1120] sm:$0xff] }
 0x56f   : > { %12345 = vmatprep.subr.bf16.mxu0 %v12344_v24  ;;  %v12442_v24 = vpack.c.bf16 %v11203_v50, %v11202_v49  ;;  %v11216_v49 = vld [vmem:[%s16234_s7 + $0xf08] sm:$0xff]  ;;  %v11282_v50 = vld [vmem:[%s16234_s7 + $0x1118] sm:$0xff] }
 0x572   : > { %12347 = vmatpush3.bf16.msra.mxu0 %v12346_v2  ;;  %v11222_v2 = vld [vmem:[%s16234_s7 + $0xf38] sm:$0xff] }
 0x573   : > { %12349 = vmatprep.subr.bf16.mxu0 %v12348_v3  ;;  %v11223_v3 = vld [vmem:[%s16234_s7 + $0xf40] sm:$0xff] }
 0x574   : > { %v12448_v58 = vpack.c.bf16 %v11223_v3, %v11222_v2  ;;  %v11268_v2 = vld [vmem:[%s16234_s7 + $0x10a8] sm:$0xff]  ;;  %v11269_v3 = vld [vmem:[%s16234_s7 + $0x10b0] sm:$0xff] }
 0x576   : > { %12351 = vmatpush3.bf16.msra.mxu0 %v12350_v61  ;;  %v11206_v61 = vld [vmem:[%s16234_s7 + $0xeb8] sm:$0xff] }
 0x577   : > { %12384 = vmatprep.subr.bf16.mxu0 %v12935_v22 }
 0x579   : > { %9530 = vmatmul.mubr.f32.vlgmr.msra.gmra.mrb[20].mxu0 %v9305_v7  ;;  %v12452_v7 = vpack.c.bf16 %v11225_v5, %v11224_v4  ;;  %v11270_v4 = vld [vmem:[%s16234_s7 + $0x10b8] sm:$0xff]  ;;  %v11288_v5 = vld [vmem:[%s16234_s7 + $0x1148] sm:$0xff] }
 0x57a   : > { %12386 = vmatpush1.bf16.msra.mxu0 %v12385_v6  ;;  %11169 = vmatprep.mubr.msk.f32.mxu0 %vm8266_vm15, %v9310_v12  ;;  %v12450_v6 = vpack.c.bf16 %v11207_v57, %v11206_v61  ;;  %v11226_v12 = vld [vmem:[%s16234_s7 + $0xf58] sm:$0xff]  ;;  %v12510_v61 = vpack.c.bf16 %v11269_v3, %v11268_v2  ;;  %v11307_v3 = vld [vmem:[%s16234_s7 + $0x11e0] sm:$0xff] }
 0x57b   : > { %12387 = vmatprep.subr.bf16.mxu0 %v12935_v22  ;;  %v11306_v2 = vld [vmem:[%s16234_s7 + $0x11d8] sm:$0xff] }
 0x57e   : > { %12389 = vmatpush1.bf16.msra.mxu0 %v12388_v14  ;;  %v11227_v14 = vld [vmem:[%s16234_s7 + $0xf60] sm:$0xff] }
 0x57f   : > { %12390 = vmatprep.subr.bf16.mxu0 %v12935_v22  ;;  %v12456_v15 = vpack.c.bf16 %v11227_v14, %v11226_v12  ;;  %v11273_v12 = vld [vmem:[%s16234_s7 + $0x10d0] sm:$0xff]  ;;  %v11290_v14 = vld [vmem:[%s16234_s7 + $0x1158] sm:$0xff] }
 0x582   : > { %12392 = vmatpush1.bf16.msra.mxu0 %v12391_v17  ;;  %v11211_v17 = vld [vmem:[%s16234_s7 + $0xee0] sm:$0xff] }
 0x583   : > { %12393 = vmatprep.subr.bf16.mxu0 %v12935_v22 }
 0x586   : > { %12395 = vmatpush1.bf16.msra.mxu0 %v12394_v37  ;;  %v12458_v37 = vpack.c.bf16 %v11211_v17, %v11210_v16  ;;  %v11274_v17 = vld [vmem:[%s16234_s7 + $0x10d8] sm:$0xff] }
 0x587   : > { %12396 = vmatprep.subr.bf16.mxu0 %v12935_v22 }
 0x588   : > { %v11427_v27 = vpop.f32.mrb[10].mxu0 }
 0x589   : > { %v11428_v28 = vpop.f32.mrb[11].mxu0 }
 0x58a   : > { %v11429_v13 = vadd.f32 %v11428_v28, %v11427_v27  ;;  %v11637_v30 = vpop.f32.mrb[22].mxu1  ;;  %12398 = vmatpush1.bf16.msra.mxu0 %v12397_v29  ;;  %v11212_v29 = vld [vmem:[%s16234_s7 + $0xee8] sm:$0xff]  ;;  %v11230_v28 = vld [vmem:[%s16234_s7 + $0xf78] sm:$0xff] }
 0x58b   : > { %v11638_v39 = vpop.f32.mrb[23].mxu1  ;;  %12399 = vmatprep.subr.bf16.mxu0 %v12935_v22  ;;  %v12462_v33 = vpack.c.bf16 %v11213_v54, %v11212_v29  ;;  %v11277_v29 = vld [vmem:[%s16234_s7 + $0x10f0] sm:$0xff]  ;;  %v11294_v54 = vld [vmem:[%s16234_s7 + $0x1178] sm:$0xff] }
 0x58c   : > { %v15771_v36 = vadd.f32 %v11429_v13, %v15690_v53  ;;  %v15773_v41 = vadd.f32 %v11638_v39, %v11637_v30  ;;  %v11204_v53 = vld [vmem:[%s16234_s7 + $0xea8] sm:$0xff]  ;;  %v11231_v13 = vld [vmem:[%s16234_s7 + $0xf80] sm:$0xff] }
 0x58d   : > { %v12446_v34 = vpack.c.bf16 %v11205_v63, %v11204_v53  ;;  %v12464_v35 = vpack.c.bf16 %v11231_v13, %v11230_v28  ;;  %v9824_v63 = vrot.slane %v14605_v43, 3  ;;  %v11287_v43 = vld [vmem:[%s16234_s7 + $0x1140] sm:$0xff] }
 0x58e   : > { %12401 = vmatpush1.bf16.msra.mxu0 %v12400_v31 }
 0x58f   : > { %12402 = vmatprep.subr.bf16.mxu0 %v12935_v22 }
 0x592   : > { %12404 = vmatpush1.bf16.msra.mxu0 %v12403_v42  ;;  %v11214_v42 = vld [vmem:[%s16234_s7 + $0xef8] sm:$0xff] }
 0x593   : > { %12405 = vmatprep.subr.bf16.mxu0 %v12935_v22  ;;  %v12466_v47 = vpack.c.bf16 %v11215_v44, %v11214_v42  ;;  %v11296_v42 = vld [vmem:[%s16234_s7 + $0x1188] sm:$0xff]  ;;  %v11297_v44 = vld [vmem:[%s16234_s7 + $0x1190] sm:$0xff] }
 0x596   : > { %12407 = vmatpush1.bf16.msra.mxu0 %v12406_v46  ;;  %v11233_v46 = vld [vmem:[%s16234_s7 + $0xf90] sm:$0xff] }
 0x597   : > { %9637 = vmatprep.subr.mxu0 %v13670_v38 }
 0x59a   : > { %11168 = vmatpush1.msk.msra.mxu0 %vm8270_vm0, %v11167_v55  ;;  %v12504_v55 = vpack.c.bf16 %v11283_v51, %v11282_v50  ;;  %v11299_v50 = vld [vmem:[%s16234_s7 + $0x11a0] sm:$0xff] }
 0x59b   : > { %9670 = vmatmul.mubr.f32.vlgmr.msra.gmra.mrb[14].mxu0 %v9309_v56  ;;  %12441 = vmatprep.subr.bf16.mxu0 %v12440_v25  ;;  %v11266_v25 = vld [vmem:[%s16234_s7 + $0x1098] sm:$0xff]  ;;  %v11284_v56 = vld [vmem:[%s16234_s7 + $0x1128] sm:$0xff] }
 0x59c   : > { %12443 = vmatpush3.bf16.msra.mxu0 %v12442_v24  ;;  %9980 = vmatprep.mubr.f32.mxu0 %v9825_v1  ;;  %v11267_v24 = vld [vmem:[%s16234_s7 + $0x10a0] sm:$0xff] }
 0x59d   : > { %12445 = vmatprep.subr.bf16.mxu0 %v12444_v60  ;;  %v11285_v60 = vld [vmem:[%s16234_s7 + $0x1130] sm:$0xff]  ;;  %v12506_v53 = vpack.c.bf16 %v11267_v24, %v11266_v25  ;;  %v9831_v24 = vrot.slane %v15004_v26, 3  ;;  %v11304_v26 = vld [vmem:[%s16234_s7 + $0x11c8] sm:$0xff] }
 0x59e   : > { %v12508_v1 = vpack.c.bf16 %v11285_v60, %v11284_v56  ;;  %v11301_v25 = vld [vmem:[%s16234_s7 + $0x11b0] sm:$0xff]  ;;  %v11303_v60 = vld [vmem:[%s16234_s7 + $0x11c0] sm:$0xff] }
 0x5a0   : > { %12447 = vmatpush3.bf16.msra.mxu0 %v12446_v34  ;;  %v9829_v34 = vrot.slane %v14811_v40, 3  ;;  %v11271_v40 = vld [vmem:[%s16234_s7 + $0x10c0] sm:$0xff] }
 0x5a1   : > { %12449 = vmatprep.subr.bf16.mxu0 %v12448_v58  ;;  %v11286_v58 = vld [vmem:[%s16234_s7 + $0x1138] sm:$0xff] }
 0x5a2   : > { %v12512_v57 = vpack.c.bf16 %v11287_v43, %v11286_v58  ;;  %v11308_v58 = vld [vmem:[%s16234_s7 + $0x11e8] sm:$0xff]  ;;  %v11309_v43 = vld [vmem:[%s16234_s7 + $0x11f0] sm:$0xff] }
 0x5a4   : > { %12451 = vmatpush3.bf16.msra.mxu0 %v12450_v6  ;;  %v11289_v6 = vld [vmem:[%s16234_s7 + $0x1150] sm:$0xff] }
 0x5a5   : > { %12453 = vmatprep.subr.bf16.mxu0 %v12452_v7  ;;  %v12514_v7 = vpack.c.bf16 %v11271_v40, %v11270_v4  ;;  %v12516_v10 = vpack.c.bf16 %v11289_v6, %v11288_v5  ;;  %v12552_v6 = vpack.c.bf16 %v11309_v43, %v11308_v58  ;;  %v10278_v58 = vld [vmem:[%s16238_s11 + $0x18] sm:$0xff] }
 0x5a8   : > { %v11462_v19 = vpop.f32.mrb[12].mxu0  ;;  %12455 = vmatpush3.bf16.msra.mxu0 %v12454_v32  ;;  %v11291_v32 = vld [vmem:[%s16234_s7 + $0x1160] sm:$0xff] }
 0x5a9   : > { %v11463_v8 = vpop.f32.mrb[13].mxu0  ;;  %12457 = vmatprep.subr.bf16.mxu0 %v12456_v15  ;;  %v12518_v15 = vpack.c.bf16 %v11273_v12, %v11272_v11  ;;  %v12520_v16 = vpack.c.bf16 %v11291_v32, %v11290_v14  ;;  %v11311_v11 = vld [vmem:[%s16234_s7 + $0x1200] sm:$0xff] }
 0x5aa   : > { %v11464_v23 = vadd.f32 %v11463_v8, %v11462_v19  ;;  %v11672_v27 = vpop.f32.mrb[24].mxu1  ;;  %v11293_v19 = vld [vmem:[%s16234_s7 + $0x1170] sm:$0xff] }
 0x5ab   : > { %v11673_v30 = vpop.f32.mrb[25].mxu1  ;;  %v12524_v8 = vpack.c.bf16 %v11293_v19, %v11292_v18  ;;  %v8120_v18 = vld [vmem:[%s16235_s8] sm:$0x1] }
 0x5ac   : > { %v15869_v31 = vadd.f32 %v11464_v23, %v15771_v36  ;;  %v11674_v39 = vadd.f32 %v11673_v30, %v11672_v27  ;;  %12459 = vmatpush3.bf16.msra.mxu0 %v12458_v37  ;;  %v11232_v36 = vld [vmem:[%s16234_s7 + $0xf88] sm:$0xff]  ;;  %v12522_v37 = vpack.c.bf16 %v11275_v9, %v11274_v17  ;;  %v11295_v23 = vld [vmem:[%s16234_s7 + $0x1180] sm:$0xff] }
 0x5ad   : > { %12461 = vmatprep.subr.bf16.mxu0 %v12460_v20  ;;  %v12468_v48 = vpack.c.bf16 %v11233_v46, %v11232_v36  ;;  %v11276_v20 = vld [vmem:[%s16234_s7 + $0x10e8] sm:$0xff]  ;;  %v12532_v46 = vpack.c.bf16 %v11297_v44, %v11296_v42  ;;  %v10282_v44 = vld [vmem:[%s16238_s11 + $0x38] sm:$0xff] }
 0x5ae   : > { %v15878_v45 = vadd.f32 %v11674_v39, %v15773_v41  ;;  %v11217_v41 = vld [vmem:[%s16234_s7 + $0xf10] sm:$0xff]  ;;  %v12526_v13 = vpack.c.bf16 %v11277_v29, %v11276_v20  ;;  %v12528_v39 = vpack.c.bf16 %v11295_v23, %v11294_v54  ;;  %v12588_v54 = vadd.f32 %v15869_v31, %v8120_v18 }
 0x5af   : > { %v12470_v52 = vpack.c.bf16 %v11217_v41, %v11216_v49  ;;  %v11298_v41 = vld [vmem:[%s16234_s7 + $0x1198] sm:$0xff]  ;;  %v10281_v31 = vld [vmem:[%s16238_s11 + $0x30] sm:$0xff] }
 0x5b0   : > { %12463 = vmatpush3.bf16.msra.mxu0 %v12462_v33  ;;  %v11278_v33 = vld [vmem:[%s16234_s7 + $0x10f8] sm:$0xff]  ;;  %v12537_v51 = vpack.c.bf16 %v11299_v50, %v11298_v41 }
 0x5b1   : > { %12465 = vmatprep.subr.bf16.mxu0 %v12464_v35  ;;  %v11279_v35 = vld [vmem:[%s16234_s7 + $0x1100] sm:$0xff] }
 0x5b2   : > { %v12530_v36 = vpack.c.bf16 %v11279_v35, %v11278_v33 }
 0x5b4   : > { %12467 = vmatpush3.bf16.msra.mxu0 %v12466_v47  ;;  %v11280_v47 = vld [vmem:[%s16234_s7 + $0x1108] sm:$0xff] }
 0x5b5   : > { %12469 = vmatprep.subr.bf16.mxu0 %v12468_v48  ;;  %v11281_v48 = vld [vmem:[%s16234_s7 + $0x1110] sm:$0xff] }
 0x5b6   : > { %v12534_v49 = vpack.c.bf16 %v11281_v48, %v11280_v47 }
 0x5b8   : > { %12471 = vmatpush3.bf16.msra.mxu0 %v12470_v52  ;;  %v9828_v52 = vrot.slane %v14995_v21, 3  ;;  %v11302_v21 = vld [vmem:[%s16234_s7 + $0x11b8] sm:$0xff] }
 0x5b9   : > { %12505 = vmatprep.subr.bf16.mxu0 %v12504_v55  ;;  %v11300_v55 = vld [vmem:[%s16234_s7 + $0x11a8] sm:$0xff] }
 0x5ba   : > { %v12540_v56 = vpack.c.bf16 %v11301_v25, %v11300_v55 }
 0x5bb   : > { %9981 = vmatmul.mubr.f32.vlgmr.msra.gmra.mrb[22].mxu0 %v9824_v63  ;;  %v11305_v63 = vld [vmem:[%s16234_s7 + $0x11d0] sm:$0xff] }
 0x5bc   : > { %12507 = vmatpush3.bf16.msra.mxu0 %v12506_v53  ;;  %10120 = vmatprep.mubr.f32.mxu0 %v9829_v34  ;;  %v12543_v53 = vpack.c.bf16 %v11303_v60, %v11302_v21  ;;  %v12549_v34 = vpack.c.bf16 %v11307_v3, %v11306_v2  ;;  %v10276_v60 = vld [vmem:[%s16238_s11 + $0x8] sm:$0xff]  ;;  %v10200_v2 = vld [vmem:[%s16237_s10] sm:$0x1] }
 0x5bd   : > { %12509 = vmatprep.subr.bf16.mxu0 %v12508_v1  ;;  %v12546_v1 = vpack.c.bf16 %v11305_v63, %v11304_v26 }
 0x5c0   : > { %12511 = vmatpush3.bf16.msra.mxu0 %v12510_v61 }
 0x5c1   : > { %12513 = vmatprep.subr.bf16.mxu0 %v12512_v57 }
 0x5c4   : > { %12515 = vmatpush3.bf16.msra.mxu0 %v12514_v7 }
 0x5c5   : > { %12517 = vmatprep.subr.bf16.mxu0 %v12516_v10  ;;  %v11310_v10 = vld [vmem:[%s16234_s7 + $0x11f8] sm:$0xff] }
 0x5c6   : > { %v12555_v14 = vpack.c.bf16 %v11311_v11, %v11310_v10  ;;  %v10437_v11 = vld [vmem:[%s16240_s13 + $0x20] sm:$0xff] }
 0x5c8   : > { %12519 = vmatpush3.bf16.msra.mxu0 %v12518_v15  ;;  %v11312_v15 = vld [vmem:[%s16234_s7 + $0x1208] sm:$0xff] }
 0x5c9   : > { %12521 = vmatprep.subr.bf16.mxu0 %v12520_v16  ;;  %v11313_v16 = vld [vmem:[%s16234_s7 + $0x1210] sm:$0xff] }
 0x5ca   : > { %v12558_v17 = vpack.c.bf16 %v11313_v16, %v11312_v15 }
 0x5cb   : > { %v11742_v27 = vpop.f32.mrb[26].mxu1 }
 0x5cc   : > { %v11743_v28 = vpop.f32.mrb[27].mxu1  ;;  %12523 = vmatpush3.bf16.msra.mxu0 %v12522_v37 }
 0x5cd   : > { %v15972_v30 = vadd.f32 %v11743_v28, %v11742_v27  ;;  %12525 = vmatprep.subr.bf16.mxu0 %v12524_v8  ;;  %v10280_v28 = vld [vmem:[%s16238_s11 + $0x28] sm:$0xff] }
 0x5d0   : > { %12527 = vmatpush3.bf16.msra.mxu0 %v12526_v13 }
 0x5d1   : > { %12529 = vmatprep.subr.bf16.mxu0 %v12528_v39 }
 0x5d4   : > { %12531 = vmatpush3.bf16.msra.mxu0 %v12530_v36  ;;  %v12564_v36 = vpack.c.bf16 %v10282_v44, %v10281_v31 }
 0x5d5   : > { %12533 = vmatprep.subr.bf16.mxu0 %v12532_v46 }
 0x5d8   : > { %12535 = vmatpush3.bf16.msra.mxu0 %v12534_v49 }
 0x5d9   : > { %12536 = vmatprep.subr.bf16.mxu0 %v12935_v22 }
 0x5db   : > { %10121 = vmatmul.mubr.f32.vlgmr.msra.gmra.mrb[24].mxu0 %v9828_v52 }
 0x5dc   : > { %12538 = vmatpush1.bf16.msra.mxu0 %v12537_v51  ;;  %11316 = vmatprep.mubr.msk.f32.mxu0 %vm8266_vm15, %v9831_v24 }
 0x5dd   : > { %12539 = vmatprep.subr.bf16.mxu0 %v12935_v22 }
 0x5e0   : > { %12541 = vmatpush1.bf16.msra.mxu0 %v12540_v56 }
 0x5e1   : > { %12542 = vmatprep.subr.bf16.mxu0 %v12935_v22 }
 0x5e4   : > { %12544 = vmatpush1.bf16.msra.mxu0 %v12543_v53 }
 0x5e5   : > { %12545 = vmatprep.subr.bf16.mxu0 %v12935_v22 }
 0x5e8   : > { %12547 = vmatpush1.bf16.msra.mxu0 %v12546_v1 }
 0x5e9   : > { %12548 = vmatprep.subr.bf16.mxu0 %v12935_v22 }
 0x5ea   : > { %v11532_v61 = vpop.f32.mrb[16].mxu0 }
 0x5eb   : > { %v11777_v57 = vpop.f32.mrb[28].mxu1  ;;  %v11533_v4 = vpop.f32.mrb[17].mxu0 }
 0x5ec   : > { %v11534_v40 = vadd.f32 %v11533_v4, %v11532_v61  ;;  %v11778_v5 = vpop.f32.mrb[29].mxu1  ;;  %12550 = vmatpush1.bf16.msra.mxu0 %v12549_v34  ;;  %v10277_v34 = vld [vmem:[%s16238_s11 + $0x10] sm:$0xff]  ;;  %v10434_v4 = vld [vmem:[%s16240_s13 + $0x8] sm:$0xff] }
 0x5ed   : > { %v11779_v7 = vadd.f32 %v11778_v5, %v11777_v57  ;;  %12551 = vmatprep.subr.bf16.mxu0 %v12935_v22  ;;  %v12570_v61 = vpack.c.bf16 %v10278_v58, %v10277_v34  ;;  %v10433_v57 = vld [vmem:[%s16240_s13] sm:$0xff] }
 0x5ee   : > { %v8941_v12 = vadd.f32 %v11534_v40, %v15588_v59  ;;  %v11314_v59 = vld [vmem:[%s16234_s7 + $0x1218] sm:$0x1]  ;;  %v12573_v5 = vpack.c.bf16 %v10434_v4, %v10433_v57 }
 0x5f0   : > { %12553 = vmatpush1.bf16.msra.mxu0 %v12552_v6  ;;  %v9011_v32 = vadd.f32 %v15692_v62, %v8941_v12  ;;  %v9830_v62 = vrot.slane %v15174_v0, 3  ;;  %v10279_v0 = vld [vmem:[%s16238_s11 + $0x20] sm:$0xff]  ;;  %v10435_v6 = vld [vmem:[%s16240_s13 + $0x10] sm:$0xff] }
 0x5f1   : > { %12554 = vmatprep.subr.bf16.mxu0 %v12935_v22  ;;  %v12561_v13 = vpack.c.bf16 %v10280_v28, %v10279_v0 }
 0x5f3   : > { %12562 = vmatpush3.bf16.msra.mxu1 %v12561_v13 }
 0x5f4   : > { %12556 = vmatpush1.bf16.msra.mxu0 %v12555_v14  ;;  %12563 = vmatprep.subr.bf16.mxu1 %v12935_v22  ;;  %v10439_v14 = vld [vmem:[%s16240_s13 + $0x30] sm:$0xff] }
 0x5f5   : > { %12557 = vmatprep.subr.bf16.mxu0 %v12935_v22 }
 0x5f7   : > { %12565 = vmatpush3.bf16.msra.mxu1 %v12564_v36 }
 0x5f8   : > { %12559 = vmatpush1.bf16.msra.mxu0 %v12558_v17  ;;  %12566 = vmatprep.subr.bf16.mxu1 %v12935_v22 }
 0x5f9   : > { %10158 = vmatprep.subr.mxu0 %v13670_v38 }
 0x5fc   : > { %11315 = vmatpush1.msk.msra.mxu0 %vm8270_vm0, %v11314_v59 }
 0x5fd   : > { %10191 = vmatmul.mubr.f32.vlgmr.msra.gmra.mrb[14].mxu0 %v9830_v62  ;;  %v10430_v62 = vld [vmem:[%s16239_s12] sm:$0x1] }
 0x60a   : > { %v11602_v9 = vpop.f32.mrb[18].mxu0 }
 0x60b   : > { %v11847_v19 = vpop.f32.mrb[30].mxu1  ;;  %v11603_v37 = vpop.f32.mrb[19].mxu0 }
 0x60c   : > { %v11604_v8 = vadd.f32 %v11603_v37, %v11602_v9  ;;  %v11848_v20 = vpop.f32.mrb[31].mxu1  ;;  %v10441_v37 = vld [vmem:[%s16241_s14] sm:$0x1] }
 0x60d   : > { %v11849_v29 = vadd.f32 %v11848_v20, %v11847_v19 }
 0x60e   : > { %v9081_v23 = vadd.f32 %v11604_v8, %v9011_v32  ;;  %v10440_v32 = vld [vmem:[%s16240_s13 + $0x38] sm:$0xff] }
 0x60f   : > { %v12582_v15 = vpack.c.bf16 %v10440_v32, %v10439_v14 }
 0x610   : > { %v12589_v27 = vadd.f32 %v12588_v54, %v9081_v23 }
 0x630   : > { %v10270_v48 = vpop.f32.mrb[32].mxu1 }
 0x631   : > { %v11910_v49 = vpop.f32.mrb[33].mxu1  ;;  %v10271_v43 = vadd.f32 %v10270_v48, %v10200_v2 }
 0x633   : > { %v10274_v40 = vmax.f32 %v10271_v43, 0.0 }
 0x64c   : > { %v11707_v39 = vpop.f32.mrb[20].mxu0 }
 0x64d   : > { %v11708_v33 = vpop.f32.mrb[21].mxu0 }
 0x64e   : > { %v11709_v35 = vadd.f32 %v11708_v33, %v11707_v39 }
 0x650   : > { %v9532_v42 = vadd.f32 %v11709_v35, %v15878_v45 }
 0x652   : > { %v9602_v46 = vadd.f32 %v15972_v30, %v9532_v42  ;;  %v10275_v30 = vld [vmem:[%s16238_s11] sm:$0xff] }
 0x653   : > { %v12567_v1 = vpack.c.bf16 %v10276_v60, %v10275_v30 }
 0x654   : > { %v12590_v47 = vadd.f32 %v12589_v27, %v9602_v46 }
 0x68e   : > { %v11812_v41 = vpop.f32.mrb[22].mxu0 }
 0x68f   : > { %v11813_v50 = vpop.f32.mrb[23].mxu0 }
 0x690   : > { %v11814_v45 = vadd.f32 %v11813_v50, %v11812_v41 }
 0x692   : > { %v9983_v51 = vadd.f32 %v11814_v45, %v11779_v7  ;;  %v10436_v7 = vld [vmem:[%s16240_s13 + $0x18] sm:$0xff] }
 0x693   : > { %v12576_v10 = vpack.c.bf16 %v10436_v7, %v10435_v6 }
 0x694   : > { %v10053_v52 = vadd.f32 %v11849_v29, %v9983_v51 }
 0x6ae   : > { %v11882_v55 = vpop.f32.mrb[24].mxu0 }
 0x6af   : > { %v11883_v25 = vpop.f32.mrb[25].mxu0 }
 0x6b0   : > { %v11884_v24 = vadd.f32 %v11883_v25, %v11882_v55 }
 0x6b2   : > { %v10123_v56 = vadd.f32 %v11884_v24, %v10053_v52 }
 0x6b4   : > { %v12591_v21 = vadd.f32 %v12590_v47, %v10123_v56 }
 0x6d0   : > { %v10192_v53 = vpop.f32.mrb[14].mxu0 }
 0x6d1   : > { %v12592_v26 = vadd.f32 %v12591_v21, %v10192_v53  ;;  %v10194_v63 = vpop.f32.mrb[15].mxu0 }
 0x6d3   : > { %v10197_v3 = vmax.f32 %v12592_v26, 0.0 }
 0x6d5   : > { %11920 = vmatmul.mubr.msk.f32.vlgmr.msra.gmra.mrb[34].mxu1 %vm10283_vm2, %v10197_v3 }
 0x6d6   : > { %12568 = vmatpush3.bf16.msra.mxu1 %v12567_v1  ;;  %11930 = vmatprep.mubr.msk.f32.mxu1 %vm12936_vm1, %v13670_v38 }
 0x6d7   : > { %12569 = vmatprep.subr.bf16.mxu1 %v12935_v22 }
 0x6da   : > { %12571 = vmatpush3.bf16.msra.mxu1 %v12570_v61 }
 0x6db   : > { %12572 = vmatprep.subr.bf16.mxu1 %v12935_v22 }
 0x6dd   : > { %11931 = vmatmul.mubr.msk.f32.vlgmr.msra.gmra.mrb[36].mxu1 %vm10283_vm2, %v10274_v40 }
 0x6de   : > { %12574 = vmatpush3.bf16.msra.mxu1 %v12573_v5  ;;  %11949 = vmatprep.mubr.msk.f32.mxu1 %vm12936_vm1, %v13670_v38  ;;  %v10438_v38 = vld [vmem:[%s16240_s13 + $0x28] sm:$0xff] }
 0x6df   : > { %12575 = vmatprep.subr.bf16.mxu1 %v12935_v22  ;;  %v12579_v12 = vpack.c.bf16 %v10438_v38, %v10437_v11 }
 0x6e2   : > { %12577 = vmatpush3.bf16.msra.mxu1 %v12576_v10 }
 0x6e3   : > { %12578 = vmatprep.subr.bf16.mxu1 %v12935_v22 }
 0x6e6   : > { %12580 = vmatpush3.bf16.msra.mxu1 %v12579_v12 }
 0x6e7   : > { %12581 = vmatprep.subr.bf16.mxu1 %v12935_v22 }
 0x6ea   : > { %12583 = vmatpush3.bf16.msra.mxu1 %v12582_v15 }
 0x7a8   : > { %v10353_v16 = vpop.f32.mrb[34].mxu1 }
 0x7a9   : > { %v11921_v17 = vpop.f32.mrb[35].mxu1 }
 0x7b0   : > { %v10426_v59 = vpop.f32.mrb[36].mxu1 }
 0x7b1   : > { %v10427_v9 = vadd.f32 %v10426_v59, %v10353_v16  ;;  %v11932_v18 = vpop.f32.mrb[37].mxu1 }
 0x7b3   : > { %v10431_v22 = vadd.f32 %v10430_v62, %v10427_v9 }
 0x7b5   : > { %v10432_v19 = vmax.f32 %v10431_v22, 0.0 }
 0x7b7   : > { %11950 = vmatmul.mubr.msk.f32.vlgmr.msra.gmra.mrb[38].mxu1 %vm10442_vm3, %v10432_v19 }
 0x88a   : > { %v10512_v8 = vpop.f32.mrb[38].mxu1 }
 0x88b   : > { %v10513_v20 = vadd.f32 %v10512_v8, %v10441_v37  ;;  %v11951_v29 = vpop.f32.mrb[39].mxu1 }
 0x88d   : > { %v10530_v54 = vsel %vm10529_vm4, %v10513_v20, -inf  ;;  %v10517_v13 = vsel %vm10516_vm5, %v10513_v20, -inf }
 0x88e   : > { %10531 = vmax.xlane.f32.xlu1 %v10530_v54 }
 0x91b   : > { %v10532_v23 = vpop.xlane.xlu1 %10531 }
 0x91c   : > { %v10533_v27 = vsub.f32 %v10513_v20, %v10532_v23 }
 0x91e   : > { %v10534_v0 = vmul.f32 1.442695, %v10533_v27 }
 0x920   : > { %12819 = vpow2.f32 %v10534_v0 }
 0x92a   : > { %v12820_v28 = vpop.eup %12819 }
 0x92b   : > { %10537 = vrot.lane.b32.xlu0 %v12820_v28, %s16277_s30 }
 0x94a   : > { %10518 = vmax.xlane.f32.xlu0 %v10517_v13 }
 0x99d   : > { %v10538_v39 = vpop.permute.xlu0 %10537 }
 0x99e   : > { %v10541_v33 = vsel %vm10540_vm6, %v10538_v39, 0.0 }
 0x99f   : > { %10542 = vadd.xlane.f32.xlu1 %v10541_v33 }
 0x9d7   : > { %v10519_v35 = vpop.xlane.xlu0 %10518 }
 0x9d8   : > { %v10520_v42 = vsub.f32 %v10513_v20, %v10519_v35 }
 0x9da   : > { %v10521_v31 = vmul.f32 1.442695, %v10520_v42 }
 0x9dc   : > { %12821 = vpow2.f32 %v10521_v31 }
 0x9e6   : > { %v12822_v44 = vpop.eup %12821 }
 0x9e7   : > { %v10523_v36 = vsel %vm10516_vm5, %v12822_v44, 0.0 }
 0x9e8   : > { %10524 = vadd.xlane.f32.xlu0 %v10523_v36 }
 0xa2c   : > { %v10543_v46 = vpop.xlane.xlu1 %10542 }
 0xa2d   : > { %12823 = vrcp.f32 %v10543_v46 }
 0xa37   : > { %v12824_v47 = vpop.eup %12823 }
 0xa38   : > { %v10545_v48 = vmul.f32 %v12824_v47, %v12820_v28 }
 0xa3a   : > { %10547 = vrot.lane.b32.xlu1 %v10545_v48, %s16277_s30  ;;  %s12834_s30 = scalar_lea.vmem %s12833_s20, 32 }
 0xa3b   : > { %p12836_p1 = scmp.lt.s32.totalorder %s12834_s30, %s12828_s26 }
 0xa3d   : > { %p12837_p2 = por %p12836_p1, %p12835_p0 }
 0xa3f   : > { %p12838_p3 = pnand %p12837_p2, %p12831_p13 }
 0xa75   : > { %v10525_v49 = vpop.xlane.xlu0 %10524 }
 0xa76   : > { %12825 = vrcp.f32 %v10525_v49 }
 0xa80   : > { %v12826_v41 = vpop.eup %12825 }
 0xa81   : > { %v10527_v50 = vmul.f32 %v12826_v41, %v12822_v44 }
 0xa83   : > { %10528 = vst.msk [vmem:[%s528_s1] sm:$0x1] %vm10516_vm5, %v10527_v50 }
 0xa84   : > { %12841 = shalt.err (!%p12838_p3)
}
 0xa85   : > { %s12842_s1 = scalar_lea.hbm %s16150_s4, 16  ;;  %s12846_s29 = scalar_lea.hbm %s16242_s15, 32 }
 0xa86   : > { %p12843_p4 = scmp.ne.s32.totalorder %s16150_s4, %s12842_s1  ;;  %p12847_p9 = scmp.lt.u32.totalorder %s16150_s4, %s16242_s15 }
 0xa87   : > { %p12848_p10 = scmp.lt.u32.totalorder %s12846_s29, %s12842_s1  ;;  %p12850_p12 = scmp.lt.u32.totalorder %s12842_s1, %s16150_s4 }
 0xa88   : > { %p12844_p7 = pnand %p12843_p4, %p13062_p5 }
 0xa89   : > { %p12849_p11 = por %p12848_p10, %p12847_p9 }
 0xa8a   : > { %p12845_p8 = pneg %p12844_p7 }
 0xa8b   : > { %p12851_p13 = por %p12850_p12, %p12849_p11 }
 0xa8d   : > { %p12852_p0 = pnand %p12851_p13, %p12845_p8 }
 0xa8f   : > { %12855 = shalt.err (!%p12852_p0)
}
 0xa90   : > { %12756 = dma.vmem_to_hbm [thread:$0]  (%p13062_p5), %s16152_s5, 16, %s16150_s4, %s10552_s18  }
 0xa91   : > { %s534_s26 = scalar_lea.vmem [#allocation5], %s16141_s28  ;;  %s16278_s2 = sshll.u32 %s13045_s25, 4 }
 0xa92   : > { %s10581_s30 = sshll.u32 %s534_s26, 4  ;;  %s16183_s29 = scalar_lea.hbm %s16243_s16, %s16278_s2  ;;  %s16185_s30 = int_to_ptr.vmem [resolvable:$true] %s10581_s30 }
 0xa93   : > { %s10556_s1 = scalar_lea.sflag [#allocation6], %s16141_s28  ;;  %s12856_s20 = scalar_lea.vmem %s16185_s30, 16 }
 0xa94   : > { %p12857_p1 = scmp.ne.s32.totalorder %s16185_s30, %s12856_s20  ;;  %s12938_s25 = smov [#allocation5]  }
 0xa95   : > { %s12860_s5 = sshll.u32 %s12938_s25, 4  ;;  %s12861_s5 = int_to_ptr.vmem [resolvable:$false] %s12860_s5 }
 0xa96   : > { %p12858_p2 = pnand %p12857_p1, %p13062_p5  ;;  %s12862_s4 = scalar_lea.vmem %s12861_s5, 32 }
 0xa97   : > { %p12863_p4 = scmp.lt.s32.totalorder %s16185_s30, %s12861_s5  ;;  %p12864_p7 = scmp.lt.s32.totalorder %s12862_s4, %s12856_s20 }
 0xa98   : > { %p12859_p3 = pneg %p12858_p2 }
 0xa99   : > { %p12865_p8 = por %p12864_p7, %p12863_p4 }
 0xa9b   : > { %p12866_p9 = pnand %p12865_p8, %p12859_p3 }
 0xaac   : > { %v10548_v45 = vpop.permute.xlu1 %10547 }
 0xaad   : > { %10550 = vst.msk [vmem:[%s534_s26] sm:$0x1] %vm10540_vm6, %v10548_v45 }
 0xaae   : > { %12869 = shalt.err (!%p12866_p9)
}
 0xaaf   : > { %s12870_s28 = scalar_lea.hbm %s16183_s29, 16  ;;  %s12874_s2 = scalar_lea.hbm %s16243_s16, 32 }
 0xab0   : > { %p12871_p10 = scmp.ne.s32.totalorder %s16183_s29, %s12870_s28  ;;  %p12875_p13 = scmp.lt.u32.totalorder %s16183_s29, %s16243_s16 }
 0xab1   : > { %p12876_p0 = scmp.lt.u32.totalorder %s12874_s2, %s12870_s28  ;;  %p12878_p2 = scmp.lt.u32.totalorder %s12870_s28, %s16183_s29 }
 0xab2   : > { %p12872_p11 = pnand %p12871_p10, %p13062_p5 }
 0xab3   : > { %p12877_p1 = por %p12876_p0, %p12875_p13 }
 0xab4   : > { %p12873_p12 = pneg %p12872_p11 }
 0xab5   : > { %p12879_p3 = por %p12878_p2, %p12877_p1 }
 0xab7   : > { %p12880_p4 = pnand %p12879_p3, %p12873_p12 }
 0xab9   : > { %12883 = shalt.err (!%p12880_p4)
}
 0xaba   : > { %12757 = dma.vmem_to_hbm [thread:$0]  (%p13062_p5), %s16185_s30, 16, %s16183_s29, %s10556_s1  }
 0xabb PF: > { %p12767_p7 = scmp.ge.s32.totalorder %s12922_s24, 2  ;;  %s10593_s20 = sand.u32 1, %s12910_s21  }
 0xabc   : > { %s10594_s25 = scalar_lea.sflag [#allocation4], %s10593_s20 }
 0xabd   : > { %p12761_p8 = pnand %p12767_p7, %p13066_p6 }
 0xabf   : > { %12901 = dma.done.wait (!%p12761_p8), %s10594_s25, 16  }
 0xac0   : > { %12903 = vsyncadd (!%p12761_p8), %s10594_s25, 4294967280  ;;  %s10602_s5 = scalar_lea.sflag [#allocation6], %s10593_s20 }
 0xac1   : > { %12905 = dma.done.wait (!%p12761_p8), %s10602_s5, 16  }
 0xac2   : > { %12907 = vsyncadd (!%p12761_p8), %s10602_s5, 4294967280  ;;  %s16279_s0 = sld [smem:[#allocation9_spill]]  ;;  %p30_p5 = scmp.ge.s32.totalorder %s13049_s27, 4  }
 0xac3   : > { %s16280_s21 = smov %s12914_s22  ;;  %s16281_s22 = smov %s12918_s23 }
 0xac4   : > { %s16283_s24 = smov %s13049_s27  ;;  %32 = sbr.rel (!%p30_p5) target bundleno = 12 (0xc), region = 154 }
 0xac8   : > { %s16282_s23 = smov %s16279_s0 }
 0xacb   :  { %10606 = vsyncpa [#allocation4], 1 }
 0xacc   :  { %10608 = vsyncpa [#allocation4 + $0x1], 1 }
 0xacd   :  { %10609 = vsyncpa [#allocation6], 1 }
 0xace   :  { %10611 = vsyncpa [#allocation6 + $0x1], 1 }

</bundles_post_ra>
